<compile_context>
chip_gen: v6e
topology: v6e:2x2x1
jax: 0.10.0
libtpu: 0.0.40
codegen_flags: <defaults>
</compile_context>

<pallas_src>
import jax
import jax.numpy as jnp
from jax.experimental import pallas as pl
from jax.experimental.pallas import tpu as pltpu


def gru_interest_extraction_kernel(x_ref, len_ref, w_ih_ref, w_hh_ref, b_ref,
                                   seq_ref, final_ref):
    """One grid step = one batch tile.

    x_ref    : (S, B_T, I)  time-major inputs (f32)
    len_ref  : (B_T, 1)     int32 lengths
    w_ih_ref : (I, 3H)      fused input->hidden gate weights, gate order [r|z|n]
    w_hh_ref : (H, 3H)      fused hidden->hidden gate weights, gate order [r|z|n]
    b_ref    : (2, 3H)      row 0 = b_ih, row 1 = b_hh
    seq_ref  : (B_T, S*H)   lane-dense flattened hidden states (time-major in lanes)
    final_ref: (B_T, H)     final hidden state
    """
    S, B_T, I = x_ref.shape
    H3 = w_hh_ref.shape[1]
    H = H3 // 3

    biases = b_ref[...]
    b_ih = biases[0:1, :]               # (1, 3H)
    b_hh = biases[1:2, :]               # (1, 3H)

    # ---- hoisted, fused input->hidden projection ---------------------------
    # One (S*B_T, I) @ (I, 3H) MXU matmul covers every time step and all three
    # gates. Time-major layout => merging (S, B_T) is a sublane-aligned
    # restack, and per-step slices below are contiguous 8-aligned row blocks.
    x2 = x_ref[...].reshape(S * B_T, I)
    gx = jnp.dot(x2, w_ih_ref[...], preferred_element_type=jnp.float32) + b_ih

    w_hh = w_hh_ref[...]                # (H, 3H), VMEM resident
    lengths = len_ref[...]              # (B_T, 1) int32

    # ---- sequential GRU recurrence over time --------------------------------
    # S is small and static here, so the fully unrolled Python loop gives the
    # scheduler maximum visibility; only the fused h @ W_hh matmul and the
    # gate element-wise math remain on the serial chain.
    h = jnp.zeros((B_T, H), dtype=jnp.float32)
    outs = []
    for t in range(S):
        gx_t = gx[t * B_T:(t + 1) * B_T, :]                       # aligned slice
        gh = jnp.dot(h, w_hh, preferred_element_type=jnp.float32) + b_hh
        r = jax.nn.sigmoid(gx_t[:, :H] + gh[:, :H])
        z = jax.nn.sigmoid(gx_t[:, H:2 * H] + gh[:, H:2 * H])
        n = jnp.tanh(gx_t[:, 2 * H:] + r * gh[:, 2 * H:])
        h_new = (1.0 - z) * n + z * h

        m = (lengths > t).astype(jnp.float32)                     # (B_T, 1)
        h = h + m * (h_new - h)                                   # freeze padded rows
        outs.append(m * h_new)                                    # zero padded steps

    final_ref[...] = h
    # Single lane-dense store (B_T, S*H) instead of S masked 32-lane stores.
    seq_ref[...] = jnp.concatenate(outs, axis=-1)


def interest_extraction_forward(inputs, lengths, params, *, batch_tile=None):
    """Pallas forward: returns (hidden_states (B,S,H), final_state (B,H))."""
    B, S, I = inputs.shape
    H3 = params["w_hh"].shape[1]
    H = H3 // 3
    if batch_tile is None:
        batch_tile = B
    assert B % batch_tile == 0 and batch_tile % 8 == 0, \
        "batch_tile must divide B and be a multiple of 8 (sublane width)"

    # Time-major inputs: transpose once in the wrapper (outside the kernel).
    x_tm = jnp.transpose(inputs.astype(jnp.float32), (1, 0, 2))   # (S, B, I)
    lengths2 = lengths.astype(jnp.int32).reshape(B, 1)

    def _const_spec(shape):
        # Full-array block, same block every grid step -> stays VMEM resident.
        return pl.BlockSpec(shape, lambda i, _s=shape: (0,) * len(_s))

    in_specs = [
        pl.BlockSpec((S, batch_tile, I), lambda i: (0, i, 0)),    # inputs (time-major)
        pl.BlockSpec((batch_tile, 1), lambda i: (i, 0)),          # lengths
        _const_spec((I, H3)),                                     # W_ih
        _const_spec((H, H3)),                                     # W_hh
        _const_spec((2, H3)),                                     # biases
    ]
    out_specs = (
        pl.BlockSpec((batch_tile, S * H), lambda i: (i, 0)),      # hidden (lane-dense)
        pl.BlockSpec((batch_tile, H), lambda i: (i, 0)),          # final state
    )
    out_shape = (
        jax.ShapeDtypeStruct((B, S * H), jnp.float32),
        jax.ShapeDtypeStruct((B, H), jnp.float32),
    )

    # Explicit VMEM budget (v7x has 64 MiB/TC): double-buffered in/out tiles,
    # resident weights, and the live fused gate projections, with 2x headroom.
    est_bytes = 4 * (2 * batch_tile * S * I
                     + 2 * batch_tile * (S * H + H)
                     + I * H3 + H * H3 + 2 * H3
                     + S * batch_tile * H3)
    vmem_limit = int(min(64 << 20, max(32 << 20, 2 * est_bytes)))

    hidden_flat, final = pl.pallas_call(
        gru_interest_extraction_kernel,
        grid=(B // batch_tile,),
        in_specs=in_specs,
        out_specs=out_specs,
        out_shape=out_shape,
        compiler_params=pltpu.CompilerParams(
            dimension_semantics=("parallel",),     # megacore-shardable on v7x
            vmem_limit_bytes=vmem_limit),
    )(x_tm, lengths2, params["w_ih"], params["w_hh"], params["b"])

    return hidden_flat.reshape(B, S, H), final


def reference(inputs, lengths, params):
    """Pure-JAX reference matching the PyTorch packed-GRU forward."""
    B, S, I = inputs.shape
    W_ih, W_hh, b = params["w_ih"], params["w_hh"], params["b"]
    H = W_hh.shape[0]
    b_ih, b_hh = b[0], b[1]
    h = jnp.zeros((B, H), jnp.float32)
    outs = []
    for t in range(S):
        gx = inputs[:, t, :] @ W_ih + b_ih
        gh = h @ W_hh + b_hh
        r = jax.nn.sigmoid(gx[:, :H] + gh[:, :H])
        z = jax.nn.sigmoid(gx[:, H:2 * H] + gh[:, H:2 * H])
        n = jnp.tanh(gx[:, 2 * H:] + r * gh[:, 2 * H:])
        h_new = (1.0 - z) * n + z * h
        valid = (t < lengths)[:, None]
        h = jnp.where(valid, h_new, h)
        outs.append(jnp.where(valid, h_new, jnp.zeros_like(h_new)))
    return jnp.stack(outs, axis=1), h


def make_params(key, input_size, hidden_size):
    """Deterministic synthetic GRU weights (xavier-normal, like the module),
    already fused: W_ih (I,3H), W_hh (H,3H), biases (2,3H) with gate order r,z,n."""
    I, H = input_size, hidden_size
    k = jax.random.split(key, 4)
    std_ih = (2.0 / (3 * H + I)) ** 0.5     # xavier_normal_ on weight_ih (3H, I)
    std_hh = (2.0 / (3 * H + H)) ** 0.5     # xavier_normal_ on weight_hh (3H, H)
    b_scale = 1.0 / (H ** 0.5)
    w_ih = (std_ih * jax.random.normal(k[0], (I, 3 * H))).astype(jnp.float32)
    w_hh = (std_hh * jax.random.normal(k[1], (H, 3 * H))).astype(jnp.float32)
    b_ih = b_scale * jax.random.uniform(k[2], (3 * H,), minval=-1.0, maxval=1.0)
    b_hh = b_scale * jax.random.uniform(k[3], (3 * H,), minval=-1.0, maxval=1.0)
    b = jnp.stack([b_ih, b_hh], axis=0).astype(jnp.float32)
    return {"w_ih": w_ih, "w_hh": w_hh, "b": b}


if __name__ == "__main__":
    B, S, I, H = 32, 16, 32, 32
    batch_tile = 16                       # grid=(2,); multiple of 8 sublanes

    key = jax.random.PRNGKey(0)
    k_params, k_x, k_len = jax.random.split(key, 3)

    params = make_params(k_params, I, H)
    inputs = jax.random.normal(k_x, (B, S, I), dtype=jnp.float32)
    # Deterministic lengths in [1, S]; force at least one full-length row so
    # the padded output width matches pad_packed_sequence exactly.
    lengths = jax.random.randint(k_len, (B,), 1, S + 1, dtype=jnp.int32)
    lengths = lengths.at[0].set(S)

    hidden, final = interest_extraction_forward(
        inputs, lengths, params, batch_tile=batch_tile)
    hidden = jax.block_until_ready(hidden)
    final = jax.block_until_ready(final)

    ref_hidden, ref_final = reference(inputs, lengths, params)
    assert hidden.shape == (B, S, H) and final.shape == (B, H)
    assert jnp.allclose(hidden, ref_hidden, atol=1e-4, rtol=1e-4), \
        "hidden_states mismatch vs reference"
    assert jnp.allclose(final, ref_final, atol=1e-4, rtol=1e-4), \
        "final_state mismatch vs reference"

    print("KERNEL_OK")
</pallas_src>

<mosaic_0001>
module attributes {stable_mosaic.version = 11 : i64} {
  func.func @gru_interest_extraction_kernel(%arg0: i32, %arg1: memref<16x16x32xf32, #tpu.memory_space<vmem>>, %arg2: memref<16x1xi32, #tpu.memory_space<vmem>>, %arg3: memref<32x96xf32, #tpu.memory_space<vmem>>, %arg4: memref<32x96xf32, #tpu.memory_space<vmem>>, %arg5: memref<2x96xf32, #tpu.memory_space<vmem>>, %arg6: memref<16x512xf32, #tpu.memory_space<vmem>>, %arg7: memref<16x32xf32, #tpu.memory_space<vmem>>) attributes {dimension_semantics = [#tpu.dimension_semantics<parallel>], iteration_bounds = array<i64: 2>, scalar_prefetch = 0 : i64, scratch_operands = 0 : i64, tpu.core_type = #tpu.core_type<tc>, window_params = [{transform_indices = @transform_0, window_bounds = array<i64: 16, 16, 32>}, {transform_indices = @transform_1, window_bounds = array<i64: 16, 1>}, {pipeline_mode = #tpu.pipeline_mode<synchronous>, transform_indices = @transform_2, window_bounds = array<i64: 32, 96>}, {pipeline_mode = #tpu.pipeline_mode<synchronous>, transform_indices = @transform_3, window_bounds = array<i64: 32, 96>}, {pipeline_mode = #tpu.pipeline_mode<synchronous>, transform_indices = @transform_4, window_bounds = array<i64: 2, 96>}, {transform_indices = @transform_5, window_bounds = array<i64: 16, 512>}, {transform_indices = @transform_6, window_bounds = array<i64: 16, 32>}]} {
    %c0 = arith.constant 0 : index
    %c0_0 = arith.constant 0 : index
    %0 = vector.load %arg5[%c0, %c0_0] : memref<2x96xf32, #tpu.memory_space<vmem>>, vector<2x96xf32>
    %1 = vector.extract_strided_slice %0 {offsets = [0, 0], sizes = [1, 96], strides = [1, 1]} : vector<2x96xf32> to vector<1x96xf32>
    %2 = vector.extract_strided_slice %0 {offsets = [1, 0], sizes = [1, 96], strides = [1, 1]} : vector<2x96xf32> to vector<1x96xf32>
    %c0_1 = arith.constant 0 : index
    %c0_2 = arith.constant 0 : index
    %c0_3 = arith.constant 0 : index
    %3 = vector.load %arg1[%c0_1, %c0_2, %c0_3] : memref<16x16x32xf32, #tpu.memory_space<vmem>>, vector<16x16x32xf32>
    %4 = vector.shape_cast %3 : vector<16x16x32xf32> to vector<256x32xf32>
    %c0_4 = arith.constant 0 : index
    %c0_5 = arith.constant 0 : index
    %5 = vector.load %arg3[%c0_4, %c0_5] : memref<32x96xf32, #tpu.memory_space<vmem>>, vector<32x96xf32>
    %cst = arith.constant dense<0.000000e+00> : vector<256x96xf32>
    %6 = tpu.matmul %4, %5, %cst {dimension_numbers = #tpu.dot_dimension_numbers<[1], [0], [0], [1], [0, 0, 1, 1], [], []>} : vector<256x32xf32>, vector<32x96xf32>, vector<256x96xf32> -> vector<256x96xf32>
    %7 = vector.broadcast %1 : vector<1x96xf32> to vector<256x96xf32>
    %8 = arith.addf %6, %7 : vector<256x96xf32>
    %c0_6 = arith.constant 0 : index
    %c0_7 = arith.constant 0 : index
    %9 = vector.load %arg4[%c0_6, %c0_7] : memref<32x96xf32, #tpu.memory_space<vmem>>, vector<32x96xf32>
    %c0_8 = arith.constant 0 : index
    %c0_9 = arith.constant 0 : index
    %10 = vector.load %arg2[%c0_8, %c0_9] : memref<16x1xi32, #tpu.memory_space<vmem>>, vector<16x1xi32>
    %cst_10 = arith.constant 0.000000e+00 : f32
    %11 = vector.broadcast %cst_10 : f32 to vector<16x32xf32>
    %12 = vector.extract_strided_slice %8 {offsets = [0, 0], sizes = [16, 96], strides = [1, 1]} : vector<256x96xf32> to vector<16x96xf32>
    %cst_11 = arith.constant dense<0.000000e+00> : vector<16x96xf32>
    %13 = tpu.matmul %11, %9, %cst_11 {dimension_numbers = #tpu.dot_dimension_numbers<[1], [0], [0], [1], [0, 0, 1, 1], [], []>} : vector<16x32xf32>, vector<32x96xf32>, vector<16x96xf32> -> vector<16x96xf32>
    %14 = vector.broadcast %2 : vector<1x96xf32> to vector<16x96xf32>
    %15 = arith.addf %13, %14 : vector<16x96xf32>
    %16 = vector.extract_strided_slice %12 {offsets = [0, 0], sizes = [16, 32], strides = [1, 1]} : vector<16x96xf32> to vector<16x32xf32>
    %17 = vector.extract_strided_slice %15 {offsets = [0, 0], sizes = [16, 32], strides = [1, 1]} : vector<16x96xf32> to vector<16x32xf32>
    %18 = arith.addf %16, %17 : vector<16x32xf32>
    %19 = arith.negf %18 : vector<16x32xf32>
    %20 = math.exp %19 : vector<16x32xf32>
    %cst_12 = arith.constant 1.000000e+00 : f32
    %21 = vector.broadcast %cst_12 : f32 to vector<16x32xf32>
    %22 = arith.addf %21, %20 : vector<16x32xf32>
    %23 = arith.divf %21, %22 : vector<16x32xf32>
    %24 = vector.extract_strided_slice %12 {offsets = [0, 32], sizes = [16, 32], strides = [1, 1]} : vector<16x96xf32> to vector<16x32xf32>
    %25 = vector.extract_strided_slice %15 {offsets = [0, 32], sizes = [16, 32], strides = [1, 1]} : vector<16x96xf32> to vector<16x32xf32>
    %26 = arith.addf %24, %25 : vector<16x32xf32>
    %27 = arith.negf %26 : vector<16x32xf32>
    %28 = math.exp %27 : vector<16x32xf32>
    %cst_13 = arith.constant 1.000000e+00 : f32
    %29 = vector.broadcast %cst_13 : f32 to vector<16x32xf32>
    %30 = arith.addf %29, %28 : vector<16x32xf32>
    %31 = arith.divf %29, %30 : vector<16x32xf32>
    %32 = vector.extract_strided_slice %12 {offsets = [0, 64], sizes = [16, 32], strides = [1, 1]} : vector<16x96xf32> to vector<16x32xf32>
    %33 = vector.extract_strided_slice %15 {offsets = [0, 64], sizes = [16, 32], strides = [1, 1]} : vector<16x96xf32> to vector<16x32xf32>
    %34 = arith.mulf %23, %33 : vector<16x32xf32>
    %35 = arith.addf %32, %34 : vector<16x32xf32>
    %36 = math.tanh %35 : vector<16x32xf32>
    %cst_14 = arith.constant 1.000000e+00 : f32
    %37 = vector.broadcast %cst_14 : f32 to vector<16x32xf32>
    %38 = arith.subf %37, %31 : vector<16x32xf32>
    %39 = arith.mulf %38, %36 : vector<16x32xf32>
    %40 = arith.mulf %31, %11 : vector<16x32xf32>
    %41 = arith.addf %39, %40 : vector<16x32xf32>
    %c0_i32 = arith.constant 0 : i32
    %42 = vector.broadcast %c0_i32 : i32 to vector<16x1xi32>
    %43 = arith.cmpi sgt, %10, %42 : vector<16x1xi32>
    %44 = arith.extui %43 : vector<16x1xi1> to vector<16x1xi32>
    %45 = arith.sitofp %44 : vector<16x1xi32> to vector<16x1xf32>
    %46 = arith.subf %41, %11 : vector<16x32xf32>
    %47 = vector.broadcast %45 : vector<16x1xf32> to vector<16x32xf32>
    %48 = arith.mulf %47, %46 : vector<16x32xf32>
    %49 = arith.addf %11, %48 : vector<16x32xf32>
    %50 = vector.broadcast %45 : vector<16x1xf32> to vector<16x32xf32>
    %51 = arith.mulf %50, %41 : vector<16x32xf32>
    %52 = vector.extract_strided_slice %8 {offsets = [16, 0], sizes = [16, 96], strides = [1, 1]} : vector<256x96xf32> to vector<16x96xf32>
    %cst_15 = arith.constant dense<0.000000e+00> : vector<16x96xf32>
    %53 = tpu.matmul %49, %9, %cst_15 {dimension_numbers = #tpu.dot_dimension_numbers<[1], [0], [0], [1], [0, 0, 1, 1], [], []>} : vector<16x32xf32>, vector<32x96xf32>, vector<16x96xf32> -> vector<16x96xf32>
    %54 = vector.broadcast %2 : vector<1x96xf32> to vector<16x96xf32>
    %55 = arith.addf %53, %54 : vector<16x96xf32>
    %56 = vector.extract_strided_slice %52 {offsets = [0, 0], sizes = [16, 32], strides = [1, 1]} : vector<16x96xf32> to vector<16x32xf32>
    %57 = vector.extract_strided_slice %55 {offsets = [0, 0], sizes = [16, 32], strides = [1, 1]} : vector<16x96xf32> to vector<16x32xf32>
    %58 = arith.addf %56, %57 : vector<16x32xf32>
    %59 = arith.negf %58 : vector<16x32xf32>
    %60 = math.exp %59 : vector<16x32xf32>
    %cst_16 = arith.constant 1.000000e+00 : f32
    %61 = vector.broadcast %cst_16 : f32 to vector<16x32xf32>
    %62 = arith.addf %61, %60 : vector<16x32xf32>
    %63 = arith.divf %61, %62 : vector<16x32xf32>
    %64 = vector.extract_strided_slice %52 {offsets = [0, 32], sizes = [16, 32], strides = [1, 1]} : vector<16x96xf32> to vector<16x32xf32>
    %65 = vector.extract_strided_slice %55 {offsets = [0, 32], sizes = [16, 32], strides = [1, 1]} : vector<16x96xf32> to vector<16x32xf32>
    %66 = arith.addf %64, %65 : vector<16x32xf32>
    %67 = arith.negf %66 : vector<16x32xf32>
    %68 = math.exp %67 : vector<16x32xf32>
    %cst_17 = arith.constant 1.000000e+00 : f32
    %69 = vector.broadcast %cst_17 : f32 to vector<16x32xf32>
    %70 = arith.addf %69, %68 : vector<16x32xf32>
    %71 = arith.divf %69, %70 : vector<16x32xf32>
    %72 = vector.extract_strided_slice %52 {offsets = [0, 64], sizes = [16, 32], strides = [1, 1]} : vector<16x96xf32> to vector<16x32xf32>
    %73 = vector.extract_strided_slice %55 {offsets = [0, 64], sizes = [16, 32], strides = [1, 1]} : vector<16x96xf32> to vector<16x32xf32>
    %74 = arith.mulf %63, %73 : vector<16x32xf32>
    %75 = arith.addf %72, %74 : vector<16x32xf32>
    %76 = math.tanh %75 : vector<16x32xf32>
    %cst_18 = arith.constant 1.000000e+00 : f32
    %77 = vector.broadcast %cst_18 : f32 to vector<16x32xf32>
    %78 = arith.subf %77, %71 : vector<16x32xf32>
    %79 = arith.mulf %78, %76 : vector<16x32xf32>
    %80 = arith.mulf %71, %49 : vector<16x32xf32>
    %81 = arith.addf %79, %80 : vector<16x32xf32>
    %c1_i32 = arith.constant 1 : i32
    %82 = vector.broadcast %c1_i32 : i32 to vector<16x1xi32>
    %83 = arith.cmpi sgt, %10, %82 : vector<16x1xi32>
    %84 = arith.extui %83 : vector<16x1xi1> to vector<16x1xi32>
    %85 = arith.sitofp %84 : vector<16x1xi32> to vector<16x1xf32>
    %86 = arith.subf %81, %49 : vector<16x32xf32>
    %87 = vector.broadcast %85 : vector<16x1xf32> to vector<16x32xf32>
    %88 = arith.mulf %87, %86 : vector<16x32xf32>
    %89 = arith.addf %49, %88 : vector<16x32xf32>
    %90 = vector.broadcast %85 : vector<16x1xf32> to vector<16x32xf32>
    %91 = arith.mulf %90, %81 : vector<16x32xf32>
    %92 = vector.extract_strided_slice %8 {offsets = [32, 0], sizes = [16, 96], strides = [1, 1]} : vector<256x96xf32> to vector<16x96xf32>
    %cst_19 = arith.constant dense<0.000000e+00> : vector<16x96xf32>
    %93 = tpu.matmul %89, %9, %cst_19 {dimension_numbers = #tpu.dot_dimension_numbers<[1], [0], [0], [1], [0, 0, 1, 1], [], []>} : vector<16x32xf32>, vector<32x96xf32>, vector<16x96xf32> -> vector<16x96xf32>
    %94 = vector.broadcast %2 : vector<1x96xf32> to vector<16x96xf32>
    %95 = arith.addf %93, %94 : vector<16x96xf32>
    %96 = vector.extract_strided_slice %92 {offsets = [0, 0], sizes = [16, 32], strides = [1, 1]} : vector<16x96xf32> to vector<16x32xf32>
    %97 = vector.extract_strided_slice %95 {offsets = [0, 0], sizes = [16, 32], strides = [1, 1]} : vector<16x96xf32> to vector<16x32xf32>
    %98 = arith.addf %96, %97 : vector<16x32xf32>
    %99 = arith.negf %98 : vector<16x32xf32>
    %100 = math.exp %99 : vector<16x32xf32>
    %cst_20 = arith.constant 1.000000e+00 : f32
    %101 = vector.broadcast %cst_20 : f32 to vector<16x32xf32>
    %102 = arith.addf %101, %100 : vector<16x32xf32>
    %103 = arith.divf %101, %102 : vector<16x32xf32>
    %104 = vector.extract_strided_slice %92 {offsets = [0, 32], sizes = [16, 32], strides = [1, 1]} : vector<16x96xf32> to vector<16x32xf32>
    %105 = vector.extract_strided_slice %95 {offsets = [0, 32], sizes = [16, 32], strides = [1, 1]} : vector<16x96xf32> to vector<16x32xf32>
    %106 = arith.addf %104, %105 : vector<16x32xf32>
    %107 = arith.negf %106 : vector<16x32xf32>
    %108 = math.exp %107 : vector<16x32xf32>
    %cst_21 = arith.constant 1.000000e+00 : f32
    %109 = vector.broadcast %cst_21 : f32 to vector<16x32xf32>
    %110 = arith.addf %109, %108 : vector<16x32xf32>
    %111 = arith.divf %109, %110 : vector<16x32xf32>
    %112 = vector.extract_strided_slice %92 {offsets = [0, 64], sizes = [16, 32], strides = [1, 1]} : vector<16x96xf32> to vector<16x32xf32>
    %113 = vector.extract_strided_slice %95 {offsets = [0, 64], sizes = [16, 32], strides = [1, 1]} : vector<16x96xf32> to vector<16x32xf32>
    %114 = arith.mulf %103, %113 : vector<16x32xf32>
    %115 = arith.addf %112, %114 : vector<16x32xf32>
    %116 = math.tanh %115 : vector<16x32xf32>
    %cst_22 = arith.constant 1.000000e+00 : f32
    %117 = vector.broadcast %cst_22 : f32 to vector<16x32xf32>
    %118 = arith.subf %117, %111 : vector<16x32xf32>
    %119 = arith.mulf %118, %116 : vector<16x32xf32>
    %120 = arith.mulf %111, %89 : vector<16x32xf32>
    %121 = arith.addf %119, %120 : vector<16x32xf32>
    %c2_i32 = arith.constant 2 : i32
    %122 = vector.broadcast %c2_i32 : i32 to vector<16x1xi32>
    %123 = arith.cmpi sgt, %10, %122 : vector<16x1xi32>
    %124 = arith.extui %123 : vector<16x1xi1> to vector<16x1xi32>
    %125 = arith.sitofp %124 : vector<16x1xi32> to vector<16x1xf32>
    %126 = arith.subf %121, %89 : vector<16x32xf32>
    %127 = vector.broadcast %125 : vector<16x1xf32> to vector<16x32xf32>
    %128 = arith.mulf %127, %126 : vector<16x32xf32>
    %129 = arith.addf %89, %128 : vector<16x32xf32>
    %130 = vector.broadcast %125 : vector<16x1xf32> to vector<16x32xf32>
    %131 = arith.mulf %130, %121 : vector<16x32xf32>
    %132 = vector.extract_strided_slice %8 {offsets = [48, 0], sizes = [16, 96], strides = [1, 1]} : vector<256x96xf32> to vector<16x96xf32>
    %cst_23 = arith.constant dense<0.000000e+00> : vector<16x96xf32>
    %133 = tpu.matmul %129, %9, %cst_23 {dimension_numbers = #tpu.dot_dimension_numbers<[1], [0], [0], [1], [0, 0, 1, 1], [], []>} : vector<16x32xf32>, vector<32x96xf32>, vector<16x96xf32> -> vector<16x96xf32>
    %134 = vector.broadcast %2 : vector<1x96xf32> to vector<16x96xf32>
    %135 = arith.addf %133, %134 : vector<16x96xf32>
    %136 = vector.extract_strided_slice %132 {offsets = [0, 0], sizes = [16, 32], strides = [1, 1]} : vector<16x96xf32> to vector<16x32xf32>
    %137 = vector.extract_strided_slice %135 {offsets = [0, 0], sizes = [16, 32], strides = [1, 1]} : vector<16x96xf32> to vector<16x32xf32>
    %138 = arith.addf %136, %137 : vector<16x32xf32>
    %139 = arith.negf %138 : vector<16x32xf32>
    %140 = math.exp %139 : vector<16x32xf32>
    %cst_24 = arith.constant 1.000000e+00 : f32
    %141 = vector.broadcast %cst_24 : f32 to vector<16x32xf32>
    %142 = arith.addf %141, %140 : vector<16x32xf32>
    %143 = arith.divf %141, %142 : vector<16x32xf32>
    %144 = vector.extract_strided_slice %132 {offsets = [0, 32], sizes = [16, 32], strides = [1, 1]} : vector<16x96xf32> to vector<16x32xf32>
    %145 = vector.extract_strided_slice %135 {offsets = [0, 32], sizes = [16, 32], strides = [1, 1]} : vector<16x96xf32> to vector<16x32xf32>
    %146 = arith.addf %144, %145 : vector<16x32xf32>
    %147 = arith.negf %146 : vector<16x32xf32>
    %148 = math.exp %147 : vector<16x32xf32>
    %cst_25 = arith.constant 1.000000e+00 : f32
    %149 = vector.broadcast %cst_25 : f32 to vector<16x32xf32>
    %150 = arith.addf %149, %148 : vector<16x32xf32>
    %151 = arith.divf %149, %150 : vector<16x32xf32>
    %152 = vector.extract_strided_slice %132 {offsets = [0, 64], sizes = [16, 32], strides = [1, 1]} : vector<16x96xf32> to vector<16x32xf32>
    %153 = vector.extract_strided_slice %135 {offsets = [0, 64], sizes = [16, 32], strides = [1, 1]} : vector<16x96xf32> to vector<16x32xf32>
    %154 = arith.mulf %143, %153 : vector<16x32xf32>
    %155 = arith.addf %152, %154 : vector<16x32xf32>
    %156 = math.tanh %155 : vector<16x32xf32>
    %cst_26 = arith.constant 1.000000e+00 : f32
    %157 = vector.broadcast %cst_26 : f32 to vector<16x32xf32>
    %158 = arith.subf %157, %151 : vector<16x32xf32>
    %159 = arith.mulf %158, %156 : vector<16x32xf32>
    %160 = arith.mulf %151, %129 : vector<16x32xf32>
    %161 = arith.addf %159, %160 : vector<16x32xf32>
    %c3_i32 = arith.constant 3 : i32
    %162 = vector.broadcast %c3_i32 : i32 to vector<16x1xi32>
    %163 = arith.cmpi sgt, %10, %162 : vector<16x1xi32>
    %164 = arith.extui %163 : vector<16x1xi1> to vector<16x1xi32>
    %165 = arith.sitofp %164 : vector<16x1xi32> to vector<16x1xf32>
    %166 = arith.subf %161, %129 : vector<16x32xf32>
    %167 = vector.broadcast %165 : vector<16x1xf32> to vector<16x32xf32>
    %168 = arith.mulf %167, %166 : vector<16x32xf32>
    %169 = arith.addf %129, %168 : vector<16x32xf32>
    %170 = vector.broadcast %165 : vector<16x1xf32> to vector<16x32xf32>
    %171 = arith.mulf %170, %161 : vector<16x32xf32>
    %172 = vector.extract_strided_slice %8 {offsets = [64, 0], sizes = [16, 96], strides = [1, 1]} : vector<256x96xf32> to vector<16x96xf32>
    %cst_27 = arith.constant dense<0.000000e+00> : vector<16x96xf32>
    %173 = tpu.matmul %169, %9, %cst_27 {dimension_numbers = #tpu.dot_dimension_numbers<[1], [0], [0], [1], [0, 0, 1, 1], [], []>} : vector<16x32xf32>, vector<32x96xf32>, vector<16x96xf32> -> vector<16x96xf32>
    %174 = vector.broadcast %2 : vector<1x96xf32> to vector<16x96xf32>
    %175 = arith.addf %173, %174 : vector<16x96xf32>
    %176 = vector.extract_strided_slice %172 {offsets = [0, 0], sizes = [16, 32], strides = [1, 1]} : vector<16x96xf32> to vector<16x32xf32>
    %177 = vector.extract_strided_slice %175 {offsets = [0, 0], sizes = [16, 32], strides = [1, 1]} : vector<16x96xf32> to vector<16x32xf32>
    %178 = arith.addf %176, %177 : vector<16x32xf32>
    %179 = arith.negf %178 : vector<16x32xf32>
    %180 = math.exp %179 : vector<16x32xf32>
    %cst_28 = arith.constant 1.000000e+00 : f32
    %181 = vector.broadcast %cst_28 : f32 to vector<16x32xf32>
    %182 = arith.addf %181, %180 : vector<16x32xf32>
    %183 = arith.divf %181, %182 : vector<16x32xf32>
    %184 = vector.extract_strided_slice %172 {offsets = [0, 32], sizes = [16, 32], strides = [1, 1]} : vector<16x96xf32> to vector<16x32xf32>
    %185 = vector.extract_strided_slice %175 {offsets = [0, 32], sizes = [16, 32], strides = [1, 1]} : vector<16x96xf32> to vector<16x32xf32>
    %186 = arith.addf %184, %185 : vector<16x32xf32>
    %187 = arith.negf %186 : vector<16x32xf32>
    %188 = math.exp %187 : vector<16x32xf32>
    %cst_29 = arith.constant 1.000000e+00 : f32
    %189 = vector.broadcast %cst_29 : f32 to vector<16x32xf32>
    %190 = arith.addf %189, %188 : vector<16x32xf32>
    %191 = arith.divf %189, %190 : vector<16x32xf32>
    %192 = vector.extract_strided_slice %172 {offsets = [0, 64], sizes = [16, 32], strides = [1, 1]} : vector<16x96xf32> to vector<16x32xf32>
    %193 = vector.extract_strided_slice %175 {offsets = [0, 64], sizes = [16, 32], strides = [1, 1]} : vector<16x96xf32> to vector<16x32xf32>
    %194 = arith.mulf %183, %193 : vector<16x32xf32>
    %195 = arith.addf %192, %194 : vector<16x32xf32>
    %196 = math.tanh %195 : vector<16x32xf32>
    %cst_30 = arith.constant 1.000000e+00 : f32
    %197 = vector.broadcast %cst_30 : f32 to vector<16x32xf32>
    %198 = arith.subf %197, %191 : vector<16x32xf32>
    %199 = arith.mulf %198, %196 : vector<16x32xf32>
    %200 = arith.mulf %191, %169 : vector<16x32xf32>
    %201 = arith.addf %199, %200 : vector<16x32xf32>
    %c4_i32 = arith.constant 4 : i32
    %202 = vector.broadcast %c4_i32 : i32 to vector<16x1xi32>
    %203 = arith.cmpi sgt, %10, %202 : vector<16x1xi32>
    %204 = arith.extui %203 : vector<16x1xi1> to vector<16x1xi32>
    %205 = arith.sitofp %204 : vector<16x1xi32> to vector<16x1xf32>
    %206 = arith.subf %201, %169 : vector<16x32xf32>
    %207 = vector.broadcast %205 : vector<16x1xf32> to vector<16x32xf32>
    %208 = arith.mulf %207, %206 : vector<16x32xf32>
    %209 = arith.addf %169, %208 : vector<16x32xf32>
    %210 = vector.broadcast %205 : vector<16x1xf32> to vector<16x32xf32>
    %211 = arith.mulf %210, %201 : vector<16x32xf32>
    %212 = vector.extract_strided_slice %8 {offsets = [80, 0], sizes = [16, 96], strides = [1, 1]} : vector<256x96xf32> to vector<16x96xf32>
    %cst_31 = arith.constant dense<0.000000e+00> : vector<16x96xf32>
    %213 = tpu.matmul %209, %9, %cst_31 {dimension_numbers = #tpu.dot_dimension_numbers<[1], [0], [0], [1], [0, 0, 1, 1], [], []>} : vector<16x32xf32>, vector<32x96xf32>, vector<16x96xf32> -> vector<16x96xf32>
    %214 = vector.broadcast %2 : vector<1x96xf32> to vector<16x96xf32>
    %215 = arith.addf %213, %214 : vector<16x96xf32>
    %216 = vector.extract_strided_slice %212 {offsets = [0, 0], sizes = [16, 32], strides = [1, 1]} : vector<16x96xf32> to vector<16x32xf32>
    %217 = vector.extract_strided_slice %215 {offsets = [0, 0], sizes = [16, 32], strides = [1, 1]} : vector<16x96xf32> to vector<16x32xf32>
    %218 = arith.addf %216, %217 : vector<16x32xf32>
    %219 = arith.negf %218 : vector<16x32xf32>
    %220 = math.exp %219 : vector<16x32xf32>
    %cst_32 = arith.constant 1.000000e+00 : f32
    %221 = vector.broadcast %cst_32 : f32 to vector<16x32xf32>
    %222 = arith.addf %221, %220 : vector<16x32xf32>
    %223 = arith.divf %221, %222 : vector<16x32xf32>
    %224 = vector.extract_strided_slice %212 {offsets = [0, 32], sizes = [16, 32], strides = [1, 1]} : vector<16x96xf32> to vector<16x32xf32>
    %225 = vector.extract_strided_slice %215 {offsets = [0, 32], sizes = [16, 32], strides = [1, 1]} : vector<16x96xf32> to vector<16x32xf32>
    %226 = arith.addf %224, %225 : vector<16x32xf32>
    %227 = arith.negf %226 : vector<16x32xf32>
    %228 = math.exp %227 : vector<16x32xf32>
    %cst_33 = arith.constant 1.000000e+00 : f32
    %229 = vector.broadcast %cst_33 : f32 to vector<16x32xf32>
    %230 = arith.addf %229, %228 : vector<16x32xf32>
    %231 = arith.divf %229, %230 : vector<16x32xf32>
    %232 = vector.extract_strided_slice %212 {offsets = [0, 64], sizes = [16, 32], strides = [1, 1]} : vector<16x96xf32> to vector<16x32xf32>
    %233 = vector.extract_strided_slice %215 {offsets = [0, 64], sizes = [16, 32], strides = [1, 1]} : vector<16x96xf32> to vector<16x32xf32>
    %234 = arith.mulf %223, %233 : vector<16x32xf32>
    %235 = arith.addf %232, %234 : vector<16x32xf32>
    %236 = math.tanh %235 : vector<16x32xf32>
    %cst_34 = arith.constant 1.000000e+00 : f32
    %237 = vector.broadcast %cst_34 : f32 to vector<16x32xf32>
    %238 = arith.subf %237, %231 : vector<16x32xf32>
    %239 = arith.mulf %238, %236 : vector<16x32xf32>
    %240 = arith.mulf %231, %209 : vector<16x32xf32>
    %241 = arith.addf %239, %240 : vector<16x32xf32>
    %c5_i32 = arith.constant 5 : i32
    %242 = vector.broadcast %c5_i32 : i32 to vector<16x1xi32>
    %243 = arith.cmpi sgt, %10, %242 : vector<16x1xi32>
    %244 = arith.extui %243 : vector<16x1xi1> to vector<16x1xi32>
    %245 = arith.sitofp %244 : vector<16x1xi32> to vector<16x1xf32>
    %246 = arith.subf %241, %209 : vector<16x32xf32>
    %247 = vector.broadcast %245 : vector<16x1xf32> to vector<16x32xf32>
    %248 = arith.mulf %247, %246 : vector<16x32xf32>
    %249 = arith.addf %209, %248 : vector<16x32xf32>
    %250 = vector.broadcast %245 : vector<16x1xf32> to vector<16x32xf32>
    %251 = arith.mulf %250, %241 : vector<16x32xf32>
    %252 = vector.extract_strided_slice %8 {offsets = [96, 0], sizes = [16, 96], strides = [1, 1]} : vector<256x96xf32> to vector<16x96xf32>
    %cst_35 = arith.constant dense<0.000000e+00> : vector<16x96xf32>
    %253 = tpu.matmul %249, %9, %cst_35 {dimension_numbers = #tpu.dot_dimension_numbers<[1], [0], [0], [1], [0, 0, 1, 1], [], []>} : vector<16x32xf32>, vector<32x96xf32>, vector<16x96xf32> -> vector<16x96xf32>
    %254 = vector.broadcast %2 : vector<1x96xf32> to vector<16x96xf32>
    %255 = arith.addf %253, %254 : vector<16x96xf32>
    %256 = vector.extract_strided_slice %252 {offsets = [0, 0], sizes = [16, 32], strides = [1, 1]} : vector<16x96xf32> to vector<16x32xf32>
    %257 = vector.extract_strided_slice %255 {offsets = [0, 0], sizes = [16, 32], strides = [1, 1]} : vector<16x96xf32> to vector<16x32xf32>
    %258 = arith.addf %256, %257 : vector<16x32xf32>
    %259 = arith.negf %258 : vector<16x32xf32>
    %260 = math.exp %259 : vector<16x32xf32>
    %cst_36 = arith.constant 1.000000e+00 : f32
    %261 = vector.broadcast %cst_36 : f32 to vector<16x32xf32>
    %262 = arith.addf %261, %260 : vector<16x32xf32>
    %263 = arith.divf %261, %262 : vector<16x32xf32>
    %264 = vector.extract_strided_slice %252 {offsets = [0, 32], sizes = [16, 32], strides = [1, 1]} : vector<16x96xf32> to vector<16x32xf32>
    %265 = vector.extract_strided_slice %255 {offsets = [0, 32], sizes = [16, 32], strides = [1, 1]} : vector<16x96xf32> to vector<16x32xf32>
    %266 = arith.addf %264, %265 : vector<16x32xf32>
    %267 = arith.negf %266 : vector<16x32xf32>
    %268 = math.exp %267 : vector<16x32xf32>
    %cst_37 = arith.constant 1.000000e+00 : f32
    %269 = vector.broadcast %cst_37 : f32 to vector<16x32xf32>
    %270 = arith.addf %269, %268 : vector<16x32xf32>
    %271 = arith.divf %269, %270 : vector<16x32xf32>
    %272 = vector.extract_strided_slice %252 {offsets = [0, 64], sizes = [16, 32], strides = [1, 1]} : vector<16x96xf32> to vector<16x32xf32>
    %273 = vector.extract_strided_slice %255 {offsets = [0, 64], sizes = [16, 32], strides = [1, 1]} : vector<16x96xf32> to vector<16x32xf32>
    %274 = arith.mulf %263, %273 : vector<16x32xf32>
    %275 = arith.addf %272, %274 : vector<16x32xf32>
    %276 = math.tanh %275 : vector<16x32xf32>
    %cst_38 = arith.constant 1.000000e+00 : f32
    %277 = vector.broadcast %cst_38 : f32 to vector<16x32xf32>
    %278 = arith.subf %277, %271 : vector<16x32xf32>
    %279 = arith.mulf %278, %276 : vector<16x32xf32>
    %280 = arith.mulf %271, %249 : vector<16x32xf32>
    %281 = arith.addf %279, %280 : vector<16x32xf32>
    %c6_i32 = arith.constant 6 : i32
    %282 = vector.broadcast %c6_i32 : i32 to vector<16x1xi32>
    %283 = arith.cmpi sgt, %10, %282 : vector<16x1xi32>
    %284 = arith.extui %283 : vector<16x1xi1> to vector<16x1xi32>
    %285 = arith.sitofp %284 : vector<16x1xi32> to vector<16x1xf32>
    %286 = arith.subf %281, %249 : vector<16x32xf32>
    %287 = vector.broadcast %285 : vector<16x1xf32> to vector<16x32xf32>
    %288 = arith.mulf %287, %286 : vector<16x32xf32>
    %289 = arith.addf %249, %288 : vector<16x32xf32>
    %290 = vector.broadcast %285 : vector<16x1xf32> to vector<16x32xf32>
    %291 = arith.mulf %290, %281 : vector<16x32xf32>
    %292 = vector.extract_strided_slice %8 {offsets = [112, 0], sizes = [16, 96], strides = [1, 1]} : vector<256x96xf32> to vector<16x96xf32>
    %cst_39 = arith.constant dense<0.000000e+00> : vector<16x96xf32>
    %293 = tpu.matmul %289, %9, %cst_39 {dimension_numbers = #tpu.dot_dimension_numbers<[1], [0], [0], [1], [0, 0, 1, 1], [], []>} : vector<16x32xf32>, vector<32x96xf32>, vector<16x96xf32> -> vector<16x96xf32>
    %294 = vector.broadcast %2 : vector<1x96xf32> to vector<16x96xf32>
    %295 = arith.addf %293, %294 : vector<16x96xf32>
    %296 = vector.extract_strided_slice %292 {offsets = [0, 0], sizes = [16, 32], strides = [1, 1]} : vector<16x96xf32> to vector<16x32xf32>
    %297 = vector.extract_strided_slice %295 {offsets = [0, 0], sizes = [16, 32], strides = [1, 1]} : vector<16x96xf32> to vector<16x32xf32>
    %298 = arith.addf %296, %297 : vector<16x32xf32>
    %299 = arith.negf %298 : vector<16x32xf32>
    %300 = math.exp %299 : vector<16x32xf32>
    %cst_40 = arith.constant 1.000000e+00 : f32
    %301 = vector.broadcast %cst_40 : f32 to vector<16x32xf32>
    %302 = arith.addf %301, %300 : vector<16x32xf32>
    %303 = arith.divf %301, %302 : vector<16x32xf32>
    %304 = vector.extract_strided_slice %292 {offsets = [0, 32], sizes = [16, 32], strides = [1, 1]} : vector<16x96xf32> to vector<16x32xf32>
    %305 = vector.extract_strided_slice %295 {offsets = [0, 32], sizes = [16, 32], strides = [1, 1]} : vector<16x96xf32> to vector<16x32xf32>
    %306 = arith.addf %304, %305 : vector<16x32xf32>
    %307 = arith.negf %306 : vector<16x32xf32>
    %308 = math.exp %307 : vector<16x32xf32>
    %cst_41 = arith.constant 1.000000e+00 : f32
    %309 = vector.broadcast %cst_41 : f32 to vector<16x32xf32>
    %310 = arith.addf %309, %308 : vector<16x32xf32>
    %311 = arith.divf %309, %310 : vector<16x32xf32>
    %312 = vector.extract_strided_slice %292 {offsets = [0, 64], sizes = [16, 32], strides = [1, 1]} : vector<16x96xf32> to vector<16x32xf32>
    %313 = vector.extract_strided_slice %295 {offsets = [0, 64], sizes = [16, 32], strides = [1, 1]} : vector<16x96xf32> to vector<16x32xf32>
    %314 = arith.mulf %303, %313 : vector<16x32xf32>
    %315 = arith.addf %312, %314 : vector<16x32xf32>
    %316 = math.tanh %315 : vector<16x32xf32>
    %cst_42 = arith.constant 1.000000e+00 : f32
    %317 = vector.broadcast %cst_42 : f32 to vector<16x32xf32>
    %318 = arith.subf %317, %311 : vector<16x32xf32>
    %319 = arith.mulf %318, %316 : vector<16x32xf32>
    %320 = arith.mulf %311, %289 : vector<16x32xf32>
    %321 = arith.addf %319, %320 : vector<16x32xf32>
    %c7_i32 = arith.constant 7 : i32
    %322 = vector.broadcast %c7_i32 : i32 to vector<16x1xi32>
    %323 = arith.cmpi sgt, %10, %322 : vector<16x1xi32>
    %324 = arith.extui %323 : vector<16x1xi1> to vector<16x1xi32>
    %325 = arith.sitofp %324 : vector<16x1xi32> to vector<16x1xf32>
    %326 = arith.subf %321, %289 : vector<16x32xf32>
    %327 = vector.broadcast %325 : vector<16x1xf32> to vector<16x32xf32>
    %328 = arith.mulf %327, %326 : vector<16x32xf32>
    %329 = arith.addf %289, %328 : vector<16x32xf32>
    %330 = vector.broadcast %325 : vector<16x1xf32> to vector<16x32xf32>
    %331 = arith.mulf %330, %321 : vector<16x32xf32>
    %332 = vector.extract_strided_slice %8 {offsets = [128, 0], sizes = [16, 96], strides = [1, 1]} : vector<256x96xf32> to vector<16x96xf32>
    %cst_43 = arith.constant dense<0.000000e+00> : vector<16x96xf32>
    %333 = tpu.matmul %329, %9, %cst_43 {dimension_numbers = #tpu.dot_dimension_numbers<[1], [0], [0], [1], [0, 0, 1, 1], [], []>} : vector<16x32xf32>, vector<32x96xf32>, vector<16x96xf32> -> vector<16x96xf32>
    %334 = vector.broadcast %2 : vector<1x96xf32> to vector<16x96xf32>
    %335 = arith.addf %333, %334 : vector<16x96xf32>
    %336 = vector.extract_strided_slice %332 {offsets = [0, 0], sizes = [16, 32], strides = [1, 1]} : vector<16x96xf32> to vector<16x32xf32>
    %337 = vector.extract_strided_slice %335 {offsets = [0, 0], sizes = [16, 32], strides = [1, 1]} : vector<16x96xf32> to vector<16x32xf32>
    %338 = arith.addf %336, %337 : vector<16x32xf32>
    %339 = arith.negf %338 : vector<16x32xf32>
    %340 = math.exp %339 : vector<16x32xf32>
    %cst_44 = arith.constant 1.000000e+00 : f32
    %341 = vector.broadcast %cst_44 : f32 to vector<16x32xf32>
    %342 = arith.addf %341, %340 : vector<16x32xf32>
    %343 = arith.divf %341, %342 : vector<16x32xf32>
    %344 = vector.extract_strided_slice %332 {offsets = [0, 32], sizes = [16, 32], strides = [1, 1]} : vector<16x96xf32> to vector<16x32xf32>
    %345 = vector.extract_strided_slice %335 {offsets = [0, 32], sizes = [16, 32], strides = [1, 1]} : vector<16x96xf32> to vector<16x32xf32>
    %346 = arith.addf %344, %345 : vector<16x32xf32>
    %347 = arith.negf %346 : vector<16x32xf32>
    %348 = math.exp %347 : vector<16x32xf32>
    %cst_45 = arith.constant 1.000000e+00 : f32
    %349 = vector.broadcast %cst_45 : f32 to vector<16x32xf32>
    %350 = arith.addf %349, %348 : vector<16x32xf32>
    %351 = arith.divf %349, %350 : vector<16x32xf32>
    %352 = vector.extract_strided_slice %332 {offsets = [0, 64], sizes = [16, 32], strides = [1, 1]} : vector<16x96xf32> to vector<16x32xf32>
    %353 = vector.extract_strided_slice %335 {offsets = [0, 64], sizes = [16, 32], strides = [1, 1]} : vector<16x96xf32> to vector<16x32xf32>
    %354 = arith.mulf %343, %353 : vector<16x32xf32>
    %355 = arith.addf %352, %354 : vector<16x32xf32>
    %356 = math.tanh %355 : vector<16x32xf32>
    %cst_46 = arith.constant 1.000000e+00 : f32
    %357 = vector.broadcast %cst_46 : f32 to vector<16x32xf32>
    %358 = arith.subf %357, %351 : vector<16x32xf32>
    %359 = arith.mulf %358, %356 : vector<16x32xf32>
    %360 = arith.mulf %351, %329 : vector<16x32xf32>
    %361 = arith.addf %359, %360 : vector<16x32xf32>
    %c8_i32 = arith.constant 8 : i32
    %362 = vector.broadcast %c8_i32 : i32 to vector<16x1xi32>
    %363 = arith.cmpi sgt, %10, %362 : vector<16x1xi32>
    %364 = arith.extui %363 : vector<16x1xi1> to vector<16x1xi32>
    %365 = arith.sitofp %364 : vector<16x1xi32> to vector<16x1xf32>
    %366 = arith.subf %361, %329 : vector<16x32xf32>
    %367 = vector.broadcast %365 : vector<16x1xf32> to vector<16x32xf32>
    %368 = arith.mulf %367, %366 : vector<16x32xf32>
    %369 = arith.addf %329, %368 : vector<16x32xf32>
    %370 = vector.broadcast %365 : vector<16x1xf32> to vector<16x32xf32>
    %371 = arith.mulf %370, %361 : vector<16x32xf32>
    %372 = vector.extract_strided_slice %8 {offsets = [144, 0], sizes = [16, 96], strides = [1, 1]} : vector<256x96xf32> to vector<16x96xf32>
    %cst_47 = arith.constant dense<0.000000e+00> : vector<16x96xf32>
    %373 = tpu.matmul %369, %9, %cst_47 {dimension_numbers = #tpu.dot_dimension_numbers<[1], [0], [0], [1], [0, 0, 1, 1], [], []>} : vector<16x32xf32>, vector<32x96xf32>, vector<16x96xf32> -> vector<16x96xf32>
    %374 = vector.broadcast %2 : vector<1x96xf32> to vector<16x96xf32>
    %375 = arith.addf %373, %374 : vector<16x96xf32>
    %376 = vector.extract_strided_slice %372 {offsets = [0, 0], sizes = [16, 32], strides = [1, 1]} : vector<16x96xf32> to vector<16x32xf32>
    %377 = vector.extract_strided_slice %375 {offsets = [0, 0], sizes = [16, 32], strides = [1, 1]} : vector<16x96xf32> to vector<16x32xf32>
    %378 = arith.addf %376, %377 : vector<16x32xf32>
    %379 = arith.negf %378 : vector<16x32xf32>
    %380 = math.exp %379 : vector<16x32xf32>
    %cst_48 = arith.constant 1.000000e+00 : f32
    %381 = vector.broadcast %cst_48 : f32 to vector<16x32xf32>
    %382 = arith.addf %381, %380 : vector<16x32xf32>
    %383 = arith.divf %381, %382 : vector<16x32xf32>
    %384 = vector.extract_strided_slice %372 {offsets = [0, 32], sizes = [16, 32], strides = [1, 1]} : vector<16x96xf32> to vector<16x32xf32>
    %385 = vector.extract_strided_slice %375 {offsets = [0, 32], sizes = [16, 32], strides = [1, 1]} : vector<16x96xf32> to vector<16x32xf32>
    %386 = arith.addf %384, %385 : vector<16x32xf32>
    %387 = arith.negf %386 : vector<16x32xf32>
    %388 = math.exp %387 : vector<16x32xf32>
    %cst_49 = arith.constant 1.000000e+00 : f32
    %389 = vector.broadcast %cst_49 : f32 to vector<16x32xf32>
    %390 = arith.addf %389, %388 : vector<16x32xf32>
    %391 = arith.divf %389, %390 : vector<16x32xf32>
    %392 = vector.extract_strided_slice %372 {offsets = [0, 64], sizes = [16, 32], strides = [1, 1]} : vector<16x96xf32> to vector<16x32xf32>
    %393 = vector.extract_strided_slice %375 {offsets = [0, 64], sizes = [16, 32], strides = [1, 1]} : vector<16x96xf32> to vector<16x32xf32>
    %394 = arith.mulf %383, %393 : vector<16x32xf32>
    %395 = arith.addf %392, %394 : vector<16x32xf32>
    %396 = math.tanh %395 : vector<16x32xf32>
    %cst_50 = arith.constant 1.000000e+00 : f32
    %397 = vector.broadcast %cst_50 : f32 to vector<16x32xf32>
    %398 = arith.subf %397, %391 : vector<16x32xf32>
    %399 = arith.mulf %398, %396 : vector<16x32xf32>
    %400 = arith.mulf %391, %369 : vector<16x32xf32>
    %401 = arith.addf %399, %400 : vector<16x32xf32>
    %c9_i32 = arith.constant 9 : i32
    %402 = vector.broadcast %c9_i32 : i32 to vector<16x1xi32>
    %403 = arith.cmpi sgt, %10, %402 : vector<16x1xi32>
    %404 = arith.extui %403 : vector<16x1xi1> to vector<16x1xi32>
    %405 = arith.sitofp %404 : vector<16x1xi32> to vector<16x1xf32>
    %406 = arith.subf %401, %369 : vector<16x32xf32>
    %407 = vector.broadcast %405 : vector<16x1xf32> to vector<16x32xf32>
    %408 = arith.mulf %407, %406 : vector<16x32xf32>
    %409 = arith.addf %369, %408 : vector<16x32xf32>
    %410 = vector.broadcast %405 : vector<16x1xf32> to vector<16x32xf32>
    %411 = arith.mulf %410, %401 : vector<16x32xf32>
    %412 = vector.extract_strided_slice %8 {offsets = [160, 0], sizes = [16, 96], strides = [1, 1]} : vector<256x96xf32> to vector<16x96xf32>
    %cst_51 = arith.constant dense<0.000000e+00> : vector<16x96xf32>
    %413 = tpu.matmul %409, %9, %cst_51 {dimension_numbers = #tpu.dot_dimension_numbers<[1], [0], [0], [1], [0, 0, 1, 1], [], []>} : vector<16x32xf32>, vector<32x96xf32>, vector<16x96xf32> -> vector<16x96xf32>
    %414 = vector.broadcast %2 : vector<1x96xf32> to vector<16x96xf32>
    %415 = arith.addf %413, %414 : vector<16x96xf32>
    %416 = vector.extract_strided_slice %412 {offsets = [0, 0], sizes = [16, 32], strides = [1, 1]} : vector<16x96xf32> to vector<16x32xf32>
    %417 = vector.extract_strided_slice %415 {offsets = [0, 0], sizes = [16, 32], strides = [1, 1]} : vector<16x96xf32> to vector<16x32xf32>
    %418 = arith.addf %416, %417 : vector<16x32xf32>
    %419 = arith.negf %418 : vector<16x32xf32>
    %420 = math.exp %419 : vector<16x32xf32>
    %cst_52 = arith.constant 1.000000e+00 : f32
    %421 = vector.broadcast %cst_52 : f32 to vector<16x32xf32>
    %422 = arith.addf %421, %420 : vector<16x32xf32>
    %423 = arith.divf %421, %422 : vector<16x32xf32>
    %424 = vector.extract_strided_slice %412 {offsets = [0, 32], sizes = [16, 32], strides = [1, 1]} : vector<16x96xf32> to vector<16x32xf32>
    %425 = vector.extract_strided_slice %415 {offsets = [0, 32], sizes = [16, 32], strides = [1, 1]} : vector<16x96xf32> to vector<16x32xf32>
    %426 = arith.addf %424, %425 : vector<16x32xf32>
    %427 = arith.negf %426 : vector<16x32xf32>
    %428 = math.exp %427 : vector<16x32xf32>
    %cst_53 = arith.constant 1.000000e+00 : f32
    %429 = vector.broadcast %cst_53 : f32 to vector<16x32xf32>
    %430 = arith.addf %429, %428 : vector<16x32xf32>
    %431 = arith.divf %429, %430 : vector<16x32xf32>
    %432 = vector.extract_strided_slice %412 {offsets = [0, 64], sizes = [16, 32], strides = [1, 1]} : vector<16x96xf32> to vector<16x32xf32>
    %433 = vector.extract_strided_slice %415 {offsets = [0, 64], sizes = [16, 32], strides = [1, 1]} : vector<16x96xf32> to vector<16x32xf32>
    %434 = arith.mulf %423, %433 : vector<16x32xf32>
    %435 = arith.addf %432, %434 : vector<16x32xf32>
    %436 = math.tanh %435 : vector<16x32xf32>
    %cst_54 = arith.constant 1.000000e+00 : f32
    %437 = vector.broadcast %cst_54 : f32 to vector<16x32xf32>
    %438 = arith.subf %437, %431 : vector<16x32xf32>
    %439 = arith.mulf %438, %436 : vector<16x32xf32>
    %440 = arith.mulf %431, %409 : vector<16x32xf32>
    %441 = arith.addf %439, %440 : vector<16x32xf32>
    %c10_i32 = arith.constant 10 : i32
    %442 = vector.broadcast %c10_i32 : i32 to vector<16x1xi32>
    %443 = arith.cmpi sgt, %10, %442 : vector<16x1xi32>
    %444 = arith.extui %443 : vector<16x1xi1> to vector<16x1xi32>
    %445 = arith.sitofp %444 : vector<16x1xi32> to vector<16x1xf32>
    %446 = arith.subf %441, %409 : vector<16x32xf32>
    %447 = vector.broadcast %445 : vector<16x1xf32> to vector<16x32xf32>
    %448 = arith.mulf %447, %446 : vector<16x32xf32>
    %449 = arith.addf %409, %448 : vector<16x32xf32>
    %450 = vector.broadcast %445 : vector<16x1xf32> to vector<16x32xf32>
    %451 = arith.mulf %450, %441 : vector<16x32xf32>
    %452 = vector.extract_strided_slice %8 {offsets = [176, 0], sizes = [16, 96], strides = [1, 1]} : vector<256x96xf32> to vector<16x96xf32>
    %cst_55 = arith.constant dense<0.000000e+00> : vector<16x96xf32>
    %453 = tpu.matmul %449, %9, %cst_55 {dimension_numbers = #tpu.dot_dimension_numbers<[1], [0], [0], [1], [0, 0, 1, 1], [], []>} : vector<16x32xf32>, vector<32x96xf32>, vector<16x96xf32> -> vector<16x96xf32>
    %454 = vector.broadcast %2 : vector<1x96xf32> to vector<16x96xf32>
    %455 = arith.addf %453, %454 : vector<16x96xf32>
    %456 = vector.extract_strided_slice %452 {offsets = [0, 0], sizes = [16, 32], strides = [1, 1]} : vector<16x96xf32> to vector<16x32xf32>
    %457 = vector.extract_strided_slice %455 {offsets = [0, 0], sizes = [16, 32], strides = [1, 1]} : vector<16x96xf32> to vector<16x32xf32>
    %458 = arith.addf %456, %457 : vector<16x32xf32>
    %459 = arith.negf %458 : vector<16x32xf32>
    %460 = math.exp %459 : vector<16x32xf32>
    %cst_56 = arith.constant 1.000000e+00 : f32
    %461 = vector.broadcast %cst_56 : f32 to vector<16x32xf32>
    %462 = arith.addf %461, %460 : vector<16x32xf32>
    %463 = arith.divf %461, %462 : vector<16x32xf32>
    %464 = vector.extract_strided_slice %452 {offsets = [0, 32], sizes = [16, 32], strides = [1, 1]} : vector<16x96xf32> to vector<16x32xf32>
    %465 = vector.extract_strided_slice %455 {offsets = [0, 32], sizes = [16, 32], strides = [1, 1]} : vector<16x96xf32> to vector<16x32xf32>
    %466 = arith.addf %464, %465 : vector<16x32xf32>
    %467 = arith.negf %466 : vector<16x32xf32>
    %468 = math.exp %467 : vector<16x32xf32>
    %cst_57 = arith.constant 1.000000e+00 : f32
    %469 = vector.broadcast %cst_57 : f32 to vector<16x32xf32>
    %470 = arith.addf %469, %468 : vector<16x32xf32>
    %471 = arith.divf %469, %470 : vector<16x32xf32>
    %472 = vector.extract_strided_slice %452 {offsets = [0, 64], sizes = [16, 32], strides = [1, 1]} : vector<16x96xf32> to vector<16x32xf32>
    %473 = vector.extract_strided_slice %455 {offsets = [0, 64], sizes = [16, 32], strides = [1, 1]} : vector<16x96xf32> to vector<16x32xf32>
    %474 = arith.mulf %463, %473 : vector<16x32xf32>
    %475 = arith.addf %472, %474 : vector<16x32xf32>
    %476 = math.tanh %475 : vector<16x32xf32>
    %cst_58 = arith.constant 1.000000e+00 : f32
    %477 = vector.broadcast %cst_58 : f32 to vector<16x32xf32>
    %478 = arith.subf %477, %471 : vector<16x32xf32>
    %479 = arith.mulf %478, %476 : vector<16x32xf32>
    %480 = arith.mulf %471, %449 : vector<16x32xf32>
    %481 = arith.addf %479, %480 : vector<16x32xf32>
    %c11_i32 = arith.constant 11 : i32
    %482 = vector.broadcast %c11_i32 : i32 to vector<16x1xi32>
    %483 = arith.cmpi sgt, %10, %482 : vector<16x1xi32>
    %484 = arith.extui %483 : vector<16x1xi1> to vector<16x1xi32>
    %485 = arith.sitofp %484 : vector<16x1xi32> to vector<16x1xf32>
    %486 = arith.subf %481, %449 : vector<16x32xf32>
    %487 = vector.broadcast %485 : vector<16x1xf32> to vector<16x32xf32>
    %488 = arith.mulf %487, %486 : vector<16x32xf32>
    %489 = arith.addf %449, %488 : vector<16x32xf32>
    %490 = vector.broadcast %485 : vector<16x1xf32> to vector<16x32xf32>
    %491 = arith.mulf %490, %481 : vector<16x32xf32>
    %492 = vector.extract_strided_slice %8 {offsets = [192, 0], sizes = [16, 96], strides = [1, 1]} : vector<256x96xf32> to vector<16x96xf32>
    %cst_59 = arith.constant dense<0.000000e+00> : vector<16x96xf32>
    %493 = tpu.matmul %489, %9, %cst_59 {dimension_numbers = #tpu.dot_dimension_numbers<[1], [0], [0], [1], [0, 0, 1, 1], [], []>} : vector<16x32xf32>, vector<32x96xf32>, vector<16x96xf32> -> vector<16x96xf32>
    %494 = vector.broadcast %2 : vector<1x96xf32> to vector<16x96xf32>
    %495 = arith.addf %493, %494 : vector<16x96xf32>
    %496 = vector.extract_strided_slice %492 {offsets = [0, 0], sizes = [16, 32], strides = [1, 1]} : vector<16x96xf32> to vector<16x32xf32>
    %497 = vector.extract_strided_slice %495 {offsets = [0, 0], sizes = [16, 32], strides = [1, 1]} : vector<16x96xf32> to vector<16x32xf32>
    %498 = arith.addf %496, %497 : vector<16x32xf32>
    %499 = arith.negf %498 : vector<16x32xf32>
    %500 = math.exp %499 : vector<16x32xf32>
    %cst_60 = arith.constant 1.000000e+00 : f32
    %501 = vector.broadcast %cst_60 : f32 to vector<16x32xf32>
    %502 = arith.addf %501, %500 : vector<16x32xf32>
    %503 = arith.divf %501, %502 : vector<16x32xf32>
    %504 = vector.extract_strided_slice %492 {offsets = [0, 32], sizes = [16, 32], strides = [1, 1]} : vector<16x96xf32> to vector<16x32xf32>
    %505 = vector.extract_strided_slice %495 {offsets = [0, 32], sizes = [16, 32], strides = [1, 1]} : vector<16x96xf32> to vector<16x32xf32>
    %506 = arith.addf %504, %505 : vector<16x32xf32>
    %507 = arith.negf %506 : vector<16x32xf32>
    %508 = math.exp %507 : vector<16x32xf32>
    %cst_61 = arith.constant 1.000000e+00 : f32
    %509 = vector.broadcast %cst_61 : f32 to vector<16x32xf32>
    %510 = arith.addf %509, %508 : vector<16x32xf32>
    %511 = arith.divf %509, %510 : vector<16x32xf32>
    %512 = vector.extract_strided_slice %492 {offsets = [0, 64], sizes = [16, 32], strides = [1, 1]} : vector<16x96xf32> to vector<16x32xf32>
    %513 = vector.extract_strided_slice %495 {offsets = [0, 64], sizes = [16, 32], strides = [1, 1]} : vector<16x96xf32> to vector<16x32xf32>
    %514 = arith.mulf %503, %513 : vector<16x32xf32>
    %515 = arith.addf %512, %514 : vector<16x32xf32>
    %516 = math.tanh %515 : vector<16x32xf32>
    %cst_62 = arith.constant 1.000000e+00 : f32
    %517 = vector.broadcast %cst_62 : f32 to vector<16x32xf32>
    %518 = arith.subf %517, %511 : vector<16x32xf32>
    %519 = arith.mulf %518, %516 : vector<16x32xf32>
    %520 = arith.mulf %511, %489 : vector<16x32xf32>
    %521 = arith.addf %519, %520 : vector<16x32xf32>
    %c12_i32 = arith.constant 12 : i32
    %522 = vector.broadcast %c12_i32 : i32 to vector<16x1xi32>
    %523 = arith.cmpi sgt, %10, %522 : vector<16x1xi32>
    %524 = arith.extui %523 : vector<16x1xi1> to vector<16x1xi32>
    %525 = arith.sitofp %524 : vector<16x1xi32> to vector<16x1xf32>
    %526 = arith.subf %521, %489 : vector<16x32xf32>
    %527 = vector.broadcast %525 : vector<16x1xf32> to vector<16x32xf32>
    %528 = arith.mulf %527, %526 : vector<16x32xf32>
    %529 = arith.addf %489, %528 : vector<16x32xf32>
    %530 = vector.broadcast %525 : vector<16x1xf32> to vector<16x32xf32>
    %531 = arith.mulf %530, %521 : vector<16x32xf32>
    %532 = vector.extract_strided_slice %8 {offsets = [208, 0], sizes = [16, 96], strides = [1, 1]} : vector<256x96xf32> to vector<16x96xf32>
    %cst_63 = arith.constant dense<0.000000e+00> : vector<16x96xf32>
    %533 = tpu.matmul %529, %9, %cst_63 {dimension_numbers = #tpu.dot_dimension_numbers<[1], [0], [0], [1], [0, 0, 1, 1], [], []>} : vector<16x32xf32>, vector<32x96xf32>, vector<16x96xf32> -> vector<16x96xf32>
    %534 = vector.broadcast %2 : vector<1x96xf32> to vector<16x96xf32>
    %535 = arith.addf %533, %534 : vector<16x96xf32>
    %536 = vector.extract_strided_slice %532 {offsets = [0, 0], sizes = [16, 32], strides = [1, 1]} : vector<16x96xf32> to vector<16x32xf32>
    %537 = vector.extract_strided_slice %535 {offsets = [0, 0], sizes = [16, 32], strides = [1, 1]} : vector<16x96xf32> to vector<16x32xf32>
    %538 = arith.addf %536, %537 : vector<16x32xf32>
    %539 = arith.negf %538 : vector<16x32xf32>
    %540 = math.exp %539 : vector<16x32xf32>
    %cst_64 = arith.constant 1.000000e+00 : f32
    %541 = vector.broadcast %cst_64 : f32 to vector<16x32xf32>
    %542 = arith.addf %541, %540 : vector<16x32xf32>
    %543 = arith.divf %541, %542 : vector<16x32xf32>
    %544 = vector.extract_strided_slice %532 {offsets = [0, 32], sizes = [16, 32], strides = [1, 1]} : vector<16x96xf32> to vector<16x32xf32>
    %545 = vector.extract_strided_slice %535 {offsets = [0, 32], sizes = [16, 32], strides = [1, 1]} : vector<16x96xf32> to vector<16x32xf32>
    %546 = arith.addf %544, %545 : vector<16x32xf32>
    %547 = arith.negf %546 : vector<16x32xf32>
    %548 = math.exp %547 : vector<16x32xf32>
    %cst_65 = arith.constant 1.000000e+00 : f32
    %549 = vector.broadcast %cst_65 : f32 to vector<16x32xf32>
    %550 = arith.addf %549, %548 : vector<16x32xf32>
    %551 = arith.divf %549, %550 : vector<16x32xf32>
    %552 = vector.extract_strided_slice %532 {offsets = [0, 64], sizes = [16, 32], strides = [1, 1]} : vector<16x96xf32> to vector<16x32xf32>
    %553 = vector.extract_strided_slice %535 {offsets = [0, 64], sizes = [16, 32], strides = [1, 1]} : vector<16x96xf32> to vector<16x32xf32>
    %554 = arith.mulf %543, %553 : vector<16x32xf32>
    %555 = arith.addf %552, %554 : vector<16x32xf32>
    %556 = math.tanh %555 : vector<16x32xf32>
    %cst_66 = arith.constant 1.000000e+00 : f32
    %557 = vector.broadcast %cst_66 : f32 to vector<16x32xf32>
    %558 = arith.subf %557, %551 : vector<16x32xf32>
    %559 = arith.mulf %558, %556 : vector<16x32xf32>
    %560 = arith.mulf %551, %529 : vector<16x32xf32>
    %561 = arith.addf %559, %560 : vector<16x32xf32>
    %c13_i32 = arith.constant 13 : i32
    %562 = vector.broadcast %c13_i32 : i32 to vector<16x1xi32>
    %563 = arith.cmpi sgt, %10, %562 : vector<16x1xi32>
    %564 = arith.extui %563 : vector<16x1xi1> to vector<16x1xi32>
    %565 = arith.sitofp %564 : vector<16x1xi32> to vector<16x1xf32>
    %566 = arith.subf %561, %529 : vector<16x32xf32>
    %567 = vector.broadcast %565 : vector<16x1xf32> to vector<16x32xf32>
    %568 = arith.mulf %567, %566 : vector<16x32xf32>
    %569 = arith.addf %529, %568 : vector<16x32xf32>
    %570 = vector.broadcast %565 : vector<16x1xf32> to vector<16x32xf32>
    %571 = arith.mulf %570, %561 : vector<16x32xf32>
    %572 = vector.extract_strided_slice %8 {offsets = [224, 0], sizes = [16, 96], strides = [1, 1]} : vector<256x96xf32> to vector<16x96xf32>
    %cst_67 = arith.constant dense<0.000000e+00> : vector<16x96xf32>
    %573 = tpu.matmul %569, %9, %cst_67 {dimension_numbers = #tpu.dot_dimension_numbers<[1], [0], [0], [1], [0, 0, 1, 1], [], []>} : vector<16x32xf32>, vector<32x96xf32>, vector<16x96xf32> -> vector<16x96xf32>
    %574 = vector.broadcast %2 : vector<1x96xf32> to vector<16x96xf32>
    %575 = arith.addf %573, %574 : vector<16x96xf32>
    %576 = vector.extract_strided_slice %572 {offsets = [0, 0], sizes = [16, 32], strides = [1, 1]} : vector<16x96xf32> to vector<16x32xf32>
    %577 = vector.extract_strided_slice %575 {offsets = [0, 0], sizes = [16, 32], strides = [1, 1]} : vector<16x96xf32> to vector<16x32xf32>
    %578 = arith.addf %576, %577 : vector<16x32xf32>
    %579 = arith.negf %578 : vector<16x32xf32>
    %580 = math.exp %579 : vector<16x32xf32>
    %cst_68 = arith.constant 1.000000e+00 : f32
    %581 = vector.broadcast %cst_68 : f32 to vector<16x32xf32>
    %582 = arith.addf %581, %580 : vector<16x32xf32>
    %583 = arith.divf %581, %582 : vector<16x32xf32>
    %584 = vector.extract_strided_slice %572 {offsets = [0, 32], sizes = [16, 32], strides = [1, 1]} : vector<16x96xf32> to vector<16x32xf32>
    %585 = vector.extract_strided_slice %575 {offsets = [0, 32], sizes = [16, 32], strides = [1, 1]} : vector<16x96xf32> to vector<16x32xf32>
    %586 = arith.addf %584, %585 : vector<16x32xf32>
    %587 = arith.negf %586 : vector<16x32xf32>
    %588 = math.exp %587 : vector<16x32xf32>
    %cst_69 = arith.constant 1.000000e+00 : f32
    %589 = vector.broadcast %cst_69 : f32 to vector<16x32xf32>
    %590 = arith.addf %589, %588 : vector<16x32xf32>
    %591 = arith.divf %589, %590 : vector<16x32xf32>
    %592 = vector.extract_strided_slice %572 {offsets = [0, 64], sizes = [16, 32], strides = [1, 1]} : vector<16x96xf32> to vector<16x32xf32>
    %593 = vector.extract_strided_slice %575 {offsets = [0, 64], sizes = [16, 32], strides = [1, 1]} : vector<16x96xf32> to vector<16x32xf32>
    %594 = arith.mulf %583, %593 : vector<16x32xf32>
    %595 = arith.addf %592, %594 : vector<16x32xf32>
    %596 = math.tanh %595 : vector<16x32xf32>
    %cst_70 = arith.constant 1.000000e+00 : f32
    %597 = vector.broadcast %cst_70 : f32 to vector<16x32xf32>
    %598 = arith.subf %597, %591 : vector<16x32xf32>
    %599 = arith.mulf %598, %596 : vector<16x32xf32>
    %600 = arith.mulf %591, %569 : vector<16x32xf32>
    %601 = arith.addf %599, %600 : vector<16x32xf32>
    %c14_i32 = arith.constant 14 : i32
    %602 = vector.broadcast %c14_i32 : i32 to vector<16x1xi32>
    %603 = arith.cmpi sgt, %10, %602 : vector<16x1xi32>
    %604 = arith.extui %603 : vector<16x1xi1> to vector<16x1xi32>
    %605 = arith.sitofp %604 : vector<16x1xi32> to vector<16x1xf32>
    %606 = arith.subf %601, %569 : vector<16x32xf32>
    %607 = vector.broadcast %605 : vector<16x1xf32> to vector<16x32xf32>
    %608 = arith.mulf %607, %606 : vector<16x32xf32>
    %609 = arith.addf %569, %608 : vector<16x32xf32>
    %610 = vector.broadcast %605 : vector<16x1xf32> to vector<16x32xf32>
    %611 = arith.mulf %610, %601 : vector<16x32xf32>
    %612 = vector.extract_strided_slice %8 {offsets = [240, 0], sizes = [16, 96], strides = [1, 1]} : vector<256x96xf32> to vector<16x96xf32>
    %cst_71 = arith.constant dense<0.000000e+00> : vector<16x96xf32>
    %613 = tpu.matmul %609, %9, %cst_71 {dimension_numbers = #tpu.dot_dimension_numbers<[1], [0], [0], [1], [0, 0, 1, 1], [], []>} : vector<16x32xf32>, vector<32x96xf32>, vector<16x96xf32> -> vector<16x96xf32>
    %614 = vector.broadcast %2 : vector<1x96xf32> to vector<16x96xf32>
    %615 = arith.addf %613, %614 : vector<16x96xf32>
    %616 = vector.extract_strided_slice %612 {offsets = [0, 0], sizes = [16, 32], strides = [1, 1]} : vector<16x96xf32> to vector<16x32xf32>
    %617 = vector.extract_strided_slice %615 {offsets = [0, 0], sizes = [16, 32], strides = [1, 1]} : vector<16x96xf32> to vector<16x32xf32>
    %618 = arith.addf %616, %617 : vector<16x32xf32>
    %619 = arith.negf %618 : vector<16x32xf32>
    %620 = math.exp %619 : vector<16x32xf32>
    %cst_72 = arith.constant 1.000000e+00 : f32
    %621 = vector.broadcast %cst_72 : f32 to vector<16x32xf32>
    %622 = arith.addf %621, %620 : vector<16x32xf32>
    %623 = arith.divf %621, %622 : vector<16x32xf32>
    %624 = vector.extract_strided_slice %612 {offsets = [0, 32], sizes = [16, 32], strides = [1, 1]} : vector<16x96xf32> to vector<16x32xf32>
    %625 = vector.extract_strided_slice %615 {offsets = [0, 32], sizes = [16, 32], strides = [1, 1]} : vector<16x96xf32> to vector<16x32xf32>
    %626 = arith.addf %624, %625 : vector<16x32xf32>
    %627 = arith.negf %626 : vector<16x32xf32>
    %628 = math.exp %627 : vector<16x32xf32>
    %cst_73 = arith.constant 1.000000e+00 : f32
    %629 = vector.broadcast %cst_73 : f32 to vector<16x32xf32>
    %630 = arith.addf %629, %628 : vector<16x32xf32>
    %631 = arith.divf %629, %630 : vector<16x32xf32>
    %632 = vector.extract_strided_slice %612 {offsets = [0, 64], sizes = [16, 32], strides = [1, 1]} : vector<16x96xf32> to vector<16x32xf32>
    %633 = vector.extract_strided_slice %615 {offsets = [0, 64], sizes = [16, 32], strides = [1, 1]} : vector<16x96xf32> to vector<16x32xf32>
    %634 = arith.mulf %623, %633 : vector<16x32xf32>
    %635 = arith.addf %632, %634 : vector<16x32xf32>
    %636 = math.tanh %635 : vector<16x32xf32>
    %cst_74 = arith.constant 1.000000e+00 : f32
    %637 = vector.broadcast %cst_74 : f32 to vector<16x32xf32>
    %638 = arith.subf %637, %631 : vector<16x32xf32>
    %639 = arith.mulf %638, %636 : vector<16x32xf32>
    %640 = arith.mulf %631, %609 : vector<16x32xf32>
    %641 = arith.addf %639, %640 : vector<16x32xf32>
    %c15_i32 = arith.constant 15 : i32
    %642 = vector.broadcast %c15_i32 : i32 to vector<16x1xi32>
    %643 = arith.cmpi sgt, %10, %642 : vector<16x1xi32>
    %644 = arith.extui %643 : vector<16x1xi1> to vector<16x1xi32>
    %645 = arith.sitofp %644 : vector<16x1xi32> to vector<16x1xf32>
    %646 = arith.subf %641, %609 : vector<16x32xf32>
    %647 = vector.broadcast %645 : vector<16x1xf32> to vector<16x32xf32>
    %648 = arith.mulf %647, %646 : vector<16x32xf32>
    %649 = arith.addf %609, %648 : vector<16x32xf32>
    %650 = vector.broadcast %645 : vector<16x1xf32> to vector<16x32xf32>
    %651 = arith.mulf %650, %641 : vector<16x32xf32>
    %c0_75 = arith.constant 0 : index
    %c0_76 = arith.constant 0 : index
    %652 = vector.load %arg7[%c0_75, %c0_76] : memref<16x32xf32, #tpu.memory_space<vmem>>, vector<16x32xf32>
    tpu.vector_store %arg7[%c0_75, %c0_76], %649 {strides = array<i32>} : memref<16x32xf32, #tpu.memory_space<vmem>>, vector<16x32xf32>,
    %653 = tpu.concatenate %51, %91, %131, %171, %211, %251, %291, %331, %371, %411, %451, %491, %531, %571, %611, %651 in 1 : vector<16x32xf32>, vector<16x32xf32>, vector<16x32xf32>, vector<16x32xf32>, vector<16x32xf32>, vector<16x32xf32>, vector<16x32xf32>, vector<16x32xf32>, vector<16x32xf32>, vector<16x32xf32>, vector<16x32xf32>, vector<16x32xf32>, vector<16x32xf32>, vector<16x32xf32>, vector<16x32xf32>, vector<16x32xf32> -> vector<16x512xf32>
    %c0_77 = arith.constant 0 : index
    %c0_78 = arith.constant 0 : index
    %654 = vector.load %arg6[%c0_77, %c0_78] : memref<16x512xf32, #tpu.memory_space<vmem>>, vector<16x512xf32>
    tpu.vector_store %arg6[%c0_77, %c0_78], %653 {strides = array<i32>} : memref<16x512xf32, #tpu.memory_space<vmem>>, vector<16x512xf32>,
    return
  }
  func.func @transform_0(%arg0: i32) -> (i32, i32, i32) {
    %c0_i32 = arith.constant 0 : i32
    %c0_i32_0 = arith.constant 0 : i32
    %c0_i32_1 = arith.constant 0 : i32
    return %c0_i32, %arg0, %c0_i32_0 : i32, i32, i32
  }
  func.func @transform_1(%arg0: i32) -> (i32, i32) {
    %c0_i32 = arith.constant 0 : i32
    %c0_i32_0 = arith.constant 0 : i32
    return %arg0, %c0_i32 : i32, i32
  }
  func.func @transform_2(%arg0: i32) -> (i32, i32) {
    %c0_i32 = arith.constant 0 : i32
    %c0_i32_0 = arith.constant 0 : i32
    %c0_i32_1 = arith.constant 0 : i32
    return %c0_i32, %c0_i32_0 : i32, i32
  }
  func.func @transform_3(%arg0: i32) -> (i32, i32) {
    %c0_i32 = arith.constant 0 : i32
    %c0_i32_0 = arith.constant 0 : i32
    %c0_i32_1 = arith.constant 0 : i32
    return %c0_i32, %c0_i32_0 : i32, i32
  }
  func.func @transform_4(%arg0: i32) -> (i32, i32) {
    %c0_i32 = arith.constant 0 : i32
    %c0_i32_0 = arith.constant 0 : i32
    %c0_i32_1 = arith.constant 0 : i32
    return %c0_i32, %c0_i32_0 : i32, i32
  }
  func.func @transform_5(%arg0: i32) -> (i32, i32) {
    %c0_i32 = arith.constant 0 : i32
    %c0_i32_0 = arith.constant 0 : i32
    return %arg0, %c0_i32 : i32, i32
  }
  func.func @transform_6(%arg0: i32) -> (i32, i32) {
    %c0_i32 = arith.constant 0 : i32
    %c0_i32_0 = arith.constant 0 : i32
    return %arg0, %c0_i32 : i32, i32
  }
}

</mosaic_0001>

<bundles_post_ra>
// kernel: tpu_custom_call.1
= control target key start
LH: loop header
LB: loop body
LE: loop exit
PB: predicated region body
PF: predicated region fallthrough
CT: control target
= control target key end

     0   :  { %s5768_s0 = inlined_call_operand.hbm [shape: f32[16,32,32], index: 0, kind: input, shape index: {}]   ;;  %s5769_s1 = inlined_call_operand.vmem [shape: s32[32,1], index: 1, kind: input, shape index: {}]   ;;  %s5770_s2 = inlined_call_operand.vmem [shape: f32[32,96], index: 2, kind: input, shape index: {}]   ;;  %s5771_s3 = inlined_call_operand.hbm [shape: f32[32,96], index: 3, kind: input, shape index: {}]   ;;  %s5772_s4 = inlined_call_operand.vmem [shape: f32[2,96], index: 4, kind: input, shape index: {}]   ;;  %s5773_s5 = inlined_call_operand.hbm [shape: f32[32,512], index: 5, kind: output, shape index: {0}]   ;;  %s5774_s6 = inlined_call_operand.hbm [shape: f32[32,32], index: 6, kind: output, shape index: {1}]  }
   0x1   :  { %5777 = sst [smem:[#allocation18_spill]] %s5771_s3 }
   0x2   :  { %12 = vsyncpa [#allocation3], 0 }
   0x3   :  { %14 = vsyncpa [#allocation3 + $0x1], 0 }
   0x4   :  { %15 = vsyncpa [#allocation6], 0 }
   0x5   :  { %16 = vsyncpa [#allocation4], 0 }
   0x6   :  { %18 = vsyncpa [#allocation4 + $0x1], 0 }
   0x7   :  { %19 = vsyncpa [#allocation9], 0 }
   0x8   :  { %21 = vsyncpa [#allocation9 + $0x1], 0  ;;  %s4652_s21 = smov 0   ;;  %s4654_s22 = smov 0  }
   0x9   :  { %s4656_s23 = smov 0   ;;  %s4658_s24 = smov 0  }
   0xa LB: > { %s4673_s25 = sadd.s32 4294967295, %s4596_s24   ;;  %s3587_s26 = sadd.s32 4294967294, %s4596_s24   ;;  %s4596_s24 = sphi %s4658_s24, %s5792_s24   ;;  %s4592_s23 = sphi %s4656_s23, %s5791_s23   ;;  %s4588_s22 = sphi %s4654_s22, %s5790_s22   ;;  %s4584_s21 = sphi %s4652_s21, %s5789_s21  }
   0xb   : > { %s4677_s27 = sadd.s32 1, %s4596_s24   ;;  %s34_s28 = sadd.s32 1, %s4592_s23 }
   0xc   : > { %s31_s29 = ssub.s32 %s4596_s24, %s4677_s27  ;;  %p41_p0 = scmp.ne.s32.totalorder %s4592_s23, %s4588_s22 }
   0xd   : > { %p32_p1 = scmp.eq.s32.totalorder %s31_s29, 0  ;;  %p42_p2 = scmp.eq.s32.totalorder %s4596_s24, 0 }
   0xe   : > { %p47_p3 = scmp.ne.s32.totalorder %s4588_s22, %s4584_s21  ;;  %p48_p4 = scmp.eq.s32.totalorder %s4673_s25, 0 }
   0xf   : > { %s4689_s30 = scalar_select %p32_p1, %s4592_s23, %s34_s28  }
  0x10   : > { %p4691_p5 = por %p42_p2, %p41_p0  ;;  %p4697_p6 = por %p48_p4, %p47_p3 }
  0x11   : > { %5778 = sst [smem:[#allocation17_spill]] %s4689_s30  ;;  %p160_p7 = scmp.eq.s32.totalorder %s4673_s25, 1 }
  0x12   : > { %s5780_s8 = scalar_select %p4697_p6, 1, 0 }
  0x13   : > { %p166_p8 = scmp.eq.s32.totalorder %s3587_s26, 1  ;;  %p3588_p9 = scmp.ge.s32.totalorder %s4596_s24, 1 }
  0x14   : > { %p199_p10 = scmp.lt.s32.totalorder %s4596_s24, 3  ;;  %p4704_p11 = por %p160_p7, %p41_p0 }
  0x15   : > { %p4708_p12 = por %p166_p8, %p47_p3  ;;  %s4598_s12 = smov [#allocation5]  }
  0x16   : > { %s5781_s9 = scalar_select %p4704_p11, 1, 0 }
  0x17   : > { %s5782_s10 = scalar_select %p4708_p12, 1, 0 }
  0x18   : > { %p4712_p13 = pnand %p3588_p9, %p199_p10  ;;  %s214_s13 = sshll.u32 %s4598_s12, 4  ;;  %s215_s13 = int_to_ptr.vmem [resolvable:$true] %s214_s13 }
  0x19   : > { %s4483_s14 = scalar_lea.vmem %s215_s13, 512  ;;  %p4491_p8 = scmp.lt.s32.totalorder %s215_s13, %s215_s13 }
  0x1a   : > { %p4123_p1 = pneg %p4712_p13  ;;  %p4484_p7 = scmp.ne.s32.totalorder %s215_s13, %s4483_s14 }
  0x1b   : > { %p4492_p6 = scmp.lt.s32.totalorder %s4483_s14, %s4483_s14 }
  0x1c   : > { %p4124_p2 = pnand %p4123_p1, %p48_p4 }
  0x1d   : > { %p4493_p12 = por %p4492_p6, %p4491_p8 }
  0x1e   : > { %p4474_p0 = pneg %p4124_p2 }
  0x20   : > { %p4486_p11 = pnand %p4484_p7, %p4474_p0 }
  0x22   : > { %p4487_p3 = pneg %p4486_p11 }
  0x24   : > { %p4494_p9 = pnand %p4493_p12, %p4487_p3 }
  0x26   : > { %4497 = shalt.err (!%p4494_p9)
}
  0x27   : > { %s4599_s15 = smov 128   ;;  %s4600_s16 = smov 8  }
  0x28   : > { %s5784_s3 = sld [smem:[#allocation18_spill]]  ;;  %p3590_p10 = scmp.ge.s32.totalorder %s4596_s24, 2 }
  0x2a   : > { %227 = sbr.rel (%p3590_p10) target bundleno = 60 (0x3c), region = 28 }
  0x2e   : > { %4126 = dma.hbm_to_vmem [thread:$0]  (!%p4124_p2), %s5784_s3, 512, %s215_s13, [#allocation6], %s4599_s15, %s4599_s15, %s4600_s16  }
  0x2f   : > { %s231_s19 = sand.u32 1, %s4592_s23   ;;  %s3738_s20 = sshll.u32 %s4596_s24, 8 }
  0x30   : > { %s3591_s26 = sshll.u32 %s231_s19, 8  ;;  %s241_s12 = scalar_lea.hbm %s5768_s0, %s3738_s20 }
  0x31   : > { %s4108_s13 = scalar_select %p4691_p5, [#allocation0], [#allocation12] }
  0x32   : > { %s235_s14 = scalar_lea.vmem [#allocation2], %s3591_s26  ;;  %s4601_s17 = smov 512  }
  0x33   : > { %s254_s15 = sshll.u32 %s235_s14, 4  ;;  %s246_s16 = sld [smem:[%s4108_s13]]   ;;  %s255_s15 = int_to_ptr.vmem [resolvable:$true] %s254_s15 }
  0x34   : > { %4109 = sst [smem:[#allocation11]] (%p4691_p5), %s4601_s17  ;;  %s4602_s18 = smov 256  }
  0x35   : > { %4110 = sst [smem:[#allocation11 + $0x1]] (%p4691_p5), %s4602_s18  ;;  %s4603_s3 = smov 2  }
  0x36   : > { %4111 = sst [smem:[#allocation11 + $0x2]] (%p4691_p5), %s4603_s3  ;;  %s4604_s30 = smov 128  }
  0x37   : > { %4112 = sst [smem:[#allocation11 + $0x3]] (%p4691_p5), %s4604_s30  ;;  %s4605_s26 = smov 8  }
  0x38   : > { %4113 = sst [smem:[#allocation11 + $0x4]] (%p4691_p5), %s4604_s30  ;;  %s232_s29 = scalar_lea.sflag [#allocation3], %s231_s19 }
  0x39   : > { %s3594_s20 = sshll.u32 %s246_s16, 26  ;;  %4114 = sst [smem:[#allocation11 + $0x5]] (%p4691_p5), %s4605_s26 }
  0x3a   : > { %s3595_s28 = sadd.s32 134217728, %s3594_s20  ;;  %s4606_s13 = smov 131072  }
  0x3b   : > { %4115 = dma.general (%p4691_p5), %s241_s12, 4096, %s255_s15, %s232_s29, %s4606_s13, [#allocation11], %s3595_s28, 0  }
  0x3c PF: > { %288 = sbr.rel (%p4712_p13) target bundleno = 11222 (0x2bd6), region = 40  ;;  %s4750_s3 = sand.u32 (!%p4712_p13), 1, %s4588_s22  }
  0x3d   : > { %s3597_s30 = sshll.u32 (!%p4712_p13), %s4750_s3, 8  ;;  %s291_s14 = scalar_lea.sflag (!%p4712_p13), [#allocation3], %s4750_s3 }
  0x3e   : > { %s4754_s16 = scalar_lea.vmem (!%p4712_p13), [#allocation2], %s3597_s30  ;;  %p5785_p6 = scmp.ne.s32.totalorder (!%p4712_p13), %s5780_s8, 0 }
  0x41   : > { %4567 = dma.done.wait (%p5785_p6), %s291_s14, 4096  }
  0x42   : > { %4569 = vsyncadd (%p5785_p6), %s291_s14, 4294963200 }
  0x43   : > { %4571 = dma.done.wait (%p48_p4), [#allocation6], 512  }
  0x44   : > { %4573 = vsyncadd (%p48_p4), [#allocation6], 4294966784  ;;  %v4607_v0 = vmov 0.0   ;;  %v382_v1 = vld [vmem:[%s5770_s2 + $0x18] sm:$0xff]  ;;  %v381_v3 = vld [vmem:[%s5770_s2 + $0x10] sm:$0xff]  ;;  %vm387_vm0 = vcmask 261120   ;;  %v383_v11 = vlaneseq }
  0x45   : > { %3938 = vmatprep.mubr.f32.mxu1 %v4607_v0  ;;  %v4768_v2 = vld [vmem:[#allocation5 + $0x18] sm:$0xff]  ;;  %3874 = vmatprep.subr.mxu0 %v382_v1  ;;  %v4774_v4 = vld [vmem:[#allocation5 + $0x10] sm:$0xff]  ;;  %v380_v5 = vld [vmem:[%s5770_s2 + $0x8] sm:$0xff]  ;;  %s4608_s28 = smov 64   ;;  %s3601_s29 = sshll.u32 %s4673_s25, 1  ;;  %v4609_v38 = vmov 0  }
  0x46   : > { %3930 = vmatprep.subr.mxu1 %v4768_v2  ;;  %3875 = vmatpush3.msra.mxu0 %v382_v1  ;;  %v4780_v6 = vld [vmem:[#allocation5 + $0x8] sm:$0xff]  ;;  %v379_v7 = vld [vmem:[%s5770_s2] sm:$0xff]  ;;  %v384_v12 = vshrl.u32 %v383_v11, 7  ;;  %p339_p4 = scmp.lt.s32.totalorder %s3601_s29, 3  ;;  %s4610_s11 = smov 96   ;;  %v349_v52 = vld [vmem:[%s4754_s16 + $0x10] sm:$0xff] }
  0x47   : > { %3931 = vmatpush3.msra.mxu1 %v4768_v2  ;;  %3876 = vmatprep.subr.mxu0 %v381_v3  ;;  %v4787_v8 = vld [vmem:[#allocation5] sm:$0xff]  ;;  %v348_v10 = vld [vmem:[%s4754_s16 + $0x8] sm:$0xff]  ;;  %v350_v53 = vld [vmem:[%s4754_s16 + $0x18] sm:$0xff]  ;;  %s3599_s19 = sshll.u32 %s4750_s3, 6  ;;  %s3600_s8 = sshll.u32 %s4750_s3, 4 }
  0x48   : > { %3932 = vmatprep.subr.mxu1 %v4774_v4  ;;  %3877 = vmatpush3.msra.mxu0 %v381_v3  ;;  %v347_v9 = vld [vmem:[%s4754_s16] sm:$0xff]  ;;  %v717_v13 = vsub.s32 1, %v384_v12  ;;  %v385_v21 = vsub.s32 0, %v384_v12  ;;  %s5794_s29 = smov (!%p339_p4, %s3601_s29), 3  ;;  %s5645_s12 = scalar_lea.vmem [#allocation7], %s3599_s19 }
  0x49   : > { %3933 = vmatpush3.msra.mxu1 %v4774_v4  ;;  %3878 = vmatprep.subr.mxu0 %v380_v5  ;;  %v346_v14 = vld [vmem:[%s5772_s4] sm:$0x3]  ;;  %s3602_s13 = sshll.u32 %s5794_s29, 3  ;;  %s3444_s15 = sshll.u32 %s5645_s12, 4  ;;  %s5680_s15 = int_to_ptr.vmem [resolvable:$true] %s3444_s15 }
  0x4a   : > { %3934 = vmatprep.subr.mxu1 %v4780_v6  ;;  %3879 = vmatpush3.msra.mxu0 %v380_v5  ;;  %v4819_v16 = vrot.slane %v346_v14, %v717_v13  ;;  %v4825_v23 = vrot.slane %v346_v14, %v385_v21  ;;  %s4833_s7 = scalar_lea.vmem %s5769_s1, %s3602_s13  ;;  %s5676_s17 = scalar_lea.vmem [#allocation8], %s3600_s8 }
  0x4b   : > { %3935 = vmatpush3.msra.mxu1 %v4780_v6  ;;  %3880 = vmatprep.subr.mxu0 %v379_v7  ;;  %v4836_v34 = vld [vmem:[%s4833_s7] sm:$0xff]  ;;  %v4839_v35 = vld [vmem:[%s4833_s7 + $0x8] sm:$0xff]  ;;  %s3460_s18 = sshll.u32 %s5676_s17, 4  ;;  %s3740_s20 = sshll.u32 %s4673_s25, 10  ;;  %s5683_s18 = int_to_ptr.vmem [resolvable:$true] %s3460_s18 }
  0x4c   : > { %3936 = vmatprep.subr.mxu1 %v4787_v8  ;;  %3881 = vmatpush3.msra.mxu0 %v379_v7  ;;  %vm849_vm1 = vcmp.gt.s32.totalorder %v4836_v34, 0  ;;  %vm850_vm2 = vcmp.gt.s32.totalorder %v4839_v35, 0  ;;  %vm1006_vm3 = vcmp.gt.s32.totalorder %v4836_v34, 1  ;;  %vm1007_vm4 = vcmp.gt.s32.totalorder %v4839_v35, 1  ;;  %s3741_s26 = sshll.u32 %s4673_s25, 8  ;;  %s5688_s13 = scalar_lea.hbm %s5773_s5, %s3740_s20 }
  0x4d   : > { %3882 = vmatprep.mubr.msk.f32.mxu0 %vm387_vm0, %v347_v9  ;;  %3937 = vmatpush3.msra.mxu1 %v4787_v8  ;;  %v3637_v36 = vsel %vm849_vm1, 1.0, %v4607_v0  ;;  %v3638_v37 = vsel %vm850_vm2, 1.0, %v4607_v0  ;;  %vm1167_vm5 = vcmp.gt.s32.totalorder %v4836_v34, 2  ;;  %vm1168_vm6 = vcmp.gt.s32.totalorder %v4839_v35, 2  ;;  %s3425_s25 = scalar_lea.sflag [#allocation4], %s4750_s3  ;;  %p5786_p11 = scmp.ne.s32.totalorder %s5781_s9, 0 }
  0x4e   : > { %3883 = vmatmul.mubr.msk.f32.vlgmr.msra.gmra.mxu0 %vm387_vm0, %v348_v10  ;;  %3939 = vmatmul.mubr.f32.vlgmr.msra.gmra.mxu1 %v4607_v0  ;;  %v4187_v39 = vpack.i.bf16 %v3638_v37, %v3637_v36  ;;  %vm1328_vm7 = vcmp.gt.s32.totalorder %v4836_v34, 3  ;;  %vm1329_vm8 = vcmp.gt.s32.totalorder %v4839_v35, 3  ;;  %vm1489_vm9 = vcmp.gt.s32.totalorder %v4836_v34, 4  ;;  %s4612_s19 = smov [#allocation7]  }
  0x4f   : > { %3941 = vmatprep.subr.mxu1 %v4768_v2  ;;  %4018 = vmatprep.subr.mxu0 %v4768_v2  ;;  %vm1490_vm10 = vcmp.gt.s32.totalorder %v4839_v35, 4  ;;  %vm1650_vm11 = vcmp.gt.s32.totalorder %v4836_v34, 5  ;;  %vm1651_vm12 = vcmp.gt.s32.totalorder %v4839_v35, 5  ;;  %v359_v35 = vld [vmem:[%s4754_s16 + $0x60] sm:$0xff]  ;;  %s4502_s8 = sshll.u32 %s4612_s19, 4  ;;  %s4503_s8 = int_to_ptr.vmem [resolvable:$false] %s4502_s8 }
  0x50   : > { %3942 = vmatpush3.msra.mxu1 %v4768_v2  ;;  %4019 = vmatpush3.msra.mxu0 %v4768_v2  ;;  %s4504_s20 = scalar_lea.vmem %s4503_s8, 2048  ;;  %p4505_p1 = scmp.lt.s32.totalorder %s5680_s15, %s4503_s8 }
  0x51   : > { %3943 = vmatprep.subr.mxu1 %v4774_v4  ;;  %4020 = vmatprep.subr.mxu0 %v4774_v4 }
  0x52   : > { %3944 = vmatpush3.msra.mxu1 %v4774_v4  ;;  %4021 = vmatpush3.msra.mxu0 %v4774_v4 }
  0x53   : > { %3945 = vmatprep.subr.mxu1 %v4780_v6  ;;  %4022 = vmatprep.subr.mxu0 %v4780_v6 }
  0x54   : > { %3946 = vmatpush3.msra.mxu1 %v4780_v6  ;;  %4023 = vmatpush3.msra.mxu0 %v4780_v6 }
  0x55   : > { %3947 = vmatprep.subr.mxu1 %v4787_v8  ;;  %4024 = vmatprep.subr.mxu0 %v4787_v8 }
  0x56   : > { %3948 = vmatpush3.msra.mxu1 %v4787_v8  ;;  %4025 = vmatpush3.msra.mxu0 %v4787_v8 }
  0x57   : > { %3952 = vmatprep.subr.mxu1 %v4768_v2  ;;  %4040 = vmatprep.subr.mxu0 %v4768_v2 }
  0x58   : > { %4186 = vset.pattern.permute.xlu0 %v4609_v38  ;;  %4197 = vset.pattern.permute.xlu1 %v4609_v38 }
  0x59   : > { %3885 = vmatprep.mubr.msk.f32.mxu0 %vm387_vm0, %v349_v52 }
  0x5a   : > { %3886 = vmatmul.mubr.msk.f32.gmra.mxu0 %vm387_vm0, %v350_v53  ;;  %v351_v53 = vld [vmem:[%s4754_s16 + $0x20] sm:$0xff] }
  0x5b   : > { %3888 = vmatprep.mubr.msk.f32.mxu0 %vm387_vm0, %v351_v53 }
 0x10e   : > { %v3940_v15 = vpop.f32.mrf.mxu1  ;;  %v3884_v20 = vpop.f32.mrf.mxu0 }
 0x10f   : > { %v794_v19 = vadd.f32 %v3940_v15, %v4819_v16  ;;  %v556_v25 = vadd.f32 %v3884_v20, %v4825_v23 }
 0x110   : > { %v788_v17 = vpop.f32.mrf.mxu1  ;;  %v550_v22 = vpop.f32.mrf.mxu0 }
 0x111   : > { %v789_v18 = vadd.f32 %v788_v17, %v4819_v16  ;;  %v551_v24 = vadd.f32 %v550_v22, %v4825_v23  ;;  %v798_v27 = vadd.f32 %v794_v19, %v556_v25 }
 0x113   : > { %813 = vrot.lane.b32.xlu0 %v789_v18, %s4608_s28  ;;  %v797_v26 = vadd.f32 %v789_v18, %v551_v24  ;;  %v3636_v29 = vmul.f32 -1.442695, %v798_v27 }
 0x115   : > { %v3635_v28 = vmul.f32 -1.442695, %v797_v26 }
 0x117   : > { %815 = vrot.lane.b32.xlu0 %v794_v19, %s4608_s28  ;;  %4268 = vpow2.f32 %v3635_v28 }
 0x118   : > { %4270 = vpow2.f32 %v3636_v29 }
 0x11a   : > { %v3887_v17 = vpop.f32.mrf.mxu0 }
 0x11b   : > { %4188 = vperm.xlu0 %4186, %v4187_v39   ;;  %v566_v19 = vadd.f32 %v3887_v17, %v4825_v23 }
 0x11c   : > { %v560_v18 = vpop.f32.mrf.mxu0 }
 0x11d   : > { %v561_v20 = vadd.f32 %v560_v18, %v4825_v23 }
 0x124   : > { %v4269_v30 = vpop.eup %4268 }
 0x125   : > { %v805_v31 = vadd.f32 1.0, %v4269_v30  ;;  %v4271_v32 = vpop.eup %4270 }
 0x126   : > { %v806_v33 = vadd.f32 1.0, %v4271_v32 }
 0x127   : > { %4272 = vrcp.f32 %v805_v31 }
 0x128   : > { %4274 = vrcp.f32 %v806_v33 }
 0x134   : > { %v4273_v40 = vpop.eup %4272 }
 0x135   : > { %v4275_v43 = vpop.eup %4274  ;;  %v833_v55 = vsub.f32 1.0, %v4273_v40  ;;  %v845_v57 = vmul.f32 0.0, %v4273_v40 }
 0x136   : > { %v834_v61 = vsub.f32 1.0, %v4275_v43  ;;  %v846_v3 = vmul.f32 0.0, %v4275_v43 }
 0x185   : > { %v814_v41 = vpop.permute.xlu0 %813 }
 0x186   : > { %v819_v42 = vmul.f32 %v4273_v40, %v814_v41 }
 0x188   : > { %823 = vrot.lane.b32.xlu1 %v819_v42, %s4608_s28 }
 0x189   : > { %v816_v44 = vpop.permute.xlu0 %815 }
 0x18a   : > { %v820_v45 = vmul.f32 %v4275_v43, %v816_v44  ;;  %v3643_v43 = vsel %vm1006_vm3, 1.0, %v4607_v0  ;;  %v3644_v44 = vsel %vm1007_vm4, 1.0, %v4607_v0 }
 0x18c   : > { %825 = vrot.lane.b32.xlu1 %v820_v45, %s4608_s28 }
 0x196   : > { %v4189_v54 = vpop.permute.xlu0 %4188 }
 0x197   : > { %v4190_v59 = vunpack.i.l.bf16 %v4189_v54  ;;  %v4191_v63 = vunpack.i.h.bf16 %v4189_v54  ;;  %v352_v54 = vld [vmem:[%s4754_s16 + $0x28] sm:$0xff] }
 0x198   : > { %3889 = vmatmul.mubr.msk.f32.gmra.mxu0 %vm387_vm0, %v352_v54 }
 0x1fa   : > { %v824_v46 = vpop.permute.xlu1 %823 }
 0x1fb   : > { %v829_v47 = vadd.f32 %v824_v46, %v551_v24  ;;  %v4192_v46 = vpack.i.bf16 %v3644_v44, %v3643_v43 }
 0x1fd   : > { %4276 = vtanh.f32 %v829_v47 }
 0x1fe   : > { %v826_v48 = vpop.permute.xlu1 %825 }
 0x1ff   : > { %v830_v49 = vadd.f32 %v826_v48, %v556_v25 }
 0x201   : > { %4278 = vtanh.f32 %v830_v49 }
 0x20a   : > { %v4277_v50 = vpop.eup %4276 }
 0x20b   : > { %837 = vrot.lane.b32.xlu1 %v4277_v50, %s4610_s11 }
 0x20e   : > { %v4279_v51 = vpop.eup %4278 }
 0x20f   : > { %839 = vrot.lane.b32.xlu1 %v4279_v51, %s4610_s11 }
 0x27d   : > { %v838_v56 = vpop.permute.xlu1 %837 }
 0x27e   : > { %v843_v58 = vmul.f32 %v838_v56, %v833_v55 }
 0x280   : > { %v847_v60 = vadd.f32 %v845_v57, %v843_v58 }
 0x281   : > { %v840_v62 = vpop.permute.xlu1 %839 }
 0x282   : > { %v4853_v1 = vmul.f32 %v4190_v59, %v847_v60  ;;  %v844_v5 = vmul.f32 %v840_v62, %v834_v61 }
 0x284   : > { %v848_v7 = vadd.f32 %v846_v3, %v844_v5  ;;  %871 = vrot.lane.b32.xlu0 %v4853_v1, %s4610_s11 }
 0x286   : > { %v4857_v9 = vmul.f32 %v4191_v63, %v848_v7 }
 0x288   : > { %873 = vrot.lane.b32.xlu1 %v4857_v9, %s4610_s11 }
 0x2f6   : > { %v872_v10 = vpop.permute.xlu0 %871 }
 0x2f7   : > { %3949 = vmatprep.mubr.msk.f32.mxu1 %vm387_vm0, %v872_v10 }
 0x2fa   : > { %v874_v11 = vpop.permute.xlu1 %873 }
 0x2fb   : > { %3950 = vmatmul.mubr.msk.f32.vlgmr.msra.gmra.mxu1 %vm387_vm0, %v874_v11 }
 0x2fc   : > { %3953 = vmatpush3.msra.mxu1 %v4768_v2 }
 0x2fd   : > { %3954 = vmatprep.subr.mxu1 %v4774_v4 }
 0x2fe   : > { %3955 = vmatpush3.msra.mxu1 %v4774_v4 }
 0x2ff   : > { %3956 = vmatprep.subr.mxu1 %v4780_v6 }
 0x300   : > { %3957 = vmatpush3.msra.mxu1 %v4780_v6 }
 0x301   : > { %3958 = vmatprep.subr.mxu1 %v4787_v8 }
 0x302   : > { %3959 = vmatpush3.msra.mxu1 %v4787_v8 }
 0x303   : > { %3963 = vmatprep.subr.mxu1 %v4768_v2 }
 0x3bb   : > { %v3951_v12 = vpop.f32.mrf.mxu1 }
 0x3bc   : > { %v951_v13 = vadd.f32 %v3951_v12, %v4819_v16 }
 0x3bd   : > { %v945_v14 = vpop.f32.mrf.mxu1 }
 0x3be   : > { %v946_v15 = vadd.f32 %v945_v14, %v4819_v16  ;;  %972 = vrot.lane.b32.xlu1 %v951_v13, %s4608_s28  ;;  %v955_v21 = vadd.f32 %v951_v13, %v566_v19 }
 0x3c0   : > { %970 = vrot.lane.b32.xlu0 %v946_v15, %s4608_s28  ;;  %v954_v22 = vadd.f32 %v946_v15, %v561_v20  ;;  %v3642_v24 = vmul.f32 -1.442695, %v955_v21 }
 0x3c2   : > { %v3641_v25 = vmul.f32 -1.442695, %v954_v22  ;;  %4280 = vpow2.f32 %v3642_v24 }
 0x3c4   : > { %4282 = vpow2.f32 %v3641_v25 }
 0x3cf   : > { %v4281_v26 = vpop.eup %4280 }
 0x3d0   : > { %v963_v28 = vadd.f32 1.0, %v4281_v26 }
 0x3d1   : > { %v4283_v27 = vpop.eup %4282 }
 0x3d2   : > { %v962_v29 = vadd.f32 1.0, %v4283_v27  ;;  %4284 = vrcp.f32 %v963_v28 }
 0x3d4   : > { %4286 = vrcp.f32 %v962_v29 }
 0x3df   : > { %v4285_v30 = vpop.eup %4284 }
 0x3e0   : > { %v991_v49 = vsub.f32 1.0, %v4285_v30  ;;  %v1003_v55 = vmul.f32 %v4285_v30, %v4857_v9 }
 0x3e1   : > { %v4287_v33 = vpop.eup %4286 }
 0x3e2   : > { %v990_v50 = vsub.f32 1.0, %v4287_v33  ;;  %v1002_v56 = vmul.f32 %v4287_v33, %v4853_v1 }
 0x430   : > { %v973_v31 = vpop.permute.xlu1 %972 }
 0x431   : > { %v977_v32 = vmul.f32 %v4285_v30, %v973_v31 }
 0x432   : > { %v971_v36 = vpop.permute.xlu0 %970 }
 0x433   : > { %v976_v37 = vmul.f32 %v4287_v33, %v971_v36  ;;  %982 = vrot.lane.b32.xlu1 %v977_v32, %s4608_s28 }
 0x435   : > { %980 = vrot.lane.b32.xlu0 %v976_v37, %s4608_s28 }
 0x4a5   : > { %v983_v38 = vpop.permute.xlu1 %982 }
 0x4a6   : > { %v987_v39 = vadd.f32 %v983_v38, %v566_v19 }
 0x4a7   : > { %v981_v40 = vpop.permute.xlu0 %980 }
 0x4a8   : > { %4288 = vtanh.f32 %v987_v39  ;;  %v986_v41 = vadd.f32 %v981_v40, %v561_v20  ;;  %v3890_v20 = vpop.f32.mrf.mxu0 }
 0x4a9   : > { %v576_v22 = vadd.f32 %v3890_v20, %v4825_v23 }
 0x4aa   : > { %4290 = vtanh.f32 %v986_v41  ;;  %v570_v21 = vpop.f32.mrf.mxu0 }
 0x4ab   : > { %v571_v24 = vadd.f32 %v570_v21, %v4825_v23 }
 0x4b5   : > { %v4289_v42 = vpop.eup %4288 }
 0x4b6   : > { %996 = vrot.lane.b32.xlu1 %v4289_v42, %s4610_s11 }
 0x4b7   : > { %v4291_v45 = vpop.eup %4290 }
 0x4b8   : > { %994 = vrot.lane.b32.xlu0 %v4291_v45, %s4610_s11 }
 0x4bc   : > { %4193 = vperm.xlu0 %4186, %v4192_v46   ;;  %v3649_v46 = vsel %vm1167_vm5, 1.0, %v4607_v0 }
 0x528   : > { %v997_v47 = vpop.permute.xlu1 %996 }
 0x529   : > { %v1001_v51 = vmul.f32 %v997_v47, %v991_v49  ;;  %v3650_v47 = vsel %vm1168_vm6, 1.0, %v4607_v0 }
 0x52a   : > { %v995_v48 = vpop.permute.xlu0 %994  ;;  %v4198_v49 = vpack.i.bf16 %v3650_v47, %v3649_v46 }
 0x52b   : > { %v1000_v52 = vmul.f32 %v995_v48, %v990_v50  ;;  %v1005_v57 = vadd.f32 %v1003_v55, %v1001_v51 }
 0x52d   : > { %v1004_v58 = vadd.f32 %v1002_v56, %v1000_v52  ;;  %v1013_v60 = vsub.f32 %v1005_v57, %v4857_v9  ;;  %v353_v56 = vld [vmem:[%s4754_s16 + $0x30] sm:$0xff] }
 0x52e   : > { %3891 = vmatprep.mubr.msk.f32.mxu0 %vm387_vm0, %v353_v56 }
 0x52f   : > { %v1012_v61 = vsub.f32 %v1004_v58, %v4853_v1 }
 0x537   : > { %v4194_v59 = vpop.permute.xlu0 %4193 }
 0x538   : > { %v4196_v62 = vunpack.i.h.bf16 %v4194_v59  ;;  %v4195_v63 = vunpack.i.l.bf16 %v4194_v59 }
 0x53a   : > { %v1025_v3 = vmul.f32 %v4196_v62, %v1013_v60  ;;  %v4893_v5 = vmul.f32 %v4196_v62, %v1005_v57  ;;  %v1024_v7 = vmul.f32 %v4195_v63, %v1012_v61  ;;  %v4895_v10 = vmul.f32 %v4195_v63, %v1004_v58  ;;  %v354_v57 = vld [vmem:[%s4754_s16 + $0x38] sm:$0xff] }
 0x53b   : > { %3892 = vmatmul.mubr.msk.f32.gmra.mxu0 %vm387_vm0, %v354_v57 }
 0x53c   : > { %v4898_v11 = vadd.f32 %v1025_v3, %v4857_v9  ;;  %v4901_v12 = vadd.f32 %v1024_v7, %v4853_v1 }
 0x53e   : > { %1034 = vrot.lane.b32.xlu0 %v4898_v11, %s4610_s11  ;;  %1032 = vrot.lane.b32.xlu1 %v4901_v12, %s4610_s11 }
 0x5b0   : > { %v1035_v13 = vpop.permute.xlu0 %1034  ;;  %v1033_v14 = vpop.permute.xlu1 %1032 }
 0x5b1   : > { %3960 = vmatprep.mubr.msk.f32.mxu1 %vm387_vm0, %v1033_v14 }
 0x5b2   : > { %3961 = vmatmul.mubr.msk.f32.vlgmr.msra.gmra.mxu1 %vm387_vm0, %v1035_v13 }
 0x5b3   : > { %3964 = vmatpush3.msra.mxu1 %v4768_v2 }
 0x5b4   : > { %3965 = vmatprep.subr.mxu1 %v4774_v4 }
 0x5b5   : > { %3966 = vmatpush3.msra.mxu1 %v4774_v4 }
 0x5b6   : > { %3967 = vmatprep.subr.mxu1 %v4780_v6 }
 0x5b7   : > { %3968 = vmatpush3.msra.mxu1 %v4780_v6 }
 0x5b8   : > { %3969 = vmatprep.subr.mxu1 %v4787_v8 }
 0x5b9   : > { %3970 = vmatpush3.msra.mxu1 %v4787_v8 }
 0x5ba   : > { %3974 = vmatprep.subr.mxu1 %v4768_v2 }
 0x672   : > { %v3962_v15 = vpop.f32.mrf.mxu1 }
 0x673   : > { %v1112_v17 = vadd.f32 %v3962_v15, %v4819_v16 }
 0x674   : > { %v1106_v18 = vpop.f32.mrf.mxu1 }
 0x675   : > { %v1107_v19 = vadd.f32 %v1106_v18, %v4819_v16  ;;  %1133 = vrot.lane.b32.xlu0 %v1112_v17, %s4608_s28  ;;  %v1116_v25 = vadd.f32 %v1112_v17, %v576_v22 }
 0x677   : > { %1131 = vrot.lane.b32.xlu1 %v1107_v19, %s4608_s28  ;;  %v1115_v26 = vadd.f32 %v1107_v19, %v571_v24  ;;  %v3648_v27 = vmul.f32 -1.442695, %v1116_v25 }
 0x679   : > { %v3647_v28 = vmul.f32 -1.442695, %v1115_v26  ;;  %4292 = vpow2.f32 %v3648_v27  ;;  %v3893_v26 = vpop.f32.mrf.mxu0 }
 0x67b   : > { %4294 = vpow2.f32 %v3647_v28  ;;  %v580_v27 = vpop.f32.mrf.mxu0  ;;  %v586_v28 = vadd.f32 %v3893_v26, %v4825_v23 }
 0x686   : > { %v4293_v29 = vpop.eup %4292 }
 0x687   : > { %v1124_v31 = vadd.f32 1.0, %v4293_v29  ;;  %v581_v29 = vadd.f32 %v580_v27, %v4825_v23 }
 0x688   : > { %v4295_v30 = vpop.eup %4294 }
 0x689   : > { %v1123_v32 = vadd.f32 1.0, %v4295_v30  ;;  %4296 = vrcp.f32 %v1124_v31 }
 0x68b   : > { %4298 = vrcp.f32 %v1123_v32 }
 0x696   : > { %v4297_v33 = vpop.eup %4296 }
 0x697   : > { %v1152_v52 = vsub.f32 1.0, %v4297_v33  ;;  %v1164_v58 = vmul.f32 %v4297_v33, %v4898_v11 }
 0x698   : > { %v4299_v38 = vpop.eup %4298 }
 0x699   : > { %v1151_v53 = vsub.f32 1.0, %v4299_v38  ;;  %v1163_v59 = vmul.f32 %v4299_v38, %v4901_v12 }
 0x6e7   : > { %v1134_v36 = vpop.permute.xlu0 %1133 }
 0x6e8   : > { %v1138_v37 = vmul.f32 %v4297_v33, %v1134_v36 }
 0x6e9   : > { %v1132_v39 = vpop.permute.xlu1 %1131 }
 0x6ea   : > { %v1137_v40 = vmul.f32 %v4299_v38, %v1132_v39  ;;  %1143 = vrot.lane.b32.xlu0 %v1138_v37, %s4608_s28 }
 0x6ec   : > { %1141 = vrot.lane.b32.xlu1 %v1137_v40, %s4608_s28 }
 0x75c   : > { %v1144_v41 = vpop.permute.xlu0 %1143 }
 0x75d   : > { %v1148_v42 = vadd.f32 %v1144_v41, %v576_v22 }
 0x75e   : > { %v1142_v43 = vpop.permute.xlu1 %1141 }
 0x75f   : > { %4300 = vtanh.f32 %v1148_v42  ;;  %v1147_v44 = vadd.f32 %v1142_v43, %v571_v24 }
 0x761   : > { %4302 = vtanh.f32 %v1147_v44 }
 0x76c   : > { %v4301_v45 = vpop.eup %4300 }
 0x76d   : > { %1157 = vrot.lane.b32.xlu0 %v4301_v45, %s4610_s11 }
 0x76e   : > { %v4303_v48 = vpop.eup %4302 }
 0x76f   : > { %1155 = vrot.lane.b32.xlu1 %v4303_v48, %s4610_s11 }
 0x773   : > { %4199 = vperm.xlu1 %4197, %v4198_v49  }
 0x7df   : > { %v1158_v50 = vpop.permute.xlu0 %1157 }
 0x7e0   : > { %v1162_v54 = vmul.f32 %v1158_v50, %v1152_v52  ;;  %v3656_v52 = vsel %vm1329_vm8, 1.0, %v4607_v0 }
 0x7e1   : > { %v1156_v51 = vpop.permute.xlu1 %1155 }
 0x7e2   : > { %v1161_v55 = vmul.f32 %v1156_v51, %v1151_v53  ;;  %v1166_v60 = vadd.f32 %v1164_v58, %v1162_v54  ;;  %v3655_v51 = vsel %vm1328_vm7, 1.0, %v4607_v0 }
 0x7e3   : > { %v4203_v54 = vpack.i.bf16 %v3656_v52, %v3655_v51 }
 0x7e4   : > { %v1165_v61 = vadd.f32 %v1163_v59, %v1161_v55  ;;  %v1174_v63 = vsub.f32 %v1166_v60, %v4898_v11 }
 0x7e6   : > { %v1173_v3 = vsub.f32 %v1165_v61, %v4901_v12 }
 0x7ee   : > { %v4200_v62 = vpop.permute.xlu1 %4199 }
 0x7ef   : > { %v4202_v7 = vunpack.i.h.bf16 %v4200_v62  ;;  %v4201_v13 = vunpack.i.l.bf16 %v4200_v62  ;;  %v356_v62 = vld [vmem:[%s4754_s16 + $0x48] sm:$0xff] }
 0x7f1   : > { %v1186_v14 = vmul.f32 %v4202_v7, %v1174_v63  ;;  %v4939_v15 = vmul.f32 %v4202_v7, %v1166_v60  ;;  %v1185_v17 = vmul.f32 %v4201_v13, %v1173_v3  ;;  %v4941_v18 = vmul.f32 %v4201_v13, %v1165_v61  ;;  %v355_v61 = vld [vmem:[%s4754_s16 + $0x40] sm:$0xff] }
 0x7f2   : > { %3894 = vmatprep.mubr.msk.f32.mxu0 %vm387_vm0, %v355_v61 }
 0x7f3   : > { %v4944_v19 = vadd.f32 %v1186_v14, %v4898_v11  ;;  %v4947_v20 = vadd.f32 %v1185_v17, %v4901_v12  ;;  %3895 = vmatmul.mubr.msk.f32.gmra.mxu0 %vm387_vm0, %v356_v62 }
 0x7f5   : > { %1195 = vrot.lane.b32.xlu1 %v4944_v19, %s4610_s11  ;;  %1193 = vrot.lane.b32.xlu0 %v4947_v20, %s4610_s11 }
 0x867   : > { %v1196_v21 = vpop.permute.xlu1 %1195  ;;  %v1194_v22 = vpop.permute.xlu0 %1193 }
 0x868   : > { %3971 = vmatprep.mubr.msk.f32.mxu1 %vm387_vm0, %v1194_v22 }
 0x869   : > { %3972 = vmatmul.mubr.msk.f32.vlgmr.msra.gmra.mxu1 %vm387_vm0, %v1196_v21 }
 0x86a   : > { %3975 = vmatpush3.msra.mxu1 %v4768_v2 }
 0x86b   : > { %3976 = vmatprep.subr.mxu1 %v4774_v4 }
 0x86c   : > { %3977 = vmatpush3.msra.mxu1 %v4774_v4 }
 0x86d   : > { %3978 = vmatprep.subr.mxu1 %v4780_v6 }
 0x86e   : > { %3979 = vmatpush3.msra.mxu1 %v4780_v6 }
 0x86f   : > { %3980 = vmatprep.subr.mxu1 %v4787_v8 }
 0x870   : > { %3981 = vmatpush3.msra.mxu1 %v4787_v8 }
 0x871   : > { %3985 = vmatprep.subr.mxu1 %v4768_v2 }
 0x929   : > { %v3973_v11 = vpop.f32.mrf.mxu1 }
 0x92a   : > { %v1273_v12 = vadd.f32 %v3973_v11, %v4819_v16 }
 0x92b   : > { %v1267_v24 = vpop.f32.mrf.mxu1 }
 0x92c   : > { %v1268_v25 = vadd.f32 %v1267_v24, %v4819_v16  ;;  %1294 = vrot.lane.b32.xlu1 %v1273_v12, %s4608_s28  ;;  %v1277_v30 = vadd.f32 %v1273_v12, %v586_v28 }
 0x92e   : > { %1292 = vrot.lane.b32.xlu0 %v1268_v25, %s4608_s28  ;;  %v1276_v31 = vadd.f32 %v1268_v25, %v581_v29  ;;  %v3654_v32 = vmul.f32 -1.442695, %v1277_v30 }
 0x930   : > { %v3653_v33 = vmul.f32 -1.442695, %v1276_v31  ;;  %4304 = vpow2.f32 %v3654_v32 }
 0x932   : > { %4306 = vpow2.f32 %v3653_v33  ;;  %v3896_v33 = vpop.f32.mrf.mxu0 }
 0x93d   : > { %v4305_v36 = vpop.eup %4304 }
 0x93e   : > { %v1285_v38 = vadd.f32 1.0, %v4305_v36  ;;  %v590_v36 = vpop.f32.mrf.mxu0 }
 0x93f   : > { %v4307_v37 = vpop.eup %4306 }
 0x940   : > { %v1284_v39 = vadd.f32 1.0, %v4307_v37  ;;  %4308 = vrcp.f32 %v1285_v38  ;;  %v596_v37 = vadd.f32 %v3896_v33, %v4825_v23  ;;  %v591_v38 = vadd.f32 %v590_v36, %v4825_v23 }
 0x942   : > { %4310 = vrcp.f32 %v1284_v39 }
 0x94d   : > { %v4309_v40 = vpop.eup %4308 }
 0x94e   : > { %v1313_v57 = vsub.f32 1.0, %v4309_v40  ;;  %v1325_v63 = vmul.f32 %v4309_v40, %v4944_v19 }
 0x94f   : > { %v4311_v43 = vpop.eup %4310 }
 0x950   : > { %v1312_v58 = vsub.f32 1.0, %v4311_v43  ;;  %v1324_v3 = vmul.f32 %v4311_v43, %v4947_v20 }
 0x99e   : > { %v1295_v41 = vpop.permute.xlu1 %1294 }
 0x99f   : > { %v1299_v42 = vmul.f32 %v4309_v40, %v1295_v41 }
 0x9a0   : > { %v1293_v44 = vpop.permute.xlu0 %1292 }
 0x9a1   : > { %v1298_v45 = vmul.f32 %v4311_v43, %v1293_v44  ;;  %1304 = vrot.lane.b32.xlu1 %v1299_v42, %s4608_s28 }
 0x9a3   : > { %1302 = vrot.lane.b32.xlu0 %v1298_v45, %s4608_s28 }
 0xa13   : > { %v1305_v46 = vpop.permute.xlu1 %1304 }
 0xa14   : > { %v1309_v47 = vadd.f32 %v1305_v46, %v586_v28 }
 0xa15   : > { %v1303_v48 = vpop.permute.xlu0 %1302 }
 0xa16   : > { %4312 = vtanh.f32 %v1309_v47  ;;  %v1308_v49 = vadd.f32 %v1303_v48, %v581_v29 }
 0xa18   : > { %4314 = vtanh.f32 %v1308_v49 }
 0xa23   : > { %v4313_v50 = vpop.eup %4312 }
 0xa24   : > { %1318 = vrot.lane.b32.xlu1 %v4313_v50, %s4610_s11 }
 0xa25   : > { %v4315_v53 = vpop.eup %4314 }
 0xa26   : > { %1316 = vrot.lane.b32.xlu0 %v4315_v53, %s4610_s11 }
 0xa2a   : > { %4204 = vperm.xlu0 %4186, %v4203_v54  }
 0xa96   : > { %v1319_v55 = vpop.permute.xlu1 %1318 }
 0xa97   : > { %v1323_v59 = vmul.f32 %v1319_v55, %v1313_v57 }
 0xa98   : > { %v1317_v56 = vpop.permute.xlu0 %1316 }
 0xa99   : > { %v1322_v60 = vmul.f32 %v1317_v56, %v1312_v58  ;;  %v1327_v7 = vadd.f32 %v1325_v63, %v1323_v59  ;;  %v3661_v58 = vsel %vm1489_vm9, 1.0, %v4607_v0  ;;  %v3662_v59 = vsel %vm1490_vm10, 1.0, %v4607_v0 }
 0xa9a   : > { %v4208_v61 = vpack.i.bf16 %v3662_v59, %v3661_v58 }
 0xa9b   : > { %v1326_v13 = vadd.f32 %v1324_v3, %v1322_v60  ;;  %v1335_v17 = vsub.f32 %v1327_v7, %v4944_v19 }
 0xa9d   : > { %v1334_v21 = vsub.f32 %v1326_v13, %v4947_v20 }
 0xaa5   : > { %v4205_v14 = vpop.permute.xlu0 %4204 }
 0xaa6   : > { %v4207_v22 = vunpack.i.h.bf16 %v4205_v14  ;;  %v4206_v11 = vunpack.i.l.bf16 %v4205_v14 }
 0xaa8   : > { %v1347_v12 = vmul.f32 %v4207_v22, %v1335_v17  ;;  %v4985_v24 = vmul.f32 %v4207_v22, %v1327_v7  ;;  %v1346_v25 = vmul.f32 %v4206_v11, %v1334_v21  ;;  %v4987_v26 = vmul.f32 %v4206_v11, %v1326_v13  ;;  %v357_v17 = vld [vmem:[%s4754_s16 + $0x50] sm:$0xff]  ;;  %v358_v21 = vld [vmem:[%s4754_s16 + $0x58] sm:$0xff] }
 0xaa9   : > { %3897 = vmatprep.mubr.msk.f32.mxu0 %vm387_vm0, %v357_v17 }
 0xaaa   : > { %v4990_v27 = vadd.f32 %v1347_v12, %v4944_v19  ;;  %v4993_v28 = vadd.f32 %v1346_v25, %v4947_v20  ;;  %3898 = vmatmul.mubr.msk.f32.gmra.mxu0 %vm387_vm0, %v358_v21 }
 0xaab   : > { %3900 = vmatprep.mubr.msk.f32.mxu0 %vm387_vm0, %v359_v35 }
 0xaac   : > { %1356 = vrot.lane.b32.xlu0 %v4990_v27, %s4610_s11  ;;  %1354 = vrot.lane.b32.xlu1 %v4993_v28, %s4610_s11 }
 0xb1e   : > { %v1357_v29 = vpop.permute.xlu0 %1356  ;;  %v1355_v30 = vpop.permute.xlu1 %1354 }
 0xb1f   : > { %3982 = vmatprep.mubr.msk.f32.mxu1 %vm387_vm0, %v1355_v30 }
 0xb20   : > { %3983 = vmatmul.mubr.msk.f32.vlgmr.msra.gmra.mxu1 %vm387_vm0, %v1357_v29 }
 0xb21   : > { %3986 = vmatpush3.msra.mxu1 %v4768_v2 }
 0xb22   : > { %3987 = vmatprep.subr.mxu1 %v4774_v4 }
 0xb23   : > { %3988 = vmatpush3.msra.mxu1 %v4774_v4 }
 0xb24   : > { %3989 = vmatprep.subr.mxu1 %v4780_v6 }
 0xb25   : > { %3990 = vmatpush3.msra.mxu1 %v4780_v6 }
 0xb26   : > { %3991 = vmatprep.subr.mxu1 %v4787_v8 }
 0xb27   : > { %3992 = vmatpush3.msra.mxu1 %v4787_v8 }
 0xb28   : > { %3996 = vmatprep.subr.mxu1 %v4768_v2 }
 0xbe0   : > { %v3984_v19 = vpop.f32.mrf.mxu1 }
 0xbe1   : > { %v1434_v20 = vadd.f32 %v3984_v19, %v4819_v16 }
 0xbe2   : > { %v1428_v31 = vpop.f32.mrf.mxu1 }
 0xbe3   : > { %v1429_v32 = vadd.f32 %v1428_v31, %v4819_v16  ;;  %1455 = vrot.lane.b32.xlu0 %v1434_v20, %s4608_s28  ;;  %v1438_v39 = vadd.f32 %v1434_v20, %v596_v37 }
 0xbe5   : > { %1453 = vrot.lane.b32.xlu1 %v1429_v32, %s4608_s28  ;;  %v1437_v40 = vadd.f32 %v1429_v32, %v591_v38  ;;  %v3660_v41 = vmul.f32 -1.442695, %v1438_v39 }
 0xbe7   : > { %v3659_v42 = vmul.f32 -1.442695, %v1437_v40  ;;  %4316 = vpow2.f32 %v3660_v41 }
 0xbe9   : > { %4318 = vpow2.f32 %v3659_v42 }
 0xbf4   : > { %v4317_v43 = vpop.eup %4316 }
 0xbf5   : > { %v1446_v45 = vadd.f32 1.0, %v4317_v43 }
 0xbf6   : > { %v4319_v44 = vpop.eup %4318 }
 0xbf7   : > { %v1445_v46 = vadd.f32 1.0, %v4319_v44  ;;  %4320 = vrcp.f32 %v1446_v45 }
 0xbf9   : > { %4322 = vrcp.f32 %v1445_v46 }
 0xc04   : > { %v4321_v47 = vpop.eup %4320 }
 0xc05   : > { %v1474_v3 = vsub.f32 1.0, %v4321_v47  ;;  %v1486_v22 = vmul.f32 %v4321_v47, %v4990_v27 }
 0xc06   : > { %v4323_v50 = vpop.eup %4322 }
 0xc07   : > { %v1473_v7 = vsub.f32 1.0, %v4323_v50  ;;  %v1485_v11 = vmul.f32 %v4323_v50, %v4993_v28 }
 0xc55   : > { %v1456_v48 = vpop.permute.xlu0 %1455 }
 0xc56   : > { %v1460_v49 = vmul.f32 %v4321_v47, %v1456_v48 }
 0xc57   : > { %v1454_v51 = vpop.permute.xlu1 %1453 }
 0xc58   : > { %v1459_v52 = vmul.f32 %v4323_v50, %v1454_v51  ;;  %1465 = vrot.lane.b32.xlu0 %v1460_v49, %s4608_s28 }
 0xc5a   : > { %1463 = vrot.lane.b32.xlu1 %v1459_v52, %s4608_s28 }
 0xcca   : > { %v1466_v53 = vpop.permute.xlu0 %1465 }
 0xccb   : > { %v1470_v54 = vadd.f32 %v1466_v53, %v596_v37 }
 0xccc   : > { %v1464_v55 = vpop.permute.xlu1 %1463 }
 0xccd   : > { %4324 = vtanh.f32 %v1470_v54  ;;  %v1469_v56 = vadd.f32 %v1464_v55, %v591_v38 }
 0xccf   : > { %4326 = vtanh.f32 %v1469_v56 }
 0xcda   : > { %v4325_v57 = vpop.eup %4324 }
 0xcdb   : > { %1479 = vrot.lane.b32.xlu0 %v4325_v57, %s4610_s11 }
 0xcdc   : > { %v4327_v60 = vpop.eup %4326 }
 0xcdd   : > { %1477 = vrot.lane.b32.xlu1 %v4327_v60, %s4610_s11 }
 0xce1   : > { %4209 = vperm.xlu1 %4197, %v4208_v61  }
 0xd4d   : > { %v1480_v62 = vpop.permute.xlu0 %1479 }
 0xd4e   : > { %v1484_v13 = vmul.f32 %v1480_v62, %v1474_v3  ;;  %v3668_v3 = vsel %vm1651_vm12, 1.0, %v4607_v0 }
 0xd4f   : > { %v1478_v63 = vpop.permute.xlu1 %1477 }
 0xd50   : > { %v1483_v14 = vmul.f32 %v1478_v63, %v1473_v7  ;;  %v1488_v12 = vadd.f32 %v1486_v22, %v1484_v13  ;;  %v3667_v63 = vsel %vm1650_vm11, 1.0, %v4607_v0 }
 0xd51   : > { %v4213_v13 = vpack.i.bf16 %v3668_v3, %v3667_v63 }
 0xd52   : > { %v1487_v25 = vadd.f32 %v1485_v11, %v1483_v14  ;;  %v1496_v30 = vsub.f32 %v1488_v12, %v4990_v27 }
 0xd54   : > { %v1495_v19 = vsub.f32 %v1487_v25, %v4993_v28 }
 0xd5c   : > { %v4210_v29 = vpop.permute.xlu1 %4209 }
 0xd5d   : > { %v4212_v20 = vunpack.i.h.bf16 %v4210_v29  ;;  %v4211_v31 = vunpack.i.l.bf16 %v4210_v29 }
 0xd5f   : > { %v1508_v32 = vmul.f32 %v4212_v20, %v1496_v30  ;;  %v5031_v33 = vmul.f32 %v4212_v20, %v1488_v12  ;;  %v1507_v36 = vmul.f32 %v4211_v31, %v1495_v19  ;;  %v5033_v37 = vmul.f32 %v4211_v31, %v1487_v25  ;;  %v360_v12 = vld [vmem:[%s4754_s16 + $0x68] sm:$0xff] }
 0xd60   : > { %3901 = vmatmul.mubr.msk.f32.gmra.mxu0 %vm387_vm0, %v360_v12 }
 0xd61   : > { %v5036_v38 = vadd.f32 %v1508_v32, %v4990_v27  ;;  %v5039_v39 = vadd.f32 %v1507_v36, %v4993_v28 }
 0xd63   : > { %1517 = vrot.lane.b32.xlu1 %v5036_v38, %s4610_s11  ;;  %1515 = vrot.lane.b32.xlu0 %v5039_v39, %s4610_s11 }
 0xdd5   : > { %v1518_v40 = vpop.permute.xlu1 %1517  ;;  %v1516_v41 = vpop.permute.xlu0 %1515 }
 0xdd6   : > { %3993 = vmatprep.mubr.msk.f32.mxu1 %vm387_vm0, %v1516_v41 }
 0xdd7   : > { %3994 = vmatmul.mubr.msk.f32.vlgmr.msra.gmra.mxu1 %vm387_vm0, %v1518_v40 }
 0xdd8   : > { %3997 = vmatpush3.msra.mxu1 %v4768_v2 }
 0xdd9   : > { %3998 = vmatprep.subr.mxu1 %v4774_v4 }
 0xdda   : > { %3999 = vmatpush3.msra.mxu1 %v4774_v4  ;;  %v3899_v4 = vpop.f32.mrf.mxu0 }
 0xddb   : > { %4000 = vmatprep.subr.mxu1 %v4780_v6 }
 0xddc   : > { %4001 = vmatpush3.msra.mxu1 %v4780_v6  ;;  %v600_v44 = vpop.f32.mrf.mxu0  ;;  %v606_v6 = vadd.f32 %v3899_v4, %v4825_v23 }
 0xddd   : > { %4002 = vmatprep.subr.mxu1 %v4787_v8  ;;  %v601_v45 = vadd.f32 %v600_v44, %v4825_v23 }
 0xdde   : > { %4003 = vmatpush3.msra.mxu1 %v4787_v8 }
 0xddf   : > { %4007 = vmatprep.subr.mxu1 %v4768_v2 }
 0xe97   : > { %v3995_v27 = vpop.f32.mrf.mxu1 }
 0xe98   : > { %v1595_v28 = vadd.f32 %v3995_v27, %v4819_v16 }
 0xe99   : > { %v1589_v42 = vpop.f32.mrf.mxu1 }
 0xe9a   : > { %v1590_v43 = vadd.f32 %v1589_v42, %v4819_v16  ;;  %1616 = vrot.lane.b32.xlu1 %v1595_v28, %s4608_s28  ;;  %v1599_v46 = vadd.f32 %v1595_v28, %v606_v6 }
 0xe9c   : > { %1614 = vrot.lane.b32.xlu0 %v1590_v43, %s4608_s28  ;;  %v1598_v8 = vadd.f32 %v1590_v43, %v601_v45  ;;  %v3666_v47 = vmul.f32 -1.442695, %v1599_v46  ;;  %v5104_v46 = vld [vmem:[#allocation5] sm:$0xff] }
 0xe9e   : > { %v3665_v2 = vmul.f32 -1.442695, %v1598_v8  ;;  %4328 = vpow2.f32 %v3666_v47 }
 0xea0   : > { %4330 = vpow2.f32 %v3665_v2 }
 0xeab   : > { %v4329_v48 = vpop.eup %4328 }
 0xeac   : > { %v1607_v50 = vadd.f32 1.0, %v4329_v48 }
 0xead   : > { %v4331_v49 = vpop.eup %4330 }
 0xeae   : > { %v1606_v51 = vadd.f32 1.0, %v4331_v49  ;;  %4332 = vrcp.f32 %v1607_v50  ;;  %v3902_v49 = vpop.f32.mrf.mxu0 }
 0xeb0   : > { %4334 = vrcp.f32 %v1606_v51  ;;  %v610_v50 = vpop.f32.mrf.mxu0  ;;  %v616_v51 = vadd.f32 %v3902_v49, %v4825_v23 }
 0xebb   : > { %v4333_v52 = vpop.eup %4332 }
 0xebc   : > { %v1635_v21 = vsub.f32 1.0, %v4333_v52  ;;  %v1647_v25 = vmul.f32 %v4333_v52, %v5036_v38 }
 0xebd   : > { %v4335_v55 = vpop.eup %4334 }
 0xebe   : > { %v1634_v34 = vsub.f32 1.0, %v4335_v55  ;;  %v1646_v29 = vmul.f32 %v4335_v55, %v5039_v39 }
 0xf0c   : > { %v1617_v53 = vpop.permute.xlu1 %1616 }
 0xf0d   : > { %v1621_v54 = vmul.f32 %v4333_v52, %v1617_v53  ;;  %v611_v52 = vadd.f32 %v610_v50, %v4825_v23 }
 0xf0e   : > { %v1615_v56 = vpop.permute.xlu0 %1614 }
 0xf0f   : > { %v1620_v57 = vmul.f32 %v4335_v55, %v1615_v56  ;;  %1626 = vrot.lane.b32.xlu1 %v1621_v54, %s4608_s28 }
 0xf11   : > { %1624 = vrot.lane.b32.xlu0 %v1620_v57, %s4608_s28 }
 0xf81   : > { %v1627_v58 = vpop.permute.xlu1 %1626 }
 0xf82   : > { %v1631_v59 = vadd.f32 %v1627_v58, %v606_v6 }
 0xf83   : > { %v1625_v60 = vpop.permute.xlu0 %1624 }
 0xf84   : > { %4336 = vtanh.f32 %v1631_v59  ;;  %v1630_v61 = vadd.f32 %v1625_v60, %v601_v45  ;;  %v5093_v45 = vld [vmem:[#allocation5 + $0x18] sm:$0xff] }
 0xf86   : > { %4338 = vtanh.f32 %v1630_v61 }
 0xf91   : > { %v4337_v62 = vpop.eup %4336 }
 0xf92   : > { %1640 = vrot.lane.b32.xlu1 %v4337_v62, %s4610_s11 }
 0xf93   : > { %v4339_v7 = vpop.eup %4338 }
 0xf94   : > { %1638 = vrot.lane.b32.xlu0 %v4339_v7, %s4610_s11 }
 0xf98   : > { %4214 = vperm.xlu0 %4186, %v4213_v13  }
0x1004   : > { %v1641_v14 = vpop.permute.xlu1 %1640 }
0x1005   : > { %v1645_v22 = vmul.f32 %v1641_v14, %v1635_v21 }
0x1006   : > { %v1639_v17 = vpop.permute.xlu0 %1638 }
0x1007   : > { %v1644_v11 = vmul.f32 %v1639_v17, %v1634_v34  ;;  %v1649_v30 = vadd.f32 %v1647_v25, %v1645_v22  ;;  %v5118_v22 = vld [vmem:[%s4833_s7] sm:$0xff] }
0x1008   : > { %vm1811_vm13 = vcmp.gt.s32.totalorder %v5118_v22, 6  ;;  %vm1972_vm15 = vcmp.gt.s32.totalorder %v5118_v22, 7  ;;  %vm2133_vm2 = vcmp.gt.s32.totalorder %v5118_v22, 8  ;;  %vm2294_vm4 = vcmp.gt.s32.totalorder %v5118_v22, 9 }
0x1009   : > { %v1648_v19 = vadd.f32 %v1646_v29, %v1644_v11  ;;  %v1657_v31 = vsub.f32 %v1649_v30, %v5036_v38  ;;  %v5122_v11 = vld [vmem:[%s4833_s7 + $0x8] sm:$0xff]  ;;  %v3673_v12 = vsel %vm1811_vm13, 1.0, %v4607_v0  ;;  %vm2455_vm6 = vcmp.gt.s32.totalorder %v5118_v22, 10 }
0x100a   : > { %vm1812_vm14 = vcmp.gt.s32.totalorder %v5122_v11, 6  ;;  %vm1973_vm1 = vcmp.gt.s32.totalorder %v5122_v11, 7  ;;  %vm2134_vm3 = vcmp.gt.s32.totalorder %v5122_v11, 8  ;;  %vm2295_vm5 = vcmp.gt.s32.totalorder %v5122_v11, 9 }
0x100b   : > { %v1656_v32 = vsub.f32 %v1648_v19, %v5039_v39  ;;  %v3674_v25 = vsel %vm1812_vm14, 1.0, %v4607_v0  ;;  %vm2456_vm7 = vcmp.gt.s32.totalorder %v5122_v11, 10  ;;  %vm2616_vm8 = vcmp.gt.s32.totalorder %v5118_v22, 11 }
0x100c   : > { %vm2617_vm9 = vcmp.gt.s32.totalorder %v5122_v11, 11 }
0x1013   : > { %v4215_v20 = vpop.permute.xlu0 %4214 }
0x1014   : > { %v4217_v36 = vunpack.i.h.bf16 %v4215_v20  ;;  %v4216_v40 = vunpack.i.l.bf16 %v4215_v20 }
0x1016   : > { %v1669_v41 = vmul.f32 %v4217_v36, %v1657_v31  ;;  %v5077_v27 = vmul.f32 %v4217_v36, %v1649_v30  ;;  %v1668_v28 = vmul.f32 %v4216_v40, %v1656_v32  ;;  %v5079_v42 = vmul.f32 %v4216_v40, %v1648_v19 }
0x1017   : > { %v4218_v30 = vpack.i.bf16 %v3674_v25, %v3673_v12 }
0x1018   : > { %v5082_v43 = vadd.f32 %v1669_v41, %v5036_v38  ;;  %v5085_v4 = vadd.f32 %v1668_v28, %v5039_v39  ;;  %v5096_v38 = vld [vmem:[#allocation5 + $0x10] sm:$0xff]  ;;  %v5100_v39 = vld [vmem:[#allocation5 + $0x8] sm:$0xff]  ;;  %v362_v28 = vld [vmem:[%s4754_s16 + $0x78] sm:$0xff] }
0x1019   : > { %v361_v41 = vld [vmem:[%s4754_s16 + $0x70] sm:$0xff] }
0x101a   : > { %1678 = vrot.lane.b32.xlu0 %v5082_v43, %s4610_s11  ;;  %1676 = vrot.lane.b32.xlu1 %v5085_v4, %s4610_s11 }
0x101b   : > { %3903 = vmatprep.mubr.msk.f32.mxu0 %vm387_vm0, %v361_v41 }
0x101c   : > { %3904 = vmatmul.mubr.msk.f32.gmra.mxu0 %vm387_vm0, %v362_v28 }
0x108c   : > { %v1679_v44 = vpop.permute.xlu0 %1678  ;;  %v1677_v6 = vpop.permute.xlu1 %1676 }
0x108d   : > { %4004 = vmatprep.mubr.msk.f32.mxu1 %vm387_vm0, %v1677_v6 }
0x108e   : > { %4005 = vmatmul.mubr.msk.f32.vlgmr.msra.gmra.mxu1 %vm387_vm0, %v1679_v44 }
0x108f   : > { %4008 = vmatpush3.msra.mxu1 %v5093_v45 }
0x1090   : > { %4009 = vmatprep.subr.mxu1 %v5096_v38 }
0x1091   : > { %4010 = vmatpush3.msra.mxu1 %v5096_v38 }
0x1092   : > { %4011 = vmatprep.subr.mxu1 %v5100_v39 }
0x1093   : > { %4012 = vmatpush3.msra.mxu1 %v5100_v39 }
0x1094   : > { %4013 = vmatprep.subr.mxu1 %v5104_v46 }
0x1095   : > { %4014 = vmatpush3.msra.mxu1 %v5104_v46 }
0x1096   : > { %4029 = vmatprep.subr.mxu1 %v5093_v45 }
0x114e   : > { %v4006_v8 = vpop.f32.mrf.mxu1 }
0x114f   : > { %v1756_v47 = vadd.f32 %v4006_v8, %v4819_v16 }
0x1150   : > { %v1750_v2 = vpop.f32.mrf.mxu1 }
0x1151   : > { %v1751_v48 = vadd.f32 %v1750_v2, %v4819_v16  ;;  %1777 = vrot.lane.b32.xlu0 %v1756_v47, %s4608_s28  ;;  %v1760_v53 = vadd.f32 %v1756_v47, %v616_v51 }
0x1153   : > { %1775 = vrot.lane.b32.xlu1 %v1751_v48, %s4608_s28  ;;  %v1759_v54 = vadd.f32 %v1751_v48, %v611_v52  ;;  %v3672_v55 = vmul.f32 -1.442695, %v1760_v53 }
0x1155   : > { %v3671_v56 = vmul.f32 -1.442695, %v1759_v54  ;;  %4340 = vpow2.f32 %v3672_v55 }
0x1157   : > { %4342 = vpow2.f32 %v3671_v56 }
0x1162   : > { %v4341_v57 = vpop.eup %4340 }
0x1163   : > { %v1768_v59 = vadd.f32 1.0, %v4341_v57 }
0x1164   : > { %v4343_v58 = vpop.eup %4342 }
0x1165   : > { %v1767_v60 = vadd.f32 1.0, %v4343_v58  ;;  %4344 = vrcp.f32 %v1768_v59 }
0x1167   : > { %4346 = vrcp.f32 %v1767_v60 }
0x1172   : > { %v4345_v61 = vpop.eup %4344 }
0x1173   : > { %v1796_v31 = vsub.f32 1.0, %v4345_v61  ;;  %v1808_v44 = vmul.f32 %v4345_v61, %v5082_v43 }
0x1174   : > { %v4347_v3 = vpop.eup %4346 }
0x1175   : > { %v1795_v32 = vsub.f32 1.0, %v4347_v3  ;;  %v1807_v6 = vmul.f32 %v4347_v3, %v5085_v4 }
0x11c3   : > { %v1778_v62 = vpop.permute.xlu0 %1777 }
0x11c4   : > { %v1782_v63 = vmul.f32 %v4345_v61, %v1778_v62  ;;  %v3905_v62 = vpop.f32.mrf.mxu0 }
0x11c5   : > { %v1776_v7 = vpop.permute.xlu1 %1775 }
0x11c6   : > { %v1781_v13 = vmul.f32 %v4347_v3, %v1776_v7  ;;  %1787 = vrot.lane.b32.xlu0 %v1782_v63, %s4608_s28  ;;  %v620_v63 = vpop.f32.mrf.mxu0  ;;  %v626_v3 = vadd.f32 %v3905_v62, %v4825_v23  ;;  %v375_v62 = vld [vmem:[%s4754_s16 + $0xe0] sm:$0xff] }
0x11c7   : > { %v621_v7 = vadd.f32 %v620_v63, %v4825_v23  ;;  %v376_v63 = vld [vmem:[%s4754_s16 + $0xe8] sm:$0xff] }
0x11c8   : > { %1785 = vrot.lane.b32.xlu1 %v1781_v13, %s4608_s28 }
0x1238   : > { %v1788_v14 = vpop.permute.xlu0 %1787 }
0x1239   : > { %v1792_v17 = vadd.f32 %v1788_v14, %v616_v51 }
0x123a   : > { %v1786_v21 = vpop.permute.xlu1 %1785 }
0x123b   : > { %4348 = vtanh.f32 %v1792_v17  ;;  %v1791_v34 = vadd.f32 %v1786_v21, %v611_v52 }
0x123d   : > { %4350 = vtanh.f32 %v1791_v34 }
0x1248   : > { %v4349_v35 = vpop.eup %4348 }
0x1249   : > { %1801 = vrot.lane.b32.xlu0 %v4349_v35, %s4610_s11 }
0x124a   : > { %v4351_v29 = vpop.eup %4350 }
0x124b   : > { %1799 = vrot.lane.b32.xlu1 %v4351_v29, %s4610_s11 }
0x124f   : > { %4219 = vperm.xlu1 %4197, %v4218_v30  }
0x12bb   : > { %v1802_v19 = vpop.permute.xlu0 %1801 }
0x12bc   : > { %v1806_v36 = vmul.f32 %v1802_v19, %v1796_v31 }
0x12bd   : > { %v1800_v20 = vpop.permute.xlu1 %1799 }
0x12be   : > { %v1805_v40 = vmul.f32 %v1800_v20, %v1795_v32  ;;  %v1810_v8 = vadd.f32 %v1808_v44, %v1806_v36 }
0x12c0   : > { %v1809_v47 = vadd.f32 %v1807_v6, %v1805_v40  ;;  %v1818_v48 = vsub.f32 %v1810_v8, %v5082_v43  ;;  %v3679_v6 = vsel %vm1972_vm15, 1.0, %v4607_v0 }
0x12c2   : > { %v1817_v49 = vsub.f32 %v1809_v47, %v5085_v4 }
0x12ca   : > { %v4220_v2 = vpop.permute.xlu1 %4219 }
0x12cb   : > { %v4222_v50 = vunpack.i.h.bf16 %v4220_v2  ;;  %v4221_v51 = vunpack.i.l.bf16 %v4220_v2 }
0x12cd   : > { %v1830_v52 = vmul.f32 %v4222_v50, %v1818_v48  ;;  %v5137_v53 = vmul.f32 %v4222_v50, %v1810_v8  ;;  %v1829_v54 = vmul.f32 %v4221_v51, %v1817_v49  ;;  %v5139_v55 = vmul.f32 %v4221_v51, %v1809_v47  ;;  %v363_v48 = vld [vmem:[%s4754_s16 + $0x80] sm:$0xff]  ;;  %v364_v49 = vld [vmem:[%s4754_s16 + $0x88] sm:$0xff]  ;;  %v365_v50 = vld [vmem:[%s4754_s16 + $0x90] sm:$0xff] }
0x12ce   : > { %v3680_v8 = vsel %vm1973_vm1, 1.0, %v4607_v0  ;;  %3906 = vmatprep.mubr.msk.f32.mxu0 %vm387_vm0, %v363_v48  ;;  %v366_v51 = vld [vmem:[%s4754_s16 + $0x98] sm:$0xff] }
0x12cf   : > { %v5142_v56 = vadd.f32 %v1830_v52, %v5082_v43  ;;  %v5145_v57 = vadd.f32 %v1829_v54, %v5085_v4  ;;  %v4223_v2 = vpack.i.bf16 %v3680_v8, %v3679_v6  ;;  %3907 = vmatmul.mubr.msk.f32.gmra.mxu0 %vm387_vm0, %v364_v49  ;;  %v367_v52 = vld [vmem:[%s4754_s16 + $0xa0] sm:$0xff]  ;;  %v368_v54 = vld [vmem:[%s4754_s16 + $0xa8] sm:$0xff] }
0x12d0   : > { %3909 = vmatprep.mubr.msk.f32.mxu0 %vm387_vm0, %v365_v50 }
0x12d1   : > { %1839 = vrot.lane.b32.xlu1 %v5142_v56, %s4610_s11  ;;  %1837 = vrot.lane.b32.xlu0 %v5145_v57, %s4610_s11 }
0x12d3   : > { %3910 = vmatmul.mubr.msk.f32.gmra.mxu0 %vm387_vm0, %v366_v51 }
0x12d4   : > { %3912 = vmatprep.mubr.msk.f32.mxu0 %vm387_vm0, %v367_v52 }
0x12d7   : > { %3913 = vmatmul.mubr.msk.f32.gmra.mxu0 %vm387_vm0, %v368_v54 }
0x1343   : > { %v1840_v58 = vpop.permute.xlu1 %1839  ;;  %v1838_v59 = vpop.permute.xlu0 %1837 }
0x1344   : > { %4015 = vmatprep.mubr.msk.f32.mxu1 %vm387_vm0, %v1838_v59  ;;  %v370_v59 = vld [vmem:[%s4754_s16 + $0xb8] sm:$0xff] }
0x1345   : > { %4016 = vmatmul.mubr.msk.f32.vlgmr.msra.gmra.mxu1 %vm387_vm0, %v1840_v58  ;;  %v369_v58 = vld [vmem:[%s4754_s16 + $0xb0] sm:$0xff] }
0x1346   : > { %4030 = vmatpush3.msra.mxu1 %v5093_v45  ;;  %3915 = vmatprep.mubr.msk.f32.mxu0 %vm387_vm0, %v369_v58 }
0x1347   : > { %4031 = vmatprep.subr.mxu1 %v5096_v38  ;;  %3916 = vmatmul.mubr.msk.f32.gmra.mxu0 %vm387_vm0, %v370_v59 }
0x1348   : > { %4032 = vmatpush3.msra.mxu1 %v5096_v38 }
0x1349   : > { %4033 = vmatprep.subr.mxu1 %v5100_v39 }
0x134a   : > { %4034 = vmatpush3.msra.mxu1 %v5100_v39 }
0x134b   : > { %4035 = vmatprep.subr.mxu1 %v5104_v46 }
0x134c   : > { %4036 = vmatpush3.msra.mxu1 %v5104_v46 }
0x134d   : > { %4051 = vmatprep.subr.mxu1 %v5093_v45 }
0x1405   : > { %v4017_v43 = vpop.f32.mrf.mxu1 }
0x1406   : > { %v1917_v4 = vadd.f32 %v4017_v43, %v4819_v16  ;;  %v371_v43 = vld [vmem:[%s4754_s16 + $0xc0] sm:$0xff] }
0x1407   : > { %v1911_v60 = vpop.f32.mrf.mxu1  ;;  %3918 = vmatprep.mubr.msk.f32.mxu0 %vm387_vm0, %v371_v43 }
0x1408   : > { %v1912_v61 = vadd.f32 %v1911_v60, %v4819_v16  ;;  %1938 = vrot.lane.b32.xlu1 %v1917_v4, %s4608_s28  ;;  %v1921_v13 = vadd.f32 %v1917_v4, %v626_v3  ;;  %v372_v4 = vld [vmem:[%s4754_s16 + $0xc8] sm:$0xff]  ;;  %v373_v60 = vld [vmem:[%s4754_s16 + $0xd0] sm:$0xff] }
0x1409   : > { %3919 = vmatmul.mubr.msk.f32.gmra.mxu0 %vm387_vm0, %v372_v4 }
0x140a   : > { %1936 = vrot.lane.b32.xlu0 %v1912_v61, %s4608_s28  ;;  %v1920_v14 = vadd.f32 %v1912_v61, %v621_v7  ;;  %v3678_v17 = vmul.f32 -1.442695, %v1921_v13  ;;  %3921 = vmatprep.mubr.msk.f32.mxu0 %vm387_vm0, %v373_v60  ;;  %v374_v61 = vld [vmem:[%s4754_s16 + $0xd8] sm:$0xff] }
0x140c   : > { %v3677_v21 = vmul.f32 -1.442695, %v1920_v14  ;;  %4352 = vpow2.f32 %v3678_v17 }
0x140d   : > { %3922 = vmatmul.mubr.msk.f32.gmra.mxu0 %vm387_vm0, %v374_v61 }
0x140e   : > { %4354 = vpow2.f32 %v3677_v21  ;;  %3924 = vmatprep.mubr.msk.f32.mxu0 %vm387_vm0, %v375_v62 }
0x1411   : > { %3925 = vmatmul.mubr.msk.f32.gmra.mxu0 %vm387_vm0, %v376_v63 }
0x1419   : > { %v4353_v34 = vpop.eup %4352 }
0x141a   : > { %v1929_v12 = vadd.f32 1.0, %v4353_v34 }
0x141b   : > { %v4355_v35 = vpop.eup %4354 }
0x141c   : > { %v1928_v25 = vadd.f32 1.0, %v4355_v35  ;;  %4356 = vrcp.f32 %v1929_v12 }
0x141e   : > { %4358 = vrcp.f32 %v1928_v25 }
0x1429   : > { %v4357_v29 = vpop.eup %4356 }
0x142a   : > { %v1957_v17 = vsub.f32 1.0, %v4357_v29  ;;  %v1969_v12 = vmul.f32 %v4357_v29, %v5142_v56 }
0x142b   : > { %v4359_v20 = vpop.eup %4358 }
0x142c   : > { %v1956_v21 = vsub.f32 1.0, %v4359_v20  ;;  %v1968_v25 = vmul.f32 %v4359_v20, %v5145_v57 }
0x147a   : > { %v1939_v30 = vpop.permute.xlu1 %1938 }
0x147b   : > { %v1943_v19 = vmul.f32 %v4357_v29, %v1939_v30 }
0x147c   : > { %v1937_v31 = vpop.permute.xlu0 %1936 }
0x147d   : > { %v1942_v32 = vmul.f32 %v4359_v20, %v1937_v31  ;;  %1948 = vrot.lane.b32.xlu1 %v1943_v19, %s4608_s28 }
0x147f   : > { %1946 = vrot.lane.b32.xlu0 %v1942_v32, %s4608_s28 }
0x14ef   : > { %v1949_v36 = vpop.permute.xlu1 %1948 }
0x14f0   : > { %v1953_v40 = vadd.f32 %v1949_v36, %v626_v3  ;;  %v377_v3 = vld [vmem:[%s4754_s16 + $0xf0] sm:$0xff] }
0x14f1   : > { %v1947_v41 = vpop.permute.xlu0 %1946  ;;  %3927 = vmatprep.mubr.msk.f32.mxu0 %vm387_vm0, %v377_v3 }
0x14f2   : > { %4360 = vtanh.f32 %v1953_v40  ;;  %v1952_v28 = vadd.f32 %v1947_v41, %v621_v7  ;;  %v378_v7 = vld [vmem:[%s4754_s16 + $0xf8] sm:$0xff]  ;;  %s4611_s16 = smov 32  }
0x14f3   : > { %3928 = vmatmul.mubr.msk.f32.gmra.mxu0 %vm387_vm0, %v378_v7 }
0x14f4   : > { %4362 = vtanh.f32 %v1952_v28 }
0x14ff   : > { %v4361_v44 = vpop.eup %4360 }
0x1500   : > { %1962 = vrot.lane.b32.xlu1 %v4361_v44, %s4610_s11 }
0x1501   : > { %v4363_v47 = vpop.eup %4362 }
0x1502   : > { %1960 = vrot.lane.b32.xlu0 %v4363_v47, %s4610_s11 }
0x1506   : > { %4224 = vperm.xlu0 %4186, %v4223_v2  }
0x1572   : > { %v1963_v13 = vpop.permute.xlu1 %1962 }
0x1573   : > { %v1967_v34 = vmul.f32 %v1963_v13, %v1957_v17 }
0x1574   : > { %v1961_v14 = vpop.permute.xlu0 %1960 }
0x1575   : > { %v1966_v35 = vmul.f32 %v1961_v14, %v1956_v21  ;;  %v1971_v30 = vadd.f32 %v1969_v12, %v1967_v34 }
0x1577   : > { %v1970_v19 = vadd.f32 %v1968_v25, %v1966_v35  ;;  %v1979_v32 = vsub.f32 %v1971_v30, %v5142_v56 }
0x1579   : > { %v1978_v36 = vsub.f32 %v1970_v19, %v5145_v57 }
0x1581   : > { %v4225_v31 = vpop.permute.xlu0 %4224 }
0x1582   : > { %v4227_v40 = vunpack.i.h.bf16 %v4225_v31  ;;  %v4226_v41 = vunpack.i.l.bf16 %v4225_v31 }
0x1584   : > { %v1991_v28 = vmul.f32 %v4227_v40, %v1979_v32  ;;  %v5211_v44 = vmul.f32 %v4227_v40, %v1971_v30  ;;  %v1990_v6 = vmul.f32 %v4226_v41, %v1978_v36  ;;  %v5213_v8 = vmul.f32 %v4226_v41, %v1970_v19 }
0x1586   : > { %v5216_v47 = vadd.f32 %v1991_v28, %v5142_v56  ;;  %v5219_v29 = vadd.f32 %v1990_v6, %v5145_v57  ;;  %v3908_v56 = vpop.f32.mrf.mxu0 }
0x1587   : > { %v636_v17 = vadd.f32 %v3908_v56, %v4825_v23 }
0x1588   : > { %2000 = vrot.lane.b32.xlu0 %v5216_v47, %s4610_s11  ;;  %1998 = vrot.lane.b32.xlu1 %v5219_v29, %s4610_s11  ;;  %v630_v57 = vpop.f32.mrf.mxu0 }
0x1589   : > { %v631_v21 = vadd.f32 %v630_v57, %v4825_v23 }
0x158a   : > { %v5235_v48 = vpop.f32.mrf.mxu0 }
0x158c   : > { %v5237_v49 = vpop.f32.mrf.mxu0 }
0x158e   : > { %v5239_v50 = vpop.f32.mrf.mxu0 }
0x1590   : > { %v5241_v51 = vpop.f32.mrf.mxu0 }
0x1592   : > { %v5243_v52 = vpop.f32.mrf.mxu0 }
0x1594   : > { %v5245_v54 = vpop.f32.mrf.mxu0 }
0x1596   : > { %v5247_v58 = vpop.f32.mrf.mxu0 }
0x1598   : > { %v5249_v59 = vpop.f32.mrf.mxu0 }
0x159a   : > { %v5251_v43 = vpop.f32.mrf.mxu0 }
0x159c   : > { %v5253_v4 = vpop.f32.mrf.mxu0 }
0x159e   : > { %v5255_v60 = vpop.f32.mrf.mxu0 }
0x15a0   : > { %v5257_v61 = vpop.f32.mrf.mxu0 }
0x15b3   : > { %v5259_v62 = vpop.f32.mrf.mxu0 }
0x15b5   : > { %v5261_v63 = vpop.f32.mrf.mxu0 }
0x15fa   : > { %v2001_v20 = vpop.permute.xlu0 %2000  ;;  %v1999_v2 = vpop.permute.xlu1 %1998 }
0x15fb   : > { %4026 = vmatprep.mubr.msk.f32.mxu0 %vm387_vm0, %v1999_v2 }
0x15fc   : > { %4027 = vmatmul.mubr.msk.f32.vlgmr.msra.gmra.mxu0 %vm387_vm0, %v2001_v20 }
0x15fd   : > { %4041 = vmatpush3.msra.mxu0 %v5093_v45 }
0x15fe   : > { %4042 = vmatprep.subr.mxu0 %v5096_v38 }
0x15ff   : > { %4043 = vmatpush3.msra.mxu0 %v5096_v38 }
0x1600   : > { %4044 = vmatprep.subr.mxu0 %v5100_v39 }
0x1601   : > { %4045 = vmatpush3.msra.mxu0 %v5100_v39 }
0x1602   : > { %4046 = vmatprep.subr.mxu0 %v5104_v46 }
0x1603   : > { %4047 = vmatpush3.msra.mxu0 %v5104_v46 }
0x1604   : > { %4062 = vmatprep.subr.mxu0 %v5093_v45 }
0x16bc   : > { %v4028_v3 = vpop.f32.mrf.mxu0 }
0x16bd   : > { %v2078_v7 = vadd.f32 %v4028_v3, %v4819_v16 }
0x16be   : > { %v2072_v13 = vpop.f32.mrf.mxu0 }
0x16bf   : > { %v2073_v14 = vadd.f32 %v2072_v13, %v4819_v16  ;;  %2099 = vrot.lane.b32.xlu0 %v2078_v7, %s4608_s28  ;;  %v2082_v34 = vadd.f32 %v2078_v7, %v636_v17  ;;  %v3685_v13 = vsel %vm2133_vm2, 1.0, %v4607_v0 }
0x16c1   : > { %2097 = vrot.lane.b32.xlu1 %v2073_v14, %s4608_s28  ;;  %v2081_v35 = vadd.f32 %v2073_v14, %v631_v21  ;;  %v3684_v12 = vmul.f32 -1.442695, %v2082_v34  ;;  %v3686_v14 = vsel %vm2134_vm3, 1.0, %v4607_v0  ;;  %vm3392_vm3 = vcmask 523264  }
0x16c3   : > { %v3683_v25 = vmul.f32 -1.442695, %v2081_v35  ;;  %4364 = vpow2.f32 %v3684_v12  ;;  %v4228_v35 = vpack.i.bf16 %v3686_v14, %v3685_v13 }
0x16c5   : > { %4366 = vpow2.f32 %v3683_v25 }
0x16d0   : > { %v4365_v30 = vpop.eup %4364 }
0x16d1   : > { %v2090_v31 = vadd.f32 1.0, %v4365_v30 }
0x16d2   : > { %v4367_v19 = vpop.eup %4366 }
0x16d3   : > { %v2089_v32 = vadd.f32 1.0, %v4367_v19  ;;  %4368 = vrcp.f32 %v2090_v31 }
0x16d5   : > { %4370 = vrcp.f32 %v2089_v32 }
0x16e0   : > { %v4369_v36 = vpop.eup %4368 }
0x16e1   : > { %v2130_v31 = vmul.f32 %v4369_v36, %v5216_v47 }
0x16e2   : > { %v4371_v28 = vpop.eup %4370 }
0x16e3   : > { %v2117_v25 = vsub.f32 1.0, %v4371_v28  ;;  %v2129_v32 = vmul.f32 %v4371_v28, %v5219_v29 }
0x1731   : > { %v2100_v40 = vpop.permute.xlu0 %2099 }
0x1732   : > { %v2104_v41 = vmul.f32 %v4369_v36, %v2100_v40 }
0x1733   : > { %v2098_v6 = vpop.permute.xlu1 %2097 }
0x1734   : > { %v2103_v20 = vmul.f32 %v4371_v28, %v2098_v6  ;;  %2109 = vrot.lane.b32.xlu0 %v2104_v41, %s4608_s28 }
0x1736   : > { %2107 = vrot.lane.b32.xlu1 %v2103_v20, %s4608_s28 }
0x17a6   : > { %v2110_v2 = vpop.permute.xlu0 %2109 }
0x17a7   : > { %v2114_v56 = vadd.f32 %v2110_v2, %v636_v17 }
0x17a8   : > { %v2108_v57 = vpop.permute.xlu1 %2107 }
0x17a9   : > { %4372 = vtanh.f32 %v2114_v56  ;;  %v2113_v3 = vadd.f32 %v2108_v57, %v631_v21  ;;  %v2118_v21 = vsub.f32 1.0, %v4369_v36 }
0x17ab   : > { %4374 = vtanh.f32 %v2113_v3 }
0x17b6   : > { %v4373_v7 = vpop.eup %4372 }
0x17b7   : > { %2123 = vrot.lane.b32.xlu0 %v4373_v7, %s4610_s11 }
0x17b8   : > { %v4375_v34 = vpop.eup %4374 }
0x17b9   : > { %2121 = vrot.lane.b32.xlu1 %v4375_v34, %s4610_s11 }
0x17bd   : > { %4229 = vperm.xlu1 %4197, %v4228_v35  }
0x1829   : > { %v2124_v17 = vpop.permute.xlu0 %2123 }
0x182a   : > { %v2128_v30 = vmul.f32 %v2124_v17, %v2118_v21  ;;  %v646_v21 = vadd.f32 %v5235_v48, %v4825_v23 }
0x182b   : > { %v2122_v12 = vpop.permute.xlu1 %2121 }
0x182c   : > { %v2127_v19 = vmul.f32 %v2122_v12, %v2117_v25  ;;  %v2132_v40 = vadd.f32 %v2130_v31, %v2128_v30  ;;  %v641_v25 = vadd.f32 %v5237_v49, %v4825_v23 }
0x182e   : > { %v2131_v41 = vadd.f32 %v2129_v32, %v2127_v19  ;;  %v2140_v20 = vsub.f32 %v2132_v40, %v5216_v47 }
0x1830   : > { %v2139_v2 = vsub.f32 %v2131_v41, %v5219_v29 }
0x1838   : > { %v4230_v6 = vpop.permute.xlu1 %4229 }
0x1839   : > { %v4232_v56 = vunpack.i.h.bf16 %v4230_v6  ;;  %v4231_v57 = vunpack.i.l.bf16 %v4230_v6 }
0x183b   : > { %v2152_v3 = vmul.f32 %v4232_v56, %v2140_v20  ;;  %v5281_v7 = vmul.f32 %v4232_v56, %v2132_v40  ;;  %v2151_v13 = vmul.f32 %v4231_v57, %v2139_v2  ;;  %v5283_v14 = vmul.f32 %v4231_v57, %v2131_v41 }
0x183d   : > { %v5286_v34 = vadd.f32 %v2152_v3, %v5216_v47  ;;  %v5289_v36 = vadd.f32 %v2151_v13, %v5219_v29 }
0x183f   : > { %2161 = vrot.lane.b32.xlu1 %v5286_v34, %s4610_s11  ;;  %2159 = vrot.lane.b32.xlu0 %v5289_v36, %s4610_s11 }
0x18b1   : > { %v2162_v28 = vpop.permute.xlu1 %2161  ;;  %v2160_v35 = vpop.permute.xlu0 %2159 }
0x18b2   : > { %4037 = vmatprep.mubr.msk.f32.mxu1 %vm387_vm0, %v2160_v35 }
0x18b3   : > { %4038 = vmatmul.mubr.msk.f32.vlgmr.msra.gmra.mxu1 %vm387_vm0, %v2162_v28 }
0x18b4   : > { %4052 = vmatpush3.msra.mxu1 %v5093_v45 }
0x18b5   : > { %4053 = vmatprep.subr.mxu1 %v5096_v38 }
0x18b6   : > { %4054 = vmatpush3.msra.mxu1 %v5096_v38 }
0x18b7   : > { %4055 = vmatprep.subr.mxu1 %v5100_v39 }
0x18b8   : > { %4056 = vmatpush3.msra.mxu1 %v5100_v39 }
0x18b9   : > { %4057 = vmatprep.subr.mxu1 %v5104_v46 }
0x18ba   : > { %4058 = vmatpush3.msra.mxu1 %v5104_v46 }
0x18bb   : > { %4073 = vmatprep.subr.mxu1 %v5093_v45 }
0x1973   : > { %v4039_v47 = vpop.f32.mrf.mxu1 }
0x1974   : > { %v2239_v29 = vadd.f32 %v4039_v47, %v4819_v16 }
0x1975   : > { %v2233_v17 = vpop.f32.mrf.mxu1 }
0x1976   : > { %v2234_v12 = vadd.f32 %v2233_v17, %v4819_v16  ;;  %2260 = vrot.lane.b32.xlu1 %v2239_v29, %s4608_s28  ;;  %v2243_v30 = vadd.f32 %v2239_v29, %v646_v21  ;;  %v3691_v17 = vsel %vm2294_vm4, 1.0, %v4607_v0  ;;  %vm3395_vm4 = vcmask 785408  }
0x1978   : > { %2258 = vrot.lane.b32.xlu0 %v2234_v12, %s4608_s28  ;;  %v2242_v19 = vadd.f32 %v2234_v12, %v641_v25  ;;  %v3690_v31 = vmul.f32 -1.442695, %v2243_v30  ;;  %v3692_v12 = vsel %vm2295_vm5, 1.0, %v4607_v0 }
0x197a   : > { %v3689_v32 = vmul.f32 -1.442695, %v2242_v19  ;;  %4376 = vpow2.f32 %v3690_v31  ;;  %v4233_v19 = vpack.i.bf16 %v3692_v12, %v3691_v17 }
0x197c   : > { %4378 = vpow2.f32 %v3689_v32 }
0x1987   : > { %v4377_v40 = vpop.eup %4376 }
0x1988   : > { %v2251_v6 = vadd.f32 1.0, %v4377_v40 }
0x1989   : > { %v4379_v41 = vpop.eup %4378 }
0x198a   : > { %v2250_v20 = vadd.f32 1.0, %v4379_v41  ;;  %4380 = vrcp.f32 %v2251_v6 }
0x198c   : > { %4382 = vrcp.f32 %v2250_v20 }
0x1997   : > { %v4381_v2 = vpop.eup %4380 }
0x1998   : > { %v2291_v6 = vmul.f32 %v4381_v2, %v5286_v34 }
0x1999   : > { %v4383_v3 = vpop.eup %4382 }
0x199a   : > { %v2278_v32 = vsub.f32 1.0, %v4383_v3  ;;  %v2290_v20 = vmul.f32 %v4383_v3, %v5289_v36 }
0x19e8   : > { %v2261_v56 = vpop.permute.xlu1 %2260 }
0x19e9   : > { %v2265_v57 = vmul.f32 %v4381_v2, %v2261_v56 }
0x19ea   : > { %v2259_v48 = vpop.permute.xlu0 %2258 }
0x19eb   : > { %v2264_v13 = vmul.f32 %v4383_v3, %v2259_v48  ;;  %2270 = vrot.lane.b32.xlu1 %v2265_v57, %s4608_s28 }
0x19ed   : > { %2268 = vrot.lane.b32.xlu0 %v2264_v13, %s4608_s28 }
0x1a5d   : > { %v2271_v49 = vpop.permute.xlu1 %2270 }
0x1a5e   : > { %v2275_v28 = vadd.f32 %v2271_v49, %v646_v21 }
0x1a5f   : > { %v2269_v35 = vpop.permute.xlu0 %2268 }
0x1a60   : > { %4384 = vtanh.f32 %v2275_v28  ;;  %v2274_v47 = vadd.f32 %v2269_v35, %v641_v25  ;;  %v2279_v25 = vsub.f32 1.0, %v4381_v2 }
0x1a62   : > { %4386 = vtanh.f32 %v2274_v47 }
0x1a6d   : > { %v4385_v29 = vpop.eup %4384 }
0x1a6e   : > { %2284 = vrot.lane.b32.xlu1 %v4385_v29, %s4610_s11 }
0x1a6f   : > { %v4387_v30 = vpop.eup %4386 }
0x1a70   : > { %2282 = vrot.lane.b32.xlu0 %v4387_v30, %s4610_s11 }
0x1a74   : > { %4234 = vperm.xlu0 %4186, %v4233_v19  }
0x1ae0   : > { %v2285_v21 = vpop.permute.xlu1 %2284 }
0x1ae1   : > { %v2289_v40 = vmul.f32 %v2285_v21, %v2279_v25  ;;  %v656_v25 = vadd.f32 %v5239_v50, %v4825_v23 }
0x1ae2   : > { %v2283_v31 = vpop.permute.xlu0 %2282 }
0x1ae3   : > { %v2288_v41 = vmul.f32 %v2283_v31, %v2278_v32  ;;  %v2293_v56 = vadd.f32 %v2291_v6, %v2289_v40  ;;  %v651_v32 = vadd.f32 %v5241_v51, %v4825_v23 }
0x1ae5   : > { %v2292_v57 = vadd.f32 %v2290_v20, %v2288_v41  ;;  %v2301_v13 = vsub.f32 %v2293_v56, %v5286_v34 }
0x1ae7   : > { %v2300_v49 = vsub.f32 %v2292_v57, %v5289_v36 }
0x1aef   : > { %v4235_v48 = vpop.permute.xlu0 %4234 }
0x1af0   : > { %v4237_v28 = vunpack.i.h.bf16 %v4235_v48  ;;  %v4236_v35 = vunpack.i.l.bf16 %v4235_v48 }
0x1af2   : > { %v2313_v47 = vmul.f32 %v4237_v28, %v2301_v13  ;;  %v5325_v29 = vmul.f32 %v4237_v28, %v2293_v56  ;;  %v2312_v17 = vmul.f32 %v4236_v35, %v2300_v49  ;;  %v5327_v12 = vmul.f32 %v4236_v35, %v2292_v57 }
0x1af4   : > { %v5330_v30 = vadd.f32 %v2313_v47, %v5286_v34  ;;  %v5333_v2 = vadd.f32 %v2312_v17, %v5289_v36 }
0x1af6   : > { %2322 = vrot.lane.b32.xlu0 %v5330_v30, %s4610_s11  ;;  %2320 = vrot.lane.b32.xlu1 %v5333_v2, %s4610_s11 }
0x1b68   : > { %v2323_v3 = vpop.permute.xlu0 %2322  ;;  %v2321_v19 = vpop.permute.xlu1 %2320 }
0x1b69   : > { %4048 = vmatprep.mubr.msk.f32.mxu0 %vm387_vm0, %v2321_v19 }
0x1b6a   : > { %4049 = vmatmul.mubr.msk.f32.vlgmr.msra.gmra.mxu0 %vm387_vm0, %v2323_v3 }
0x1b6b   : > { %4063 = vmatpush3.msra.mxu0 %v5093_v45 }
0x1b6c   : > { %4064 = vmatprep.subr.mxu0 %v5096_v38 }
0x1b6d   : > { %4065 = vmatpush3.msra.mxu0 %v5096_v38 }
0x1b6e   : > { %4066 = vmatprep.subr.mxu0 %v5100_v39 }
0x1b6f   : > { %4067 = vmatpush3.msra.mxu0 %v5100_v39 }
0x1b70   : > { %4068 = vmatprep.subr.mxu0 %v5104_v46 }
0x1b71   : > { %4069 = vmatpush3.msra.mxu0 %v5104_v46 }
0x1b72   : > { %4084 = vmatprep.subr.mxu0 %v5093_v45 }
0x1c2a   : > { %v4050_v34 = vpop.f32.mrf.mxu0 }
0x1c2b   : > { %v2400_v36 = vadd.f32 %v4050_v34, %v4819_v16 }
0x1c2c   : > { %v2394_v21 = vpop.f32.mrf.mxu0 }
0x1c2d   : > { %v2395_v31 = vadd.f32 %v2394_v21, %v4819_v16  ;;  %2421 = vrot.lane.b32.xlu0 %v2400_v36, %s4608_s28  ;;  %v2404_v40 = vadd.f32 %v2400_v36, %v656_v25  ;;  %v3697_v21 = vsel %vm2455_vm6, 1.0, %v4607_v0 }
0x1c2f   : > { %2419 = vrot.lane.b32.xlu1 %v2395_v31, %s4608_s28  ;;  %v2403_v41 = vadd.f32 %v2395_v31, %v651_v32  ;;  %v3696_v6 = vmul.f32 -1.442695, %v2404_v40  ;;  %v3698_v31 = vsel %vm2456_vm7, 1.0, %v4607_v0 }
0x1c31   : > { %v3695_v20 = vmul.f32 -1.442695, %v2403_v41  ;;  %4388 = vpow2.f32 %v3696_v6  ;;  %v4238_v41 = vpack.i.bf16 %v3698_v31, %v3697_v21 }
0x1c33   : > { %4390 = vpow2.f32 %v3695_v20 }
0x1c3e   : > { %v4389_v56 = vpop.eup %4388 }
0x1c3f   : > { %v2412_v48 = vadd.f32 1.0, %v4389_v56 }
0x1c40   : > { %v4391_v57 = vpop.eup %4390 }
0x1c41   : > { %v2411_v13 = vadd.f32 1.0, %v4391_v57  ;;  %4392 = vrcp.f32 %v2412_v48 }
0x1c43   : > { %4394 = vrcp.f32 %v2411_v13 }
0x1c4e   : > { %v4393_v49 = vpop.eup %4392 }
0x1c4f   : > { %v2452_v48 = vmul.f32 %v4393_v49, %v5330_v30 }
0x1c50   : > { %v4395_v47 = vpop.eup %4394 }
0x1c51   : > { %v2439_v20 = vsub.f32 1.0, %v4395_v47  ;;  %v2451_v13 = vmul.f32 %v4395_v47, %v5333_v2 }
0x1c9f   : > { %v2422_v28 = vpop.permute.xlu0 %2421 }
0x1ca0   : > { %v2426_v35 = vmul.f32 %v4393_v49, %v2422_v28 }
0x1ca1   : > { %v2420_v50 = vpop.permute.xlu1 %2419 }
0x1ca2   : > { %v2425_v17 = vmul.f32 %v4395_v47, %v2420_v50  ;;  %2431 = vrot.lane.b32.xlu0 %v2426_v35, %s4608_s28 }
0x1ca4   : > { %2429 = vrot.lane.b32.xlu1 %v2425_v17, %s4608_s28 }
0x1d14   : > { %v2432_v51 = vpop.permute.xlu0 %2431 }
0x1d15   : > { %v2436_v3 = vadd.f32 %v2432_v51, %v656_v25 }
0x1d16   : > { %v2430_v19 = vpop.permute.xlu1 %2429 }
0x1d17   : > { %4396 = vtanh.f32 %v2436_v3  ;;  %v2435_v34 = vadd.f32 %v2430_v19, %v651_v32  ;;  %v2440_v32 = vsub.f32 1.0, %v4393_v49 }
0x1d19   : > { %4398 = vtanh.f32 %v2435_v34 }
0x1d24   : > { %v4397_v36 = vpop.eup %4396 }
0x1d25   : > { %2445 = vrot.lane.b32.xlu0 %v4397_v36, %s4610_s11 }
0x1d26   : > { %v4399_v40 = vpop.eup %4398 }
0x1d27   : > { %2443 = vrot.lane.b32.xlu1 %v4399_v40, %s4610_s11 }
0x1d2b   : > { %4239 = vperm.xlu1 %4197, %v4238_v41  }
0x1d97   : > { %v2446_v25 = vpop.permute.xlu0 %2445 }
0x1d98   : > { %v2450_v56 = vmul.f32 %v2446_v25, %v2440_v32 }
0x1d99   : > { %v2444_v6 = vpop.permute.xlu1 %2443 }
0x1d9a   : > { %v2449_v57 = vmul.f32 %v2444_v6, %v2439_v20  ;;  %v2454_v28 = vadd.f32 %v2452_v48, %v2450_v56 }
0x1d9c   : > { %v2453_v35 = vadd.f32 %v2451_v13, %v2449_v57  ;;  %v2462_v17 = vsub.f32 %v2454_v28, %v5330_v30 }
0x1d9e   : > { %v2461_v51 = vsub.f32 %v2453_v35, %v5333_v2 }
0x1da6   : > { %v4240_v50 = vpop.permute.xlu1 %4239 }
0x1da7   : > { %v4242_v3 = vunpack.i.h.bf16 %v4240_v50  ;;  %v4241_v19 = vunpack.i.l.bf16 %v4240_v50 }
0x1da9   : > { %v2474_v34 = vmul.f32 %v4242_v3, %v2462_v17  ;;  %v5369_v36 = vmul.f32 %v4242_v3, %v2454_v28  ;;  %v2473_v21 = vmul.f32 %v4241_v19, %v2461_v51  ;;  %v5371_v31 = vmul.f32 %v4241_v19, %v2453_v35 }
0x1dab   : > { %v5374_v40 = vadd.f32 %v2474_v34, %v5330_v30  ;;  %v5377_v49 = vadd.f32 %v2473_v21, %v5333_v2 }
0x1dad   : > { %2483 = vrot.lane.b32.xlu1 %v5374_v40, %s4610_s11  ;;  %2481 = vrot.lane.b32.xlu0 %v5377_v49, %s4610_s11 }
0x1e1f   : > { %v2484_v47 = vpop.permute.xlu1 %2483  ;;  %v2482_v41 = vpop.permute.xlu0 %2481 }
0x1e20   : > { %4059 = vmatprep.mubr.msk.f32.mxu1 %vm387_vm0, %v2482_v41  ;;  %v3704_v41 = vsel %vm2617_vm9, 1.0, %v4607_v0 }
0x1e21   : > { %4060 = vmatmul.mubr.msk.f32.vlgmr.msra.gmra.mxu1 %vm387_vm0, %v2484_v47  ;;  %v3703_v47 = vsel %vm2616_vm8, 1.0, %v4607_v0 }
0x1e22   : > { %4074 = vmatpush3.msra.mxu1 %v5093_v45 }
0x1e23   : > { %4075 = vmatprep.subr.mxu1 %v5096_v38 }
0x1e24   : > { %4076 = vmatpush3.msra.mxu1 %v5096_v38  ;;  %v666_v38 = vadd.f32 %v5243_v52, %v4825_v23 }
0x1e25   : > { %4077 = vmatprep.subr.mxu1 %v5100_v39 }
0x1e26   : > { %4078 = vmatpush3.msra.mxu1 %v5100_v39  ;;  %v661_v39 = vadd.f32 %v5245_v54, %v4825_v23 }
0x1e27   : > { %4079 = vmatprep.subr.mxu1 %v5104_v46 }
0x1e28   : > { %4080 = vmatpush3.msra.mxu1 %v5104_v46 }
0x1e29   : > { %4095 = vmatprep.subr.mxu1 %v5093_v45 }
0x1ee1   : > { %v4061_v30 = vpop.f32.mrf.mxu1 }
0x1ee2   : > { %v2561_v2 = vadd.f32 %v4061_v30, %v4819_v16 }
0x1ee3   : > { %v2555_v25 = vpop.f32.mrf.mxu1 }
0x1ee4   : > { %v2556_v6 = vadd.f32 %v2555_v25, %v4819_v16  ;;  %2582 = vrot.lane.b32.xlu1 %v2561_v2, %s4608_s28  ;;  %v2565_v32 = vadd.f32 %v2561_v2, %v666_v38  ;;  %v4243_v2 = vpack.i.bf16 %v3704_v41, %v3703_v47 }
0x1ee6   : > { %2580 = vrot.lane.b32.xlu0 %v2556_v6, %s4608_s28  ;;  %v2564_v46 = vadd.f32 %v2556_v6, %v661_v39  ;;  %v3702_v20 = vmul.f32 -1.442695, %v2565_v32 }
0x1ee8   : > { %v3701_v45 = vmul.f32 -1.442695, %v2564_v46  ;;  %4400 = vpow2.f32 %v3702_v20 }
0x1eea   : > { %4402 = vpow2.f32 %v3701_v45 }
0x1ef5   : > { %v4401_v56 = vpop.eup %4400 }
0x1ef6   : > { %v2573_v48 = vadd.f32 1.0, %v4401_v56 }
0x1ef7   : > { %v4403_v57 = vpop.eup %4402 }
0x1ef8   : > { %v2572_v13 = vadd.f32 1.0, %v4403_v57  ;;  %4404 = vrcp.f32 %v2573_v48 }
0x1efa   : > { %4406 = vrcp.f32 %v2572_v13 }
0x1f05   : > { %v4405_v28 = vpop.eup %4404 }
0x1f06   : > { %v2613_v11 = vmul.f32 %v4405_v28, %v5374_v40 }
0x1f07   : > { %v4407_v17 = vpop.eup %4406 }
0x1f08   : > { %v2612_v46 = vmul.f32 %v4407_v17, %v5377_v49 }
0x1f56   : > { %v2583_v35 = vpop.permute.xlu1 %2582 }
0x1f57   : > { %v2587_v50 = vmul.f32 %v4405_v28, %v2583_v35 }
0x1f58   : > { %v2581_v52 = vpop.permute.xlu0 %2580 }
0x1f59   : > { %v2586_v51 = vmul.f32 %v4407_v17, %v2581_v52  ;;  %2592 = vrot.lane.b32.xlu1 %v2587_v50, %s4608_s28 }
0x1f5b   : > { %2590 = vrot.lane.b32.xlu0 %v2586_v51, %s4608_s28 }
0x1fcb   : > { %v2593_v54 = vpop.permute.xlu1 %2592 }
0x1fcc   : > { %v2597_v3 = vadd.f32 %v2593_v54, %v666_v38  ;;  %v2601_v38 = vsub.f32 1.0, %v4405_v28 }
0x1fcd   : > { %v2591_v19 = vpop.permute.xlu0 %2590 }
0x1fce   : > { %4408 = vtanh.f32 %v2597_v3  ;;  %v2596_v34 = vadd.f32 %v2591_v19, %v661_v39  ;;  %v2600_v39 = vsub.f32 1.0, %v4407_v17 }
0x1fd0   : > { %4410 = vtanh.f32 %v2596_v34  ;;  %v5429_v34 = vld [vmem:[#allocation5 + $0x18] sm:$0xff] }
0x1fdb   : > { %v4409_v21 = vpop.eup %4408 }
0x1fdc   : > { %2606 = vrot.lane.b32.xlu1 %v4409_v21, %s4610_s11  ;;  %v5440_v21 = vld [vmem:[#allocation5] sm:$0xff] }
0x1fdd   : > { %v4411_v30 = vpop.eup %4410 }
0x1fde   : > { %2604 = vrot.lane.b32.xlu0 %v4411_v30, %s4610_s11 }
0x1fe2   : > { %4244 = vperm.xlu0 %4186, %v4243_v2  }
0x204e   : > { %v2607_v25 = vpop.permute.xlu1 %2606 }
0x204f   : > { %v2611_v32 = vmul.f32 %v2607_v25, %v2601_v38  ;;  %v676_v25 = vadd.f32 %v5247_v58, %v4825_v23 }
0x2050   : > { %v2605_v6 = vpop.permute.xlu0 %2604 }
0x2051   : > { %v2610_v22 = vmul.f32 %v2605_v6, %v2600_v39  ;;  %v2615_v20 = vadd.f32 %v2613_v11, %v2611_v32  ;;  %v671_v6 = vadd.f32 %v5249_v59, %v4825_v23 }
0x2053   : > { %v2614_v45 = vadd.f32 %v2612_v46, %v2610_v22  ;;  %v2623_v57 = vsub.f32 %v2615_v20, %v5374_v40 }
0x2055   : > { %v2622_v48 = vsub.f32 %v2614_v45, %v5377_v49 }
0x205d   : > { %v4245_v56 = vpop.permute.xlu0 %4244 }
0x205e   : > { %v4247_v13 = vunpack.i.h.bf16 %v4245_v56  ;;  %v4246_v35 = vunpack.i.l.bf16 %v4245_v56 }
0x2060   : > { %v2635_v50 = vmul.f32 %v4247_v13, %v2623_v57  ;;  %v5413_v52 = vmul.f32 %v4247_v13, %v2615_v20  ;;  %v2634_v51 = vmul.f32 %v4246_v35, %v2622_v48  ;;  %v5415_v54 = vmul.f32 %v4246_v35, %v2614_v45 }
0x2062   : > { %v5418_v3 = vadd.f32 %v2635_v50, %v5374_v40  ;;  %v5421_v28 = vadd.f32 %v2634_v51, %v5377_v49  ;;  %v5432_v40 = vld [vmem:[#allocation5 + $0x10] sm:$0xff]  ;;  %v5436_v49 = vld [vmem:[#allocation5 + $0x8] sm:$0xff] }
0x2064   : > { %2644 = vrot.lane.b32.xlu0 %v5418_v3, %s4610_s11  ;;  %2642 = vrot.lane.b32.xlu1 %v5421_v28, %s4610_s11 }
0x20d6   : > { %v2645_v17 = vpop.permute.xlu0 %2644  ;;  %v2643_v19 = vpop.permute.xlu1 %2642 }
0x20d7   : > { %4070 = vmatprep.mubr.msk.f32.mxu0 %vm387_vm0, %v2643_v19  ;;  %v5455_v19 = vld [vmem:[%s4833_s7] sm:$0xff] }
0x20d8   : > { %4071 = vmatmul.mubr.msk.f32.vlgmr.msra.gmra.mxu0 %vm387_vm0, %v2645_v17  ;;  %vm2777_vm10 = vcmp.gt.s32.totalorder %v5455_v19, 12  ;;  %vm2938_vm12 = vcmp.gt.s32.totalorder %v5455_v19, 13  ;;  %vm3099_vm14 = vcmp.gt.s32.totalorder %v5455_v19, 14  ;;  %vm3260_vm1 = vcmp.gt.s32.totalorder %v5455_v19, 15 }
0x20d9   : > { %4085 = vmatpush3.msra.mxu0 %v5429_v34 }
0x20da   : > { %4086 = vmatprep.subr.mxu0 %v5432_v40 }
0x20db   : > { %4087 = vmatpush3.msra.mxu0 %v5432_v40 }
0x20dc   : > { %4088 = vmatprep.subr.mxu0 %v5436_v49 }
0x20dd   : > { %4089 = vmatpush3.msra.mxu0 %v5436_v49 }
0x20de   : > { %4090 = vmatprep.subr.mxu0 %v5440_v21 }
0x20df   : > { %4091 = vmatpush3.msra.mxu0 %v5440_v21 }
0x2198   : > { %v4072_v47 = vpop.f32.mrf.mxu0 }
0x2199   : > { %v2722_v41 = vadd.f32 %v4072_v47, %v4819_v16  ;;  %v5459_v47 = vld [vmem:[%s4833_s7 + $0x8] sm:$0xff]  ;;  %s5695_s7 = scalar_lea.hbm %s5774_s6, %s3741_s26 }
0x219a   : > { %v2716_v30 = vpop.f32.mrf.mxu0  ;;  %vm2778_vm11 = vcmp.gt.s32.totalorder %v5459_v47, 12  ;;  %vm2939_vm13 = vcmp.gt.s32.totalorder %v5459_v47, 13  ;;  %vm3100_vm15 = vcmp.gt.s32.totalorder %v5459_v47, 14  ;;  %vm3261_vm2 = vcmp.gt.s32.totalorder %v5459_v47, 15 }
0x219b   : > { %v2717_v2 = vadd.f32 %v2716_v30, %v4819_v16  ;;  %2743 = vrot.lane.b32.xlu0 %v2722_v41, %s4608_s28  ;;  %v2726_v38 = vadd.f32 %v2722_v41, %v676_v25  ;;  %v3709_v30 = vsel %vm2777_vm10, 1.0, %v4607_v0 }
0x219d   : > { %2741 = vrot.lane.b32.xlu1 %v2717_v2, %s4608_s28  ;;  %v2725_v39 = vadd.f32 %v2717_v2, %v671_v6  ;;  %v3708_v32 = vmul.f32 -1.442695, %v2726_v38  ;;  %v3710_v2 = vsel %vm2778_vm11, 1.0, %v4607_v0 }
0x219f   : > { %v3707_v22 = vmul.f32 -1.442695, %v2725_v39  ;;  %4412 = vpow2.f32 %v3708_v32 }
0x21a1   : > { %4414 = vpow2.f32 %v3707_v22 }
0x21ac   : > { %v4413_v11 = vpop.eup %4412 }
0x21ad   : > { %v2734_v20 = vadd.f32 1.0, %v4413_v11 }
0x21ae   : > { %v4415_v46 = vpop.eup %4414 }
0x21af   : > { %v2733_v45 = vadd.f32 1.0, %v4415_v46  ;;  %4416 = vrcp.f32 %v2734_v20 }
0x21b1   : > { %4418 = vrcp.f32 %v2733_v45 }
0x21bc   : > { %v4417_v56 = vpop.eup %4416 }
0x21bd   : > { %v2762_v32 = vsub.f32 1.0, %v4417_v56  ;;  %v2774_v20 = vmul.f32 %v4417_v56, %v5418_v3 }
0x21be   : > { %v4419_v48 = vpop.eup %4418 }
0x21bf   : > { %v2761_v22 = vsub.f32 1.0, %v4419_v48  ;;  %v2773_v45 = vmul.f32 %v4419_v48, %v5421_v28 }
0x220d   : > { %v2744_v57 = vpop.permute.xlu0 %2743 }
0x220e   : > { %v2748_v58 = vmul.f32 %v4417_v56, %v2744_v57 }
0x220f   : > { %v2742_v13 = vpop.permute.xlu1 %2741 }
0x2210   : > { %v2747_v59 = vmul.f32 %v4419_v48, %v2742_v13  ;;  %2753 = vrot.lane.b32.xlu0 %v2748_v58, %s4608_s28 }
0x2212   : > { %2751 = vrot.lane.b32.xlu1 %v2747_v59, %s4608_s28 }
0x2282   : > { %v2754_v35 = vpop.permute.xlu0 %2753 }
0x2283   : > { %v2758_v50 = vadd.f32 %v2754_v35, %v676_v25 }
0x2284   : > { %v2752_v51 = vpop.permute.xlu1 %2751 }
0x2285   : > { %4420 = vtanh.f32 %v2758_v50  ;;  %v2757_v17 = vadd.f32 %v2752_v51, %v671_v6  ;;  %v4248_v6 = vpack.i.bf16 %v3710_v2, %v3709_v30 }
0x2287   : > { %4422 = vtanh.f32 %v2757_v17 }
0x2292   : > { %v4421_v41 = vpop.eup %4420 }
0x2293   : > { %2767 = vrot.lane.b32.xlu0 %v4421_v41, %s4610_s11 }
0x2294   : > { %v4423_v25 = vpop.eup %4422 }
0x2295   : > { %2765 = vrot.lane.b32.xlu1 %v4423_v25, %s4610_s11 }
0x2299   : > { %4249 = vperm.xlu1 %4197, %v4248_v6  }
0x2305   : > { %v2768_v38 = vpop.permute.xlu0 %2767 }
0x2306   : > { %v2772_v11 = vmul.f32 %v2768_v38, %v2762_v32 }
0x2307   : > { %v2766_v39 = vpop.permute.xlu1 %2765 }
0x2308   : > { %v2771_v46 = vmul.f32 %v2766_v39, %v2761_v22  ;;  %v2776_v57 = vadd.f32 %v2774_v20, %v2772_v11 }
0x230a   : > { %v2775_v58 = vadd.f32 %v2773_v45, %v2771_v46  ;;  %v2784_v59 = vsub.f32 %v2776_v57, %v5418_v3 }
0x230c   : > { %v2783_v35 = vsub.f32 %v2775_v58, %v5421_v28 }
0x2314   : > { %v4250_v13 = vpop.permute.xlu1 %4249 }
0x2315   : > { %v4252_v50 = vunpack.i.h.bf16 %v4250_v13  ;;  %v4251_v51 = vunpack.i.l.bf16 %v4250_v13 }
0x2317   : > { %v2796_v17 = vmul.f32 %v4252_v50, %v2784_v59  ;;  %v5470_v41 = vmul.f32 %v4252_v50, %v2776_v57  ;;  %v2795_v30 = vmul.f32 %v4251_v51, %v2783_v35  ;;  %v5472_v2 = vmul.f32 %v4251_v51, %v2775_v58 }
0x2319   : > { %v5475_v25 = vadd.f32 %v2796_v17, %v5418_v3  ;;  %v5478_v56 = vadd.f32 %v2795_v30, %v5421_v28 }
0x231b   : > { %2805 = vrot.lane.b32.xlu1 %v5475_v25, %s4610_s11  ;;  %2803 = vrot.lane.b32.xlu0 %v5478_v56, %s4610_s11 }
0x238d   : > { %v2806_v48 = vpop.permute.xlu1 %2805  ;;  %v2804_v6 = vpop.permute.xlu0 %2803 }
0x238e   : > { %4081 = vmatprep.mubr.msk.f32.mxu1 %vm387_vm0, %v2804_v6  ;;  %v3716_v6 = vsel %vm2939_vm13, 1.0, %v4607_v0 }
0x238f   : > { %4082 = vmatmul.mubr.msk.f32.vlgmr.msra.gmra.mxu1 %vm387_vm0, %v2806_v48  ;;  %v3715_v48 = vsel %vm2938_vm12, 1.0, %v4607_v0 }
0x2390   : > { %4096 = vmatpush3.msra.mxu1 %v5429_v34  ;;  %v686_v34 = vadd.f32 %v5251_v43, %v4825_v23 }
0x2391   : > { %4097 = vmatprep.subr.mxu1 %v5432_v40 }
0x2392   : > { %4098 = vmatpush3.msra.mxu1 %v5432_v40  ;;  %v681_v40 = vadd.f32 %v5253_v4, %v4825_v23 }
0x2393   : > { %4099 = vmatprep.subr.mxu1 %v5436_v49 }
0x2394   : > { %4100 = vmatpush3.msra.mxu1 %v5436_v49 }
0x2395   : > { %4101 = vmatprep.subr.mxu1 %v5440_v21 }
0x2396   : > { %4102 = vmatpush3.msra.mxu1 %v5440_v21 }
0x244f   : > { %v4083_v3 = vpop.f32.mrf.mxu1 }
0x2450   : > { %v2883_v28 = vadd.f32 %v4083_v3, %v4819_v16 }
0x2451   : > { %v2877_v38 = vpop.f32.mrf.mxu1 }
0x2452   : > { %v2878_v39 = vadd.f32 %v2877_v38, %v4819_v16  ;;  %2904 = vrot.lane.b32.xlu1 %v2883_v28, %s4608_s28  ;;  %v2887_v49 = vadd.f32 %v2883_v28, %v686_v34  ;;  %v4253_v28 = vpack.i.bf16 %v3716_v6, %v3715_v48 }
0x2454   : > { %2902 = vrot.lane.b32.xlu0 %v2878_v39, %s4608_s28  ;;  %v2886_v32 = vadd.f32 %v2878_v39, %v681_v40  ;;  %v3714_v22 = vmul.f32 -1.442695, %v2887_v49 }
0x2456   : > { %v3713_v21 = vmul.f32 -1.442695, %v2886_v32  ;;  %4424 = vpow2.f32 %v3714_v22 }
0x2458   : > { %4426 = vpow2.f32 %v3713_v21 }
0x2463   : > { %v4425_v11 = vpop.eup %4424 }
0x2464   : > { %v2895_v20 = vadd.f32 1.0, %v4425_v11 }
0x2465   : > { %v4427_v46 = vpop.eup %4426 }
0x2466   : > { %v2894_v45 = vadd.f32 1.0, %v4427_v46  ;;  %4428 = vrcp.f32 %v2895_v20 }
0x2468   : > { %4430 = vrcp.f32 %v2894_v45 }
0x2473   : > { %v4429_v57 = vpop.eup %4428 }
0x2474   : > { %v2935_v22 = vmul.f32 %v4429_v57, %v5475_v25 }
0x2475   : > { %v4431_v59 = vpop.eup %4430 }
0x2476   : > { %v2934_v21 = vmul.f32 %v4431_v59, %v5478_v56 }
0x24c4   : > { %v2905_v58 = vpop.permute.xlu1 %2904 }
0x24c5   : > { %v2909_v13 = vmul.f32 %v4429_v57, %v2905_v58 }
0x24c6   : > { %v2903_v43 = vpop.permute.xlu0 %2902 }
0x24c7   : > { %v2908_v35 = vmul.f32 %v4431_v59, %v2903_v43  ;;  %2914 = vrot.lane.b32.xlu1 %v2909_v13, %s4608_s28 }
0x24c9   : > { %2912 = vrot.lane.b32.xlu0 %v2908_v35, %s4608_s28 }
0x2539   : > { %v2915_v4 = vpop.permute.xlu1 %2914 }
0x253a   : > { %v2919_v50 = vadd.f32 %v2915_v4, %v686_v34  ;;  %v2923_v34 = vsub.f32 1.0, %v4429_v57 }
0x253b   : > { %v2913_v51 = vpop.permute.xlu0 %2912 }
0x253c   : > { %4432 = vtanh.f32 %v2919_v50  ;;  %v2918_v17 = vadd.f32 %v2913_v51, %v681_v40  ;;  %v2922_v40 = vsub.f32 1.0, %v4431_v59 }
0x253e   : > { %4434 = vtanh.f32 %v2918_v17 }
0x2549   : > { %v4433_v30 = vpop.eup %4432 }
0x254a   : > { %2928 = vrot.lane.b32.xlu1 %v4433_v30, %s4610_s11 }
0x254b   : > { %v4435_v3 = vpop.eup %4434 }
0x254c   : > { %2926 = vrot.lane.b32.xlu0 %v4435_v3, %s4610_s11 }
0x2550   : > { %4254 = vperm.xlu0 %4186, %v4253_v28   ;;  %v691_v28 = vadd.f32 %v5257_v61, %v4825_v23 }
0x25bc   : > { %v2929_v38 = vpop.permute.xlu1 %2928 }
0x25bd   : > { %v2933_v49 = vmul.f32 %v2929_v38, %v2923_v34 }
0x25be   : > { %v2927_v39 = vpop.permute.xlu0 %2926 }
0x25bf   : > { %v2932_v32 = vmul.f32 %v2927_v39, %v2922_v40  ;;  %v2937_v11 = vadd.f32 %v2935_v22, %v2933_v49 }
0x25c1   : > { %v2936_v46 = vadd.f32 %v2934_v21, %v2932_v32  ;;  %v2945_v45 = vsub.f32 %v2937_v11, %v5475_v25 }
0x25c3   : > { %v2944_v58 = vsub.f32 %v2936_v46, %v5478_v56 }
0x25cb   : > { %v4255_v20 = vpop.permute.xlu0 %4254 }
0x25cc   : > { %v4257_v13 = vunpack.i.h.bf16 %v4255_v20  ;;  %v4256_v43 = vunpack.i.l.bf16 %v4255_v20 }
0x25ce   : > { %v2957_v35 = vmul.f32 %v4257_v13, %v2945_v45  ;;  %v5513_v4 = vmul.f32 %v4257_v13, %v2937_v11  ;;  %v2956_v50 = vmul.f32 %v4256_v43, %v2944_v58  ;;  %v5515_v51 = vmul.f32 %v4256_v43, %v2936_v46 }
0x25d0   : > { %v5518_v17 = vadd.f32 %v2957_v35, %v5475_v25  ;;  %v5521_v57 = vadd.f32 %v2956_v50, %v5478_v56  ;;  %v696_v56 = vadd.f32 %v5255_v60, %v4825_v23 }
0x25d2   : > { %2966 = vrot.lane.b32.xlu0 %v5518_v17, %s4610_s11  ;;  %2964 = vrot.lane.b32.xlu1 %v5521_v57, %s4610_s11 }
0x2644   : > { %v2967_v59 = vpop.permute.xlu0 %2966  ;;  %v2965_v30 = vpop.permute.xlu1 %2964 }
0x2645   : > { %4092 = vmatprep.mubr.msk.f32.mxu0 %vm387_vm0, %v2965_v30  ;;  %v3722_v30 = vsel %vm3100_vm15, 1.0, %v4607_v0 }
0x2646   : > { %4093 = vmatmul.mubr.msk.f32.vlgmr.msra.gmra.mxu0 %vm387_vm0, %v2967_v59  ;;  %v3721_v59 = vsel %vm3099_vm14, 1.0, %v4607_v0 }
0x2706   : > { %v4094_v48 = vpop.f32.mrf.mxu0 }
0x2707   : > { %v3044_v6 = vadd.f32 %v4094_v48, %v4819_v16 }
0x2708   : > { %v3038_v25 = vpop.f32.mrf.mxu0 }
0x2709   : > { %v3039_v3 = vadd.f32 %v3038_v25, %v4819_v16  ;;  %3065 = vrot.lane.b32.xlu0 %v3044_v6, %s4608_s28  ;;  %v3048_v38 = vadd.f32 %v3044_v6, %v696_v56  ;;  %v4258_v6 = vpack.i.bf16 %v3722_v30, %v3721_v59 }
0x270b   : > { %3063 = vrot.lane.b32.xlu1 %v3039_v3, %s4608_s28  ;;  %v3047_v39 = vadd.f32 %v3039_v3, %v691_v28  ;;  %v3720_v34 = vmul.f32 -1.442695, %v3048_v38 }
0x270d   : > { %v3719_v40 = vmul.f32 -1.442695, %v3047_v39  ;;  %4436 = vpow2.f32 %v3720_v34 }
0x270f   : > { %4438 = vpow2.f32 %v3719_v40 }
0x271a   : > { %v4437_v49 = vpop.eup %4436 }
0x271b   : > { %v3056_v22 = vadd.f32 1.0, %v4437_v49 }
0x271c   : > { %v4439_v32 = vpop.eup %4438 }
0x271d   : > { %v3055_v21 = vadd.f32 1.0, %v4439_v32  ;;  %4440 = vrcp.f32 %v3056_v22 }
0x271f   : > { %4442 = vrcp.f32 %v3055_v21 }
0x272a   : > { %v4441_v11 = vpop.eup %4440 }
0x272b   : > { %v3096_v34 = vmul.f32 %v4441_v11, %v5518_v17 }
0x272c   : > { %v4443_v45 = vpop.eup %4442 }
0x272d   : > { %v3095_v40 = vmul.f32 %v4443_v45, %v5521_v57 }
0x277b   : > { %v3066_v46 = vpop.permute.xlu0 %3065 }
0x277c   : > { %v3070_v20 = vmul.f32 %v4441_v11, %v3066_v46 }
0x277d   : > { %v3064_v60 = vpop.permute.xlu1 %3063 }
0x277e   : > { %v3069_v58 = vmul.f32 %v4443_v45, %v3064_v60  ;;  %3075 = vrot.lane.b32.xlu0 %v3070_v20, %s4608_s28 }
0x2780   : > { %3073 = vrot.lane.b32.xlu1 %v3069_v58, %s4608_s28 }
0x27f0   : > { %v3076_v61 = vpop.permute.xlu0 %3075 }
0x27f1   : > { %v3080_v13 = vadd.f32 %v3076_v61, %v696_v56  ;;  %v3084_v56 = vsub.f32 1.0, %v4441_v11 }
0x27f2   : > { %v3074_v43 = vpop.permute.xlu1 %3073 }
0x27f3   : > { %4444 = vtanh.f32 %v3080_v13  ;;  %v3079_v35 = vadd.f32 %v3074_v43, %v691_v28  ;;  %v3083_v28 = vsub.f32 1.0, %v4443_v45 }
0x27f5   : > { %4446 = vtanh.f32 %v3079_v35 }
0x2800   : > { %v4445_v50 = vpop.eup %4444 }
0x2801   : > { %3089 = vrot.lane.b32.xlu0 %v4445_v50, %s4610_s11 }
0x2802   : > { %v4447_v48 = vpop.eup %4446 }
0x2803   : > { %3087 = vrot.lane.b32.xlu1 %v4447_v48, %s4610_s11 }
0x2807   : > { %4259 = vperm.xlu1 %4197, %v4258_v6   ;;  %v701_v6 = vadd.f32 %v5261_v63, %v4825_v23 }
0x2873   : > { %v3090_v25 = vpop.permute.xlu0 %3089 }
0x2874   : > { %v3094_v38 = vmul.f32 %v3090_v25, %v3084_v56 }
0x2875   : > { %v3088_v3 = vpop.permute.xlu1 %3087 }
0x2876   : > { %v3093_v39 = vmul.f32 %v3088_v3, %v3083_v28  ;;  %v3098_v49 = vadd.f32 %v3096_v34, %v3094_v38 }
0x2878   : > { %v3097_v32 = vadd.f32 %v3095_v40, %v3093_v39  ;;  %v3106_v21 = vsub.f32 %v3098_v49, %v5518_v17 }
0x287a   : > { %v3105_v46 = vsub.f32 %v3097_v32, %v5521_v57 }
0x2882   : > { %v4260_v22 = vpop.permute.xlu1 %4259 }
0x2883   : > { %v4262_v20 = vunpack.i.h.bf16 %v4260_v22  ;;  %v4261_v60 = vunpack.i.l.bf16 %v4260_v22 }
0x2885   : > { %v3118_v58 = vmul.f32 %v4262_v20, %v3106_v21  ;;  %v5549_v61 = vmul.f32 %v4262_v20, %v3098_v49  ;;  %v3117_v13 = vmul.f32 %v4261_v60, %v3105_v46  ;;  %v5551_v43 = vmul.f32 %v4261_v60, %v3097_v32 }
0x2887   : > { %v5554_v35 = vadd.f32 %v3118_v58, %v5518_v17  ;;  %v5557_v11 = vadd.f32 %v3117_v13, %v5521_v57  ;;  %v706_v57 = vadd.f32 %v5259_v62, %v4825_v23  ;;  %v3727_v58 = vsel %vm3260_vm1, 1.0, %v4607_v0 }
0x2888   : > { %v3728_v13 = vsel %vm3261_vm2, 1.0, %v4607_v0 }
0x2889   : > { %3127 = vrot.lane.b32.xlu1 %v5554_v35, %s4610_s11  ;;  %3125 = vrot.lane.b32.xlu0 %v5557_v11, %s4610_s11 }
0x28fb   : > { %v3128_v45 = vpop.permute.xlu1 %3127  ;;  %v3126_v50 = vpop.permute.xlu0 %3125 }
0x28fc   : > { %4103 = vmatprep.mubr.msk.f32.mxu1 %vm387_vm0, %v3126_v50  ;;  %v4263_v50 = vpack.i.bf16 %v3728_v13, %v3727_v58 }
0x28fd   : > { %4104 = vmatmul.mubr.msk.f32.vlgmr.msra.gmra.mxu1 %vm387_vm0, %v3128_v45 }
0x29bd   : > { %v4105_v59 = vpop.f32.mrf.mxu1 }
0x29be   : > { %v3205_v30 = vadd.f32 %v4105_v59, %v4819_v16 }
0x29bf   : > { %v3199_v17 = vpop.f32.mrf.mxu1 }
0x29c0   : > { %v3200_v48 = vadd.f32 %v3199_v17, %v4819_v16  ;;  %3226 = vrot.lane.b32.xlu1 %v3205_v30, %s4608_s28  ;;  %v3209_v25 = vadd.f32 %v3205_v30, %v706_v57 }
0x29c2   : > { %3224 = vrot.lane.b32.xlu0 %v3200_v48, %s4608_s28  ;;  %v3208_v3 = vadd.f32 %v3200_v48, %v701_v6  ;;  %v3726_v56 = vmul.f32 -1.442695, %v3209_v25 }
0x29c4   : > { %v3725_v28 = vmul.f32 -1.442695, %v3208_v3  ;;  %4448 = vpow2.f32 %v3726_v56 }
0x29c6   : > { %4450 = vpow2.f32 %v3725_v28 }
0x29d1   : > { %v4449_v38 = vpop.eup %4448 }
0x29d2   : > { %v3217_v34 = vadd.f32 1.0, %v4449_v38 }
0x29d3   : > { %v4451_v39 = vpop.eup %4450 }
0x29d4   : > { %v3216_v16 = vadd.f32 1.0, %v4451_v39  ;;  %4452 = vrcp.f32 %v3217_v34 }
0x29d6   : > { %4454 = vrcp.f32 %v3216_v16 }
0x29e1   : > { %v4453_v40 = vpop.eup %4452 }
0x29e3   : > { %v4455_v22 = vpop.eup %4454 }
0x2a32   : > { %v3227_v49 = vpop.permute.xlu1 %3226 }
0x2a33   : > { %v3231_v32 = vmul.f32 %v4453_v40, %v3227_v49 }
0x2a34   : > { %v3225_v62 = vpop.permute.xlu0 %3224 }
0x2a35   : > { %v3230_v21 = vmul.f32 %v4455_v22, %v3225_v62  ;;  %3236 = vrot.lane.b32.xlu1 %v3231_v32, %s4608_s28 }
0x2a37   : > { %3234 = vrot.lane.b32.xlu0 %v3230_v21, %s4608_s28 }
0x2aa7   : > { %v3237_v23 = vpop.permute.xlu1 %3236 }
0x2aa8   : > { %v3241_v63 = vadd.f32 %v3237_v23, %v706_v57 }
0x2aa9   : > { %v3235_v46 = vpop.permute.xlu0 %3234 }
0x2aaa   : > { %4456 = vtanh.f32 %v3241_v63  ;;  %v3240_v20 = vadd.f32 %v3235_v46, %v701_v6 }
0x2aac   : > { %4458 = vtanh.f32 %v3240_v20 }
0x2ab7   : > { %v4457_v60 = vpop.eup %4456 }
0x2ab8   : > { %3250 = vrot.lane.b32.xlu1 %v4457_v60, %s4610_s11 }
0x2ab9   : > { %v4459_v45 = vpop.eup %4458 }
0x2aba   : > { %3248 = vrot.lane.b32.xlu0 %v4459_v45, %s4610_s11 }
0x2abc   : > { %3296 = vrot.lane.b32.xlu1 %v4853_v1, %s4610_s11 }
0x2abe   : > { %4264 = vperm.xlu0 %4186, %v4263_v50  }
0x2ac0   : > { %3320 = vrot.lane.b32.xlu1 %v5033_v37, %s4610_s11 }
0x2ac2   : > { %3298 = vrot.lane.b32.xlu0 %v4857_v9, %s4610_s11 }
0x2ac4   : > { %3344 = vrot.lane.b32.xlu1 %v5283_v14, %s4610_s11 }
0x2ac6   : > { %3322 = vrot.lane.b32.xlu0 %v5031_v33, %s4610_s11 }
0x2ac8   : > { %3368 = vrot.lane.b32.xlu1 %v5472_v2, %s4610_s11 }
0x2aca   : > { %3346 = vrot.lane.b32.xlu0 %v5281_v7, %s4610_s11 }
0x2acc   : > { %3304 = vrot.lane.b32.xlu1 %v4941_v18, %s4611_s16  ;;  %v3244_v18 = vsub.f32 1.0, %v4455_v22 }
0x2ace   : > { %3370 = vrot.lane.b32.xlu0 %v5470_v41, %s4610_s11 }
0x2ad0   : > { %3328 = vrot.lane.b32.xlu1 %v5139_v55, %s4611_s16 }
0x2ad2   : > { %3306 = vrot.lane.b32.xlu0 %v4939_v15, %s4611_s16  ;;  %v3245_v15 = vsub.f32 1.0, %v4453_v40 }
0x2ad4   : > { %3352 = vrot.lane.b32.xlu1 %v5371_v31, %s4611_s16 }
0x2ad6   : > { %3330 = vrot.lane.b32.xlu0 %v5137_v53, %s4611_s16  ;;  %v3257_v53 = vmul.f32 %v4453_v40, %v5554_v35 }
0x2ad8   : > { %3376 = vrot.lane.b32.xlu1 %v5551_v43, %s4611_s16 }
0x2ada   : > { %3354 = vrot.lane.b32.xlu0 %v5369_v36, %s4611_s16 }
0x2adc   : > { %3312 = vrot.lane.b32.xlu1 %v4987_v26, %s4608_s28 }
0x2ade   : > { %3378 = vrot.lane.b32.xlu0 %v5549_v61, %s4611_s16 }
0x2ae0   : > { %3336 = vrot.lane.b32.xlu1 %v5213_v8, %s4608_s28 }
0x2ae2   : > { %3314 = vrot.lane.b32.xlu0 %v4985_v24, %s4608_s28  ;;  %v3256_v24 = vmul.f32 %v4455_v22, %v5557_v11 }
0x2ae4   : > { %3360 = vrot.lane.b32.xlu1 %v5415_v54, %s4608_s28 }
0x2ae6   : > { %3338 = vrot.lane.b32.xlu0 %v5211_v44, %s4608_s28 }
0x2aea   : > { %3362 = vrot.lane.b32.xlu0 %v5413_v52, %s4608_s28 }
0x2b2a   : > { %v3251_v0 = vpop.permute.xlu1 %3250 }
0x2b2b   : > { %v3255_v26 = vmul.f32 %v3251_v0, %v3245_v15 }
0x2b2c   : > { %v3249_v9 = vpop.permute.xlu0 %3248 }
0x2b2d   : > { %v3254_v33 = vmul.f32 %v3249_v9, %v3244_v18  ;;  %v3259_v55 = vadd.f32 %v3257_v53, %v3255_v26 }
0x2b2e   : > { %v3297_v1 = vpop.permute.xlu1 %3296 }
0x2b2f   : > { %v3258_v8 = vadd.f32 %v3256_v24, %v3254_v33  ;;  %v3267_v44 = vsub.f32 %v3259_v55, %v5554_v35 }
0x2b31   : > { %v3266_v36 = vsub.f32 %v3258_v8, %v5557_v11 }
0x2b32   : > { %v3321_v37 = vpop.permute.xlu1 %3320 }
0x2b36   : > { %v3345_v7 = vpop.permute.xlu1 %3344 }
0x2b37   : > { %v3404_v32 = vsel %vm387_vm0, %v3345_v7, %v5327_v12 }
0x2b39   : > { %v4265_v14 = vpop.permute.xlu0 %4264 }
0x2b3a   : > { %v4267_v31 = vunpack.i.h.bf16 %v4265_v14  ;;  %v4266_v52 = vunpack.i.l.bf16 %v4265_v14  ;;  %v3369_v54 = vpop.permute.xlu1 %3368 }
0x2b3b   : > { %v3410_v19 = vsel %vm387_vm0, %v3369_v54, %v5515_v51 }
0x2b3c   : > { %v3279_v47 = vmul.f32 %v4267_v31, %v3267_v44  ;;  %v3283_v41 = vmul.f32 %v4267_v31, %v3259_v55  ;;  %v3278_v2 = vmul.f32 %v4266_v52, %v3266_v36  ;;  %v3282_v61 = vmul.f32 %v4266_v52, %v3258_v8 }
0x2b3d   : > { %v3299_v43 = vpop.permute.xlu0 %3298 }
0x2b3e   : > { %v3305_v59 = vpop.permute.xlu1 %3304  ;;  %3386 = vrot.lane.b32.xlu0 %v3283_v41, %s4608_s28  ;;  %3384 = vrot.lane.b32.xlu1 %v3282_v61, %s4608_s28  ;;  %v3281_v30 = vadd.f32 %v3279_v47, %v5554_v35  ;;  %v3280_v17 = vadd.f32 %v3278_v2, %v5557_v11  ;;  %v3390_v35 = vsel %vm387_vm0, %v3297_v1, %v4895_v10 }
0x2b3f   : > { %v3393_v38 = vsel %vm3392_vm3, %v3390_v35, %v3305_v59  ;;  %v3391_v46 = vsel %vm387_vm0, %v3299_v43, %v4893_v5 }
0x2b41   : > { %v3323_v48 = vpop.permute.xlu0 %3322 }
0x2b42   : > { %v3329_v57 = vpop.permute.xlu1 %3328  ;;  %3288 = vrot.lane.b32.xlu0 %v3281_v30, %s4610_s11  ;;  %3286 = vrot.lane.b32.xlu1 %v3280_v17, %s4610_s11  ;;  %v3399_v58 = vsel %vm387_vm0, %v3323_v48, %v5077_v27  ;;  %s4498_s11 = scalar_lea.vmem %s5680_s15, 1024 }
0x2b43   : > { %p4499_p5 = scmp.ne.s32.totalorder %s5680_s15, %s4498_s11  ;;  %p4506_p2 = scmp.lt.s32.totalorder %s4504_s20, %s4498_s11 }
0x2b45   : > { %v3347_v51 = vpop.permute.xlu0 %3346  ;;  %p4500_p12 = pnand %p4499_p5, %p5786_p11  ;;  %p4507_p0 = por %p4506_p2, %p4505_p1 }
0x2b46   : > { %v3353_v6 = vpop.permute.xlu1 %3352  ;;  %v3405_v5 = vsel %vm387_vm0, %v3347_v51, %v5325_v29 }
0x2b47   : > { %v3406_v62 = vsel %vm3392_vm3, %v3404_v32, %v3353_v6  ;;  %p4501_p13 = pneg %p4500_p12 }
0x2b49   : > { %v3371_v25 = vpop.permute.xlu0 %3370  ;;  %p4508_p7 = pnand %p4507_p0, %p4501_p13 }
0x2b4a   : > { %v3411_v3 = vsel %vm387_vm0, %v3371_v25, %v5513_v4  ;;  %v3377_v56 = vpop.permute.xlu1 %3376  ;;  %v3398_v4 = vsel %vm387_vm0, %v3321_v37, %v5079_v42 }
0x2b4b   : > { %v3412_v28 = vsel %vm3392_vm3, %v3410_v19, %v3377_v56  ;;  %v3400_v40 = vsel %vm3392_vm3, %v3398_v4, %v3329_v57 }
0x2b4d   : > { %v3307_v11 = vpop.permute.xlu0 %3306 }
0x2b4e   : > { %v3313_v39 = vpop.permute.xlu1 %3312  ;;  %v3394_v20 = vsel %vm3392_vm3, %v3391_v46, %v3307_v11 }
0x2b4f   : > { %v3396_v34 = vsel %vm3395_vm4, %v3393_v38, %v3313_v39 }
0x2b50   : > { %3416 = vst [vmem:[%s5645_s12] sm:$0xff] %v3396_v34 }
0x2b51   : > { %v3331_v16 = vpop.permute.xlu0 %3330 }
0x2b52   : > { %v3337_v10 = vpop.permute.xlu1 %3336  ;;  %v3401_v13 = vsel %vm3392_vm3, %v3399_v58, %v3331_v16 }
0x2b53   : > { %v3402_v49 = vsel %vm3395_vm4, %v3400_v40, %v3337_v10 }
0x2b54   : > { %3417 = vst [vmem:[%s5645_s12 + $0x8] sm:$0xff] %v3402_v49 }
0x2b55   : > { %v3355_v22 = vpop.permute.xlu0 %3354 }
0x2b56   : > { %v3361_v21 = vpop.permute.xlu1 %3360  ;;  %v3407_v0 = vsel %vm3392_vm3, %v3405_v5, %v3355_v22 }
0x2b57   : > { %v3408_v23 = vsel %vm3395_vm4, %v3406_v62, %v3361_v21 }
0x2b58   : > { %3418 = vst [vmem:[%s5645_s12 + $0x10] sm:$0xff] %v3408_v23 }
0x2b59   : > { %v3379_v42 = vpop.permute.xlu0 %3378 }
0x2b5a   : > { %v3413_v63 = vsel %vm3392_vm3, %v3411_v3, %v3379_v42 }
0x2b5d   : > { %v3315_v12 = vpop.permute.xlu0 %3314 }
0x2b5e   : > { %v3397_v60 = vsel %vm3395_vm4, %v3394_v20, %v3315_v12 }
0x2b5f   : > { %3420 = vst [vmem:[%s5645_s12 + $0x20] sm:$0xff] %v3397_v60 }
0x2b61   : > { %v3339_v45 = vpop.permute.xlu0 %3338 }
0x2b62   : > { %v3403_v50 = vsel %vm3395_vm4, %v3401_v13, %v3339_v45 }
0x2b63   : > { %3421 = vst [vmem:[%s5645_s12 + $0x28] sm:$0xff] %v3403_v50 }
0x2b65   : > { %v3363_v1 = vpop.permute.xlu0 %3362 }
0x2b66   : > { %v3409_v9 = vsel %vm3395_vm4, %v3407_v0, %v3363_v1 }
0x2b67   : > { %3422 = vst [vmem:[%s5645_s12 + $0x30] sm:$0xff] %v3409_v9 }
0x2bb0   : > { %v3387_v27 = vpop.permute.xlu0 %3386  ;;  %v3385_v29 = vpop.permute.xlu1 %3384 }
0x2bb1   : > { %v3415_v15 = vsel %vm3395_vm4, %v3413_v63, %v3387_v27  ;;  %v3414_v18 = vsel %vm3395_vm4, %v3412_v28, %v3385_v29 }
0x2bb2   : > { %3423 = vst [vmem:[%s5645_s12 + $0x38] sm:$0xff] %v3415_v15  ;;  %3419 = vst [vmem:[%s5645_s12 + $0x18] sm:$0xff] %v3414_v18 }
0x2bb3   : > { %4511 = shalt.err (!%p4508_p7)
}
0x2bb4   : > { %s4512_s12 = scalar_lea.hbm %s5688_s13, 1024  ;;  %s4516_s29 = scalar_lea.hbm %s5773_s5, 2048 }
0x2bb5   : > { %p4513_p3 = scmp.ne.s32.totalorder %s5688_s13, %s4512_s12  ;;  %p4517_p6 = scmp.lt.s32.totalorder %s5688_s13, %s5773_s5 }
0x2bb6   : > { %p4518_p4 = scmp.lt.s32.totalorder %s4516_s29, %s4512_s12 }
0x2bb7   : > { %p4514_p8 = pnand %p4513_p3, %p5786_p11 }
0x2bb8   : > { %p4519_p5 = por %p4518_p4, %p4517_p6 }
0x2bb9   : > { %p4515_p9 = pneg %p4514_p8 }
0x2bbb   : > { %p4520_p12 = pnand %p4519_p5, %p4515_p9 }
0x2bbd   : > { %4523 = shalt.err (!%p4520_p12)
}
0x2bbe   : > { %s4613_s11 = smov 512   ;;  %v3289_v26 = vpop.permute.xlu0 %3288  ;;  %v3287_v33 = vpop.permute.xlu1 %3286  ;;  %s3430_s19 = scalar_lea.sflag [#allocation9], %s4750_s3 }
0x2bbf   : > { %4119 = dma.vmem_to_hbm [thread:$0]  (%p5786_p11), %s5680_s15, 1024, %s5688_s13, %s3425_s25, %s4613_s11, %s4613_s11, %s4611_s16  }
0x2bc0   : > { %3293 = vst.msk [vmem:[%s5676_s17 + $0x8] sm:$0xff] %vm387_vm0, %v3289_v26  ;;  %3292 = vst.msk [vmem:[%s5676_s17] sm:$0xff] %vm387_vm0, %v3287_v33  ;;  %s4524_s8 = scalar_lea.vmem %s5683_s18, 256  ;;  %s4614_s20 = smov [#allocation8]  }
0x2bc1   : > { %p4525_p13 = scmp.ne.s32.totalorder %s5683_s18, %s4524_s8  ;;  %s4528_s12 = sshll.u32 %s4614_s20, 4  ;;  %s4529_s12 = int_to_ptr.vmem [resolvable:$false] %s4528_s12 }
0x2bc2   : > { %s4530_s26 = scalar_lea.vmem %s4529_s12, 512  ;;  %p4531_p0 = scmp.lt.s32.totalorder %s5683_s18, %s4529_s12 }
0x2bc3   : > { %p4526_p1 = pnand %p4525_p13, %p5786_p11  ;;  %p4532_p7 = scmp.lt.s32.totalorder %s4530_s26, %s4524_s8 }
0x2bc5   : > { %p4527_p2 = pneg %p4526_p1  ;;  %p4533_p3 = por %p4532_p7, %p4531_p0 }
0x2bc7   : > { %p4534_p8 = pnand %p4533_p3, %p4527_p2 }
0x2bc9   : > { %4537 = shalt.err (!%p4534_p8)
}
0x2bca   : > { %s4538_s16 = scalar_lea.hbm %s5695_s7, 256  ;;  %s4542_s13 = scalar_lea.hbm %s5774_s6, 512 }
0x2bcb   : > { %p4539_p9 = scmp.ne.s32.totalorder %s5695_s7, %s4538_s16  ;;  %p4543_p5 = scmp.lt.s32.totalorder %s5695_s7, %s5774_s6 }
0x2bcc   : > { %p4544_p12 = scmp.lt.s32.totalorder %s4542_s13, %s4538_s16 }
0x2bcd   : > { %p4540_p6 = pnand %p4539_p9, %p5786_p11 }
0x2bce   : > { %p4545_p13 = por %p4544_p12, %p4543_p5 }
0x2bcf   : > { %p4541_p4 = pneg %p4540_p6 }
0x2bd1   : > { %p4546_p1 = pnand %p4545_p13, %p4541_p4 }
0x2bd3   : > { %4549 = shalt.err (!%p4546_p1)
}
0x2bd4   : > { %s4615_s29 = smov 128   ;;  %s4616_s30 = smov 8  }
0x2bd5   : > { %4120 = dma.vmem_to_hbm [thread:$0]  (%p5786_p11), %s5683_s18, 256, %s5695_s7, %s3430_s19, %s4615_s29, %s4615_s29, %s4616_s30  }
0x2bd6 PF: > { %s3475_s14 = sand.u32 1, %s4584_s21   ;;  %p5787_p2 = scmp.ne.s32.totalorder %s5782_s10, 0 }
0x2bd7   : > { %s3476_s11 = scalar_lea.sflag [#allocation4], %s3475_s14 }
0x2bd8   : > { %p4128_p0 = pnand %p3590_p10, %p5787_p2 }
0x2bda   : > { %p4129_p7 = pneg %p4128_p0 }
0x2bdc   : > { %4575 = dma.done.wait (%p4129_p7), %s3476_s11, 1024  }
0x2bdd   : > { %4577 = vsyncadd (%p4129_p7), %s3476_s11, 4294966272  ;;  %s3485_s8 = scalar_lea.sflag [#allocation9], %s3475_s14 }
0x2bde   : > { %4579 = dma.done.wait (%p4129_p7), %s3485_s8, 256  }
0x2bdf   : > { %4581 = vsyncadd (%p4129_p7), %s3485_s8, 4294967040  ;;  %s5788_s9 = sld [smem:[#allocation17_spill]]  ;;  %p24_p11 = scmp.ge.s32.totalorder %s4677_s27, 4  }
0x2be0   : > { %s5789_s21 = smov %s4588_s22  ;;  %s5790_s22 = smov %s4592_s23 }
0x2be1   : > { %s5792_s24 = smov %s4677_s27  ;;  %26 = sbr.rel (!%p24_p11) target bundleno = 10 (0xa), region = 114 }
0x2be5   : > { %s5791_s23 = smov %s5788_s9 }
0x2be6   :  { %3490 = vsyncpa [#allocation3], 1 }
0x2be7   :  { %3492 = vsyncpa [#allocation3 + $0x1], 1 }
0x2be8   :  { %3493 = vsyncpa [#allocation6], 1 }
0x2be9   :  { %3494 = vsyncpa [#allocation4], 1 }
0x2bea   :  { %3496 = vsyncpa [#allocation4 + $0x1], 1 }
0x2beb   :  { %3497 = vsyncpa [#allocation9], 1 }
0x2bec   :  { %3499 = vsyncpa [#allocation9 + $0x1], 1 }

</bundles_post_ra>
